<compile_context>
chip_gen: v6e
topology: v6e:2x2x1
jax: 0.10.0
libtpu: 0.0.40
codegen_flags: <defaults>
</compile_context>

<pallas_src>
import math

import jax
import jax.numpy as jnp
from jax.experimental import pallas as pl
from jax.experimental.pallas import tpu as pltpu

# ---------------- model hyper-parameters (match the PyTorch module) --------------
NUM_CLASSES = 16
MAX_OUTPUT_LENGTH = 8
DIM = 32                    # d_model = 2 ** 5
NHEAD = 2
NUM_LAYERS = 2
DIM_FF = DIM                # dim_feedforward = dim
NEG_INF = -1e30
LN_EPS = 1e-5
OUT_PAD = 128               # lane-dense classifier output slab (>= NUM_CLASSES)

# Canonical ordering of stacked per-layer weights (shared by wrapper and kernel).
ENC_KEYS = ("sa_wq", "sa_bq", "sa_wkv", "sa_bkv", "sa_wo", "sa_bo",
            "ln1g", "ln1b", "w1", "b1", "w2", "b2", "ln2g", "ln2b")
DEC_KEYS = ("sa_wq", "sa_bq", "sa_wkv", "sa_bkv", "sa_wo", "sa_bo",
            "ca_wq", "ca_bq", "ca_wkv", "ca_bkv", "ca_wo", "ca_bo",
            "ln1g", "ln1b", "ln2g", "ln2b", "ln3g", "ln3b",
            "w1", "b1", "w2", "b2")


# ============================ in-kernel math helpers =============================
def _ln(x, g, b):
    """LayerNorm over last dim (biased variance, matching PyTorch)."""
    mu = jnp.mean(x, axis=-1, keepdims=True)
    xc = x - mu
    var = jnp.mean(xc * xc, axis=-1, keepdims=True)
    return xc * jax.lax.rsqrt(var + LN_EPS) * g + b


def _attn(x_q, x_kv, wq, bq, wkv, bkv, wo, bo, mask):
    """Multi-head attention on a single batch element.

    x_q: (Sq, E), x_kv: (Sk, E); wq: (E, E), wkv: (E, 2E), wo: (E, E).
    mask: (Sq, Sk) additive mask or None.
    """
    Sq, E = x_q.shape
    dh = E // NHEAD
    scale = 1.0 / math.sqrt(dh)

    q = jnp.dot(x_q, wq, preferred_element_type=jnp.float32) + bq      # (Sq, E)
    kv = jnp.dot(x_kv, wkv, preferred_element_type=jnp.float32) + bkv  # (Sk, 2E)
    k = kv[:, :E]
    v = kv[:, E:]

    acc = None
    for h in range(NHEAD):                                  # static, tiny unroll
        lo, hi = h * dh, (h + 1) * dh
        qh, kh, vh = q[:, lo:hi], k[:, lo:hi], v[:, lo:hi]
        s = jax.lax.dot_general(qh, kh, (((1,), (1,)), ((), ())),
                                preferred_element_type=jnp.float32) * scale
        if mask is not None:
            s = s + mask
        s = s - jnp.max(s, axis=-1, keepdims=True)
        p = jnp.exp(s)
        p = p * pl.reciprocal(jnp.sum(p, axis=-1, keepdims=True), approx=True)
        ctx = jnp.dot(p, vh, preferred_element_type=jnp.float32)       # (Sq, dh)
        # accumulate into output projection -> no head concatenation
        part = jnp.dot(ctx, wo[lo:hi, :], preferred_element_type=jnp.float32)
        acc = part if acc is None else acc + part
    return acc + bo


def _ffn(x, w1, b1, w2, b2):
    h = jnp.dot(x, w1, preferred_element_type=jnp.float32) + b1
    h = jnp.maximum(h, 0.0)
    return jnp.dot(h, w2, preferred_element_type=jnp.float32) + b2


# ================================ fused kernel ===================================
def _fwd_kernel(*refs):
    n_enc, n_dec = len(ENC_KEYS), len(DEC_KEYS)
    x_ref, y_ref, mask_ref = refs[0], refs[1], refs[2]
    enc = dict(zip(ENC_KEYS, refs[3:3 + n_enc]))
    dec = dict(zip(DEC_KEYS, refs[3 + n_enc:3 + n_enc + n_dec]))
    fc_w_ref = refs[3 + n_enc + n_dec]
    fc_b_ref = refs[4 + n_enc + n_dec]
    out_ref = refs[-1]

    x = x_ref[...]           # (Sx, E)  -- one batch element (batch is the grid axis)
    y = y_ref[...]           # (Sy, E)
    y_mask = mask_ref[...]   # (Sy, Sy) causal mask

    # ------------------------------ encoder stack -------------------------------
    for l in range(NUM_LAYERS):
        a = _attn(x, x,
                  enc["sa_wq"][l], enc["sa_bq"][l],
                  enc["sa_wkv"][l], enc["sa_bkv"][l],
                  enc["sa_wo"][l], enc["sa_bo"][l], mask=None)
        x = _ln(x + a, enc["ln1g"][l], enc["ln1b"][l])
        f = _ffn(x, enc["w1"][l], enc["b1"][l], enc["w2"][l], enc["b2"][l])
        x = _ln(x + f, enc["ln2g"][l], enc["ln2b"][l])

    # ------------------------------ decoder stack -------------------------------
    for l in range(NUM_LAYERS):
        a = _attn(y, y,
                  dec["sa_wq"][l], dec["sa_bq"][l],
                  dec["sa_wkv"][l], dec["sa_bkv"][l],
                  dec["sa_wo"][l], dec["sa_bo"][l], mask=y_mask)
        y = _ln(y + a, dec["ln1g"][l], dec["ln1b"][l])
        c = _attn(y, x,
                  dec["ca_wq"][l], dec["ca_bq"][l],
                  dec["ca_wkv"][l], dec["ca_bkv"][l],
                  dec["ca_wo"][l], dec["ca_bo"][l], mask=None)
        y = _ln(y + c, dec["ln2g"][l], dec["ln2b"][l])
        f = _ffn(y, dec["w1"][l], dec["b1"][l], dec["w2"][l], dec["b2"][l])
        y = _ln(y + f, dec["ln3g"][l], dec["ln3b"][l])

    # ----------------------------- final classifier -----------------------------
    # Lane-dense (Sy, 128) store; valid logits live in the first NUM_CLASSES lanes.
    out_ref[...] = jnp.dot(y, fc_w_ref[...],
                           preferred_element_type=jnp.float32) + fc_b_ref[...]


# ============================== wrapper / forward ================================
def transformer_forward(params, x_tokens, y_tokens):
    B, Sx = x_tokens.shape
    Sy = y_tokens.shape[1]
    scale = math.sqrt(DIM)

    # embedding gather + positional encoding (glue, stays in JAX)
    x = params["emb"][x_tokens] * scale + params["pe"][:Sx][None]      # (B, Sx, E)
    y = params["emb"][y_tokens] * scale + params["pe"][:Sy][None]      # (B, Sy, E)
    y_mask = params["y_mask"][:Sy, :Sy]                                # (Sy, Sy)

    weights = ([params["enc"][k] for k in ENC_KEYS]
               + [params["dec"][k] for k in DEC_KEYS]
               + [params["fc_w_pad"], params["fc_b_pad"]])

    def full_spec(shape):
        nd = len(shape)
        return pl.BlockSpec(shape, lambda b, _nd=nd: (0,) * _nd)

    in_specs = ([pl.BlockSpec((None, Sx, DIM), lambda b: (b, 0, 0)),
                 pl.BlockSpec((None, Sy, DIM), lambda b: (b, 0, 0)),
                 full_spec((Sy, Sy))]
                + [full_spec(w.shape) for w in weights])

    out = pl.pallas_call(
        _fwd_kernel,
        out_shape=jax.ShapeDtypeStruct((B, Sy, OUT_PAD), jnp.float32),
        grid=(B,),                                  # batch -> parallel grid axis
        in_specs=in_specs,
        out_specs=pl.BlockSpec((None, Sy, OUT_PAD), lambda b: (b, 0, 0)),
        compiler_params=pltpu.CompilerParams(
            dimension_semantics=("parallel",)),     # both TCs on v7x; loop on v5e/v6e
    )(x, y, y_mask, *weights)

    logits = out[:, :, :NUM_CLASSES]                # (B, Sy, C)
    return jnp.transpose(logits, (0, 2, 1))         # (B, C, Sy) == PyTorch output


forward = jax.jit(transformer_forward)


# =============================== parameter init ==================================
def make_pe(max_len, d):
    pos = jnp.arange(max_len, dtype=jnp.float32)[:, None]
    div = jnp.exp(jnp.arange(0, d, 2, dtype=jnp.float32) * (-math.log(10000.0) / d))
    pe = jnp.zeros((max_len, d), jnp.float32)
    pe = pe.at[:, 0::2].set(jnp.sin(pos * div))
    pe = pe.at[:, 1::2].set(jnp.cos(pos * div))
    return pe


def generate_square_subsequent_mask(size):
    i = jnp.arange(size)[:, None]
    j = jnp.arange(size)[None, :]
    return jnp.where(j <= i, 0.0, NEG_INF).astype(jnp.float32)


def init_params(key):
    E, F, L, C = DIM, DIM_FF, NUM_LAYERS, NUM_CLASSES
    keys = iter(jax.random.split(key, 128))

    def u(shape):
        return jax.random.uniform(next(keys), shape, jnp.float32, -0.1, 0.1)

    ones = lambda s: jnp.ones(s, jnp.float32)
    zeros = lambda s: jnp.zeros(s, jnp.float32)

    enc = dict(
        sa_wq=u((L, E, E)), sa_bq=u((L, 1, E)),
        sa_wkv=u((L, E, 2 * E)), sa_bkv=u((L, 1, 2 * E)),
        sa_wo=u((L, E, E)), sa_bo=u((L, 1, E)),
        ln1g=ones((L, 1, E)), ln1b=zeros((L, 1, E)),
        w1=u((L, E, F)), b1=u((L, 1, F)),
        w2=u((L, F, E)), b2=u((L, 1, E)),
        ln2g=ones((L, 1, E)), ln2b=zeros((L, 1, E)),
    )
    dec = dict(
        sa_wq=u((L, E, E)), sa_bq=u((L, 1, E)),
        sa_wkv=u((L, E, 2 * E)), sa_bkv=u((L, 1, 2 * E)),
        sa_wo=u((L, E, E)), sa_bo=u((L, 1, E)),
        ca_wq=u((L, E, E)), ca_bq=u((L, 1, E)),
        ca_wkv=u((L, E, 2 * E)), ca_bkv=u((L, 1, 2 * E)),
        ca_wo=u((L, E, E)), ca_bo=u((L, 1, E)),
        ln1g=ones((L, 1, E)), ln1b=zeros((L, 1, E)),
        ln2g=ones((L, 1, E)), ln2b=zeros((L, 1, E)),
        ln3g=ones((L, 1, E)), ln3b=zeros((L, 1, E)),
        w1=u((L, E, F)), b1=u((L, 1, F)),
        w2=u((L, F, E)), b2=u((L, 1, E)),
    )
    fc_w = u((E, C))
    fc_w_pad = jnp.zeros((E, OUT_PAD), jnp.float32).at[:, :C].set(fc_w)
    fc_b_pad = jnp.zeros((1, OUT_PAD), jnp.float32)   # fc bias zero-init (PyTorch init_weights)

    return dict(
        emb=u((C, E)),
        pe=make_pe(64, E),
        y_mask=generate_square_subsequent_mask(MAX_OUTPUT_LENGTH),
        enc=enc, dec=dec,
        fc_w_pad=fc_w_pad, fc_b_pad=fc_b_pad,
    )


# ==================================== main =======================================
if __name__ == "__main__":
    B, SX, SY = 2, 8, 6
    key = jax.random.PRNGKey(0)
    kx, ky, kp = jax.random.split(key, 3)
    x_tokens = jax.random.randint(kx, (B, SX), 0, NUM_CLASSES, dtype=jnp.int32)
    y_tokens = jax.random.randint(ky, (B, SY), 0, NUM_CLASSES, dtype=jnp.int32)
    params = init_params(kp)

    out = forward(params, x_tokens, y_tokens)
    out = jax.block_until_ready(out)

    assert out.shape == (B, NUM_CLASSES, SY), out.shape
    assert bool(jnp.all(jnp.isfinite(out)))
    print("KERNEL_OK")
</pallas_src>

<mosaic_0001>
module attributes {stable_mosaic.version = 11 : i64} {
  func.func @_fwd_kernel(%arg0: i32, %arg1: memref<1x8x32xf32, #tpu.memory_space<vmem>>, %arg2: memref<1x6x32xf32, #tpu.memory_space<vmem>>, %arg3: memref<6x6xf32, #tpu.memory_space<vmem>>, %arg4: memref<2x32x32xf32, #tpu.memory_space<vmem>>, %arg5: memref<2x1x32xf32, #tpu.memory_space<vmem>>, %arg6: memref<2x32x64xf32, #tpu.memory_space<vmem>>, %arg7: memref<2x1x64xf32, #tpu.memory_space<vmem>>, %arg8: memref<2x32x32xf32, #tpu.memory_space<vmem>>, %arg9: memref<2x1x32xf32, #tpu.memory_space<vmem>>, %arg10: memref<2x1x32xf32, #tpu.memory_space<vmem>>, %arg11: memref<2x1x32xf32, #tpu.memory_space<vmem>>, %arg12: memref<2x32x32xf32, #tpu.memory_space<vmem>>, %arg13: memref<2x1x32xf32, #tpu.memory_space<vmem>>, %arg14: memref<2x32x32xf32, #tpu.memory_space<vmem>>, %arg15: memref<2x1x32xf32, #tpu.memory_space<vmem>>, %arg16: memref<2x1x32xf32, #tpu.memory_space<vmem>>, %arg17: memref<2x1x32xf32, #tpu.memory_space<vmem>>, %arg18: memref<2x32x32xf32, #tpu.memory_space<vmem>>, %arg19: memref<2x1x32xf32, #tpu.memory_space<vmem>>, %arg20: memref<2x32x64xf32, #tpu.memory_space<vmem>>, %arg21: memref<2x1x64xf32, #tpu.memory_space<vmem>>, %arg22: memref<2x32x32xf32, #tpu.memory_space<vmem>>, %arg23: memref<2x1x32xf32, #tpu.memory_space<vmem>>, %arg24: memref<2x32x32xf32, #tpu.memory_space<vmem>>, %arg25: memref<2x1x32xf32, #tpu.memory_space<vmem>>, %arg26: memref<2x32x64xf32, #tpu.memory_space<vmem>>, %arg27: memref<2x1x64xf32, #tpu.memory_space<vmem>>, %arg28: memref<2x32x32xf32, #tpu.memory_space<vmem>>, %arg29: memref<2x1x32xf32, #tpu.memory_space<vmem>>, %arg30: memref<2x1x32xf32, #tpu.memory_space<vmem>>, %arg31: memref<2x1x32xf32, #tpu.memory_space<vmem>>, %arg32: memref<2x1x32xf32, #tpu.memory_space<vmem>>, %arg33: memref<2x1x32xf32, #tpu.memory_space<vmem>>, %arg34: memref<2x1x32xf32, #tpu.memory_space<vmem>>, %arg35: memref<2x1x32xf32, #tpu.memory_space<vmem>>, %arg36: memref<2x32x32xf32, #tpu.memory_space<vmem>>, %arg37: memref<2x1x32xf32, #tpu.memory_space<vmem>>, %arg38: memref<2x32x32xf32, #tpu.memory_space<vmem>>, %arg39: memref<2x1x32xf32, #tpu.memory_space<vmem>>, %arg40: memref<32x128xf32, #tpu.memory_space<vmem>>, %arg41: memref<1x128xf32, #tpu.memory_space<vmem>>, %arg42: memref<1x6x128xf32, #tpu.memory_space<vmem>>) attributes {dimension_semantics = [#tpu.dimension_semantics<parallel>], iteration_bounds = array<i64: 2>, scalar_prefetch = 0 : i64, scratch_operands = 0 : i64, tpu.core_type = #tpu.core_type<tc>, window_params = [{transform_indices = @transform_0, window_bounds = array<i64: 1, 8, 32>}, {transform_indices = @transform_1, window_bounds = array<i64: 1, 6, 32>}, {pipeline_mode = #tpu.pipeline_mode<synchronous>, transform_indices = @transform_2, window_bounds = array<i64: 6, 6>}, {pipeline_mode = #tpu.pipeline_mode<synchronous>, transform_indices = @transform_3, window_bounds = array<i64: 2, 32, 32>}, {pipeline_mode = #tpu.pipeline_mode<synchronous>, transform_indices = @transform_4, window_bounds = array<i64: 2, 1, 32>}, {pipeline_mode = #tpu.pipeline_mode<synchronous>, transform_indices = @transform_5, window_bounds = array<i64: 2, 32, 64>}, {pipeline_mode = #tpu.pipeline_mode<synchronous>, transform_indices = @transform_6, window_bounds = array<i64: 2, 1, 64>}, {pipeline_mode = #tpu.pipeline_mode<synchronous>, transform_indices = @transform_7, window_bounds = array<i64: 2, 32, 32>}, {pipeline_mode = #tpu.pipeline_mode<synchronous>, transform_indices = @transform_8, window_bounds = array<i64: 2, 1, 32>}, {pipeline_mode = #tpu.pipeline_mode<synchronous>, transform_indices = @transform_9, window_bounds = array<i64: 2, 1, 32>}, {pipeline_mode = #tpu.pipeline_mode<synchronous>, transform_indices = @transform_10, window_bounds = array<i64: 2, 1, 32>}, {pipeline_mode = #tpu.pipeline_mode<synchronous>, transform_indices = @transform_11, window_bounds = array<i64: 2, 32, 32>}, {pipeline_mode = #tpu.pipeline_mode<synchronous>, transform_indices = @transform_12, window_bounds = array<i64: 2, 1, 32>}, {pipeline_mode = #tpu.pipeline_mode<synchronous>, transform_indices = @transform_13, window_bounds = array<i64: 2, 32, 32>}, {pipeline_mode = #tpu.pipeline_mode<synchronous>, transform_indices = @transform_14, window_bounds = array<i64: 2, 1, 32>}, {pipeline_mode = #tpu.pipeline_mode<synchronous>, transform_indices = @transform_15, window_bounds = array<i64: 2, 1, 32>}, {pipeline_mode = #tpu.pipeline_mode<synchronous>, transform_indices = @transform_16, window_bounds = array<i64: 2, 1, 32>}, {pipeline_mode = #tpu.pipeline_mode<synchronous>, transform_indices = @transform_17, window_bounds = array<i64: 2, 32, 32>}, {pipeline_mode = #tpu.pipeline_mode<synchronous>, transform_indices = @transform_18, window_bounds = array<i64: 2, 1, 32>}, {pipeline_mode = #tpu.pipeline_mode<synchronous>, transform_indices = @transform_19, window_bounds = array<i64: 2, 32, 64>}, {pipeline_mode = #tpu.pipeline_mode<synchronous>, transform_indices = @transform_20, window_bounds = array<i64: 2, 1, 64>}, {pipeline_mode = #tpu.pipeline_mode<synchronous>, transform_indices = @transform_21, window_bounds = array<i64: 2, 32, 32>}, {pipeline_mode = #tpu.pipeline_mode<synchronous>, transform_indices = @transform_22, window_bounds = array<i64: 2, 1, 32>}, {pipeline_mode = #tpu.pipeline_mode<synchronous>, transform_indices = @transform_23, window_bounds = array<i64: 2, 32, 32>}, {pipeline_mode = #tpu.pipeline_mode<synchronous>, transform_indices = @transform_24, window_bounds = array<i64: 2, 1, 32>}, {pipeline_mode = #tpu.pipeline_mode<synchronous>, transform_indices = @transform_25, window_bounds = array<i64: 2, 32, 64>}, {pipeline_mode = #tpu.pipeline_mode<synchronous>, transform_indices = @transform_26, window_bounds = array<i64: 2, 1, 64>}, {pipeline_mode = #tpu.pipeline_mode<synchronous>, transform_indices = @transform_27, window_bounds = array<i64: 2, 32, 32>}, {pipeline_mode = #tpu.pipeline_mode<synchronous>, transform_indices = @transform_28, window_bounds = array<i64: 2, 1, 32>}, {pipeline_mode = #tpu.pipeline_mode<synchronous>, transform_indices = @transform_29, window_bounds = array<i64: 2, 1, 32>}, {pipeline_mode = #tpu.pipeline_mode<synchronous>, transform_indices = @transform_30, window_bounds = array<i64: 2, 1, 32>}, {pipeline_mode = #tpu.pipeline_mode<synchronous>, transform_indices = @transform_31, window_bounds = array<i64: 2, 1, 32>}, {pipeline_mode = #tpu.pipeline_mode<synchronous>, transform_indices = @transform_32, window_bounds = array<i64: 2, 1, 32>}, {pipeline_mode = #tpu.pipeline_mode<synchronous>, transform_indices = @transform_33, window_bounds = array<i64: 2, 1, 32>}, {pipeline_mode = #tpu.pipeline_mode<synchronous>, transform_indices = @transform_34, window_bounds = array<i64: 2, 1, 32>}, {pipeline_mode = #tpu.pipeline_mode<synchronous>, transform_indices = @transform_35, window_bounds = array<i64: 2, 32, 32>}, {pipeline_mode = #tpu.pipeline_mode<synchronous>, transform_indices = @transform_36, window_bounds = array<i64: 2, 1, 32>}, {pipeline_mode = #tpu.pipeline_mode<synchronous>, transform_indices = @transform_37, window_bounds = array<i64: 2, 32, 32>}, {pipeline_mode = #tpu.pipeline_mode<synchronous>, transform_indices = @transform_38, window_bounds = array<i64: 2, 1, 32>}, {pipeline_mode = #tpu.pipeline_mode<synchronous>, transform_indices = @transform_39, window_bounds = array<i64: 32, 128>}, {pipeline_mode = #tpu.pipeline_mode<synchronous>, transform_indices = @transform_40, window_bounds = array<i64: 1, 128>}, {transform_indices = @transform_41, window_bounds = array<i64: 1, 6, 128>}]} {
    %c0 = arith.constant 0 : index
    %c0_0 = arith.constant 0 : index
    %c0_1 = arith.constant 0 : index
    %0 = vector.load %arg1[%c0, %c0_0, %c0_1] : memref<1x8x32xf32, #tpu.memory_space<vmem>>, vector<1x8x32xf32>
    %1 = vector.shape_cast %0 : vector<1x8x32xf32> to vector<8x32xf32>
    %c0_2 = arith.constant 0 : index
    %c0_3 = arith.constant 0 : index
    %c0_4 = arith.constant 0 : index
    %2 = vector.load %arg2[%c0_2, %c0_3, %c0_4] : memref<1x6x32xf32, #tpu.memory_space<vmem>>, vector<1x6x32xf32>
    %3 = vector.shape_cast %2 : vector<1x6x32xf32> to vector<6x32xf32>
    %c0_5 = arith.constant 0 : index
    %c0_6 = arith.constant 0 : index
    %4 = vector.load %arg3[%c0_5, %c0_6] : memref<6x6xf32, #tpu.memory_space<vmem>>, vector<6x6xf32>
    %c0_7 = arith.constant 0 : index
    %c0_8 = arith.constant 0 : index
    %c0_9 = arith.constant 0 : index
    %5 = vector.load %arg4[%c0_7, %c0_8, %c0_9] : memref<2x32x32xf32, #tpu.memory_space<vmem>>, vector<1x32x32xf32>
    %6 = vector.shape_cast %5 : vector<1x32x32xf32> to vector<32x32xf32>
    %c0_10 = arith.constant 0 : index
    %c0_11 = arith.constant 0 : index
    %c0_12 = arith.constant 0 : index
    %7 = vector.load %arg5[%c0_10, %c0_11, %c0_12] : memref<2x1x32xf32, #tpu.memory_space<vmem>>, vector<1x1x32xf32>
    %8 = vector.shape_cast %7 : vector<1x1x32xf32> to vector<1x32xf32>
    %c0_13 = arith.constant 0 : index
    %c0_14 = arith.constant 0 : index
    %c0_15 = arith.constant 0 : index
    %9 = vector.load %arg6[%c0_13, %c0_14, %c0_15] : memref<2x32x64xf32, #tpu.memory_space<vmem>>, vector<1x32x64xf32>
    %10 = vector.shape_cast %9 : vector<1x32x64xf32> to vector<32x64xf32>
    %c0_16 = arith.constant 0 : index
    %c0_17 = arith.constant 0 : index
    %c0_18 = arith.constant 0 : index
    %11 = vector.load %arg7[%c0_16, %c0_17, %c0_18] : memref<2x1x64xf32, #tpu.memory_space<vmem>>, vector<1x1x64xf32>
    %12 = vector.shape_cast %11 : vector<1x1x64xf32> to vector<1x64xf32>
    %c0_19 = arith.constant 0 : index
    %c0_20 = arith.constant 0 : index
    %c0_21 = arith.constant 0 : index
    %13 = vector.load %arg8[%c0_19, %c0_20, %c0_21] : memref<2x32x32xf32, #tpu.memory_space<vmem>>, vector<1x32x32xf32>
    %14 = vector.shape_cast %13 : vector<1x32x32xf32> to vector<32x32xf32>
    %c0_22 = arith.constant 0 : index
    %c0_23 = arith.constant 0 : index
    %c0_24 = arith.constant 0 : index
    %15 = vector.load %arg9[%c0_22, %c0_23, %c0_24] : memref<2x1x32xf32, #tpu.memory_space<vmem>>, vector<1x1x32xf32>
    %16 = vector.shape_cast %15 : vector<1x1x32xf32> to vector<1x32xf32>
    %cst = arith.constant dense<0.000000e+00> : vector<8x32xf32>
    %17 = tpu.matmul %1, %6, %cst {dimension_numbers = #tpu.dot_dimension_numbers<[1], [0], [0], [1], [0, 0, 1, 1], [], []>} : vector<8x32xf32>, vector<32x32xf32>, vector<8x32xf32> -> vector<8x32xf32>
    %18 = vector.broadcast %8 : vector<1x32xf32> to vector<8x32xf32>
    %19 = arith.addf %17, %18 : vector<8x32xf32>
    %cst_25 = arith.constant dense<0.000000e+00> : vector<8x64xf32>
    %20 = tpu.matmul %1, %10, %cst_25 {dimension_numbers = #tpu.dot_dimension_numbers<[1], [0], [0], [1], [0, 0, 1, 1], [], []>} : vector<8x32xf32>, vector<32x64xf32>, vector<8x64xf32> -> vector<8x64xf32>
    %21 = vector.broadcast %12 : vector<1x64xf32> to vector<8x64xf32>
    %22 = arith.addf %20, %21 : vector<8x64xf32>
    %23 = vector.extract_strided_slice %22 {offsets = [0, 0], sizes = [8, 32], strides = [1, 1]} : vector<8x64xf32> to vector<8x32xf32>
    %24 = vector.extract_strided_slice %22 {offsets = [0, 32], sizes = [8, 32], strides = [1, 1]} : vector<8x64xf32> to vector<8x32xf32>
    %25 = vector.extract_strided_slice %19 {offsets = [0, 0], sizes = [8, 16], strides = [1, 1]} : vector<8x32xf32> to vector<8x16xf32>
    %26 = vector.extract_strided_slice %23 {offsets = [0, 0], sizes = [8, 16], strides = [1, 1]} : vector<8x32xf32> to vector<8x16xf32>
    %27 = vector.extract_strided_slice %24 {offsets = [0, 0], sizes = [8, 16], strides = [1, 1]} : vector<8x32xf32> to vector<8x16xf32>
    %cst_26 = arith.constant dense<0.000000e+00> : vector<8x8xf32>
    %28 = tpu.matmul %25, %26, %cst_26 {dimension_numbers = #tpu.dot_dimension_numbers<[1], [1], [0], [0], [0, 0, 1, 0], [], []>} : vector<8x16xf32>, vector<8x16xf32>, vector<8x8xf32> -> vector<8x8xf32>
    %cst_27 = arith.constant 2.500000e-01 : f32
    %29 = vector.broadcast %cst_27 : f32 to vector<8x8xf32>
    %30 = arith.mulf %28, %29 : vector<8x8xf32>
    %cst_28 = arith.constant dense<0xFF800000> : vector<8xf32>
    %31 = vector.multi_reduction <maximumf>, %30, %cst_28 [1] : vector<8x8xf32> to vector<8xf32>
    %32 = vector.shape_cast %31 : vector<8xf32> to vector<8x1xf32>
    %33 = vector.broadcast %32 : vector<8x1xf32> to vector<8x8xf32>
    %34 = arith.subf %30, %33 : vector<8x8xf32>
    %35 = math.exp %34 : vector<8x8xf32>
    %cst_29 = arith.constant dense<0.000000e+00> : vector<8xf32>
    %36 = vector.multi_reduction <add>, %35, %cst_29 [1] : vector<8x8xf32> to vector<8xf32>
    %37 = vector.shape_cast %36 : vector<8xf32> to vector<8x1xf32>
    %38 = tpu.reciprocal %37 {approx = true} : vector<8x1xf32> -> vector<8x1xf32>
    %39 = vector.broadcast %38 : vector<8x1xf32> to vector<8x8xf32>
    %40 = arith.mulf %35, %39 : vector<8x8xf32>
    %cst_30 = arith.constant dense<0.000000e+00> : vector<8x16xf32>
    %41 = tpu.matmul %40, %27, %cst_30 {dimension_numbers = #tpu.dot_dimension_numbers<[1], [0], [0], [1], [0, 0, 1, 1], [], []>} : vector<8x8xf32>, vector<8x16xf32>, vector<8x16xf32> -> vector<8x16xf32>
    %42 = vector.extract_strided_slice %14 {offsets = [0, 0], sizes = [16, 32], strides = [1, 1]} : vector<32x32xf32> to vector<16x32xf32>
    %cst_31 = arith.constant dense<0.000000e+00> : vector<8x32xf32>
    %43 = tpu.matmul %41, %42, %cst_31 {dimension_numbers = #tpu.dot_dimension_numbers<[1], [0], [0], [1], [0, 0, 1, 1], [], []>} : vector<8x16xf32>, vector<16x32xf32>, vector<8x32xf32> -> vector<8x32xf32>
    %44 = vector.extract_strided_slice %19 {offsets = [0, 16], sizes = [8, 16], strides = [1, 1]} : vector<8x32xf32> to vector<8x16xf32>
    %45 = vector.extract_strided_slice %23 {offsets = [0, 16], sizes = [8, 16], strides = [1, 1]} : vector<8x32xf32> to vector<8x16xf32>
    %46 = vector.extract_strided_slice %24 {offsets = [0, 16], sizes = [8, 16], strides = [1, 1]} : vector<8x32xf32> to vector<8x16xf32>
    %cst_32 = arith.constant dense<0.000000e+00> : vector<8x8xf32>
    %47 = tpu.matmul %44, %45, %cst_32 {dimension_numbers = #tpu.dot_dimension_numbers<[1], [1], [0], [0], [0, 0, 1, 0], [], []>} : vector<8x16xf32>, vector<8x16xf32>, vector<8x8xf32> -> vector<8x8xf32>
    %cst_33 = arith.constant 2.500000e-01 : f32
    %48 = vector.broadcast %cst_33 : f32 to vector<8x8xf32>
    %49 = arith.mulf %47, %48 : vector<8x8xf32>
    %cst_34 = arith.constant dense<0xFF800000> : vector<8xf32>
    %50 = vector.multi_reduction <maximumf>, %49, %cst_34 [1] : vector<8x8xf32> to vector<8xf32>
    %51 = vector.shape_cast %50 : vector<8xf32> to vector<8x1xf32>
    %52 = vector.broadcast %51 : vector<8x1xf32> to vector<8x8xf32>
    %53 = arith.subf %49, %52 : vector<8x8xf32>
    %54 = math.exp %53 : vector<8x8xf32>
    %cst_35 = arith.constant dense<0.000000e+00> : vector<8xf32>
    %55 = vector.multi_reduction <add>, %54, %cst_35 [1] : vector<8x8xf32> to vector<8xf32>
    %56 = vector.shape_cast %55 : vector<8xf32> to vector<8x1xf32>
    %57 = tpu.reciprocal %56 {approx = true} : vector<8x1xf32> -> vector<8x1xf32>
    %58 = vector.broadcast %57 : vector<8x1xf32> to vector<8x8xf32>
    %59 = arith.mulf %54, %58 : vector<8x8xf32>
    %cst_36 = arith.constant dense<0.000000e+00> : vector<8x16xf32>
    %60 = tpu.matmul %59, %46, %cst_36 {dimension_numbers = #tpu.dot_dimension_numbers<[1], [0], [0], [1], [0, 0, 1, 1], [], []>} : vector<8x8xf32>, vector<8x16xf32>, vector<8x16xf32> -> vector<8x16xf32>
    %61 = vector.extract_strided_slice %14 {offsets = [16, 0], sizes = [16, 32], strides = [1, 1]} : vector<32x32xf32> to vector<16x32xf32>
    %cst_37 = arith.constant dense<0.000000e+00> : vector<8x32xf32>
    %62 = tpu.matmul %60, %61, %cst_37 {dimension_numbers = #tpu.dot_dimension_numbers<[1], [0], [0], [1], [0, 0, 1, 1], [], []>} : vector<8x16xf32>, vector<16x32xf32>, vector<8x32xf32> -> vector<8x32xf32>
    %63 = arith.addf %43, %62 : vector<8x32xf32>
    %64 = vector.broadcast %16 : vector<1x32xf32> to vector<8x32xf32>
    %65 = arith.addf %63, %64 : vector<8x32xf32>
    %66 = arith.addf %1, %65 : vector<8x32xf32>
    %c0_38 = arith.constant 0 : index
    %c0_39 = arith.constant 0 : index
    %c0_40 = arith.constant 0 : index
    %67 = vector.load %arg10[%c0_38, %c0_39, %c0_40] : memref<2x1x32xf32, #tpu.memory_space<vmem>>, vector<1x1x32xf32>
    %68 = vector.shape_cast %67 : vector<1x1x32xf32> to vector<1x32xf32>
    %c0_41 = arith.constant 0 : index
    %c0_42 = arith.constant 0 : index
    %c0_43 = arith.constant 0 : index
    %69 = vector.load %arg11[%c0_41, %c0_42, %c0_43] : memref<2x1x32xf32, #tpu.memory_space<vmem>>, vector<1x1x32xf32>
    %70 = vector.shape_cast %69 : vector<1x1x32xf32> to vector<1x32xf32>
    %cst_44 = arith.constant dense<0.000000e+00> : vector<8xf32>
    %71 = vector.multi_reduction <add>, %66, %cst_44 [1] : vector<8x32xf32> to vector<8xf32>
    %72 = vector.shape_cast %71 : vector<8xf32> to vector<8x1xf32>
    %cst_45 = arith.constant 3.200000e+01 : f32
    %73 = vector.broadcast %cst_45 : f32 to vector<8x1xf32>
    %74 = arith.divf %72, %73 : vector<8x1xf32>
    %75 = vector.broadcast %74 : vector<8x1xf32> to vector<8x32xf32>
    %76 = arith.subf %66, %75 : vector<8x32xf32>
    %77 = arith.mulf %76, %76 : vector<8x32xf32>
    %cst_46 = arith.constant dense<0.000000e+00> : vector<8xf32>
    %78 = vector.multi_reduction <add>, %77, %cst_46 [1] : vector<8x32xf32> to vector<8xf32>
    %79 = vector.shape_cast %78 : vector<8xf32> to vector<8x1xf32>
    %cst_47 = arith.constant 3.200000e+01 : f32
    %80 = vector.broadcast %cst_47 : f32 to vector<8x1xf32>
    %81 = arith.divf %79, %80 : vector<8x1xf32>
    %cst_48 = arith.constant 9.99999974E-6 : f32
    %82 = vector.broadcast %cst_48 : f32 to vector<8x1xf32>
    %83 = arith.addf %81, %82 : vector<8x1xf32>
    %84 = math.rsqrt %83 : vector<8x1xf32>
    %85 = vector.broadcast %84 : vector<8x1xf32> to vector<8x32xf32>
    %86 = arith.mulf %76, %85 : vector<8x32xf32>
    %87 = vector.broadcast %68 : vector<1x32xf32> to vector<8x32xf32>
    %88 = arith.mulf %86, %87 : vector<8x32xf32>
    %89 = vector.broadcast %70 : vector<1x32xf32> to vector<8x32xf32>
    %90 = arith.addf %88, %89 : vector<8x32xf32>
    %c0_49 = arith.constant 0 : index
    %c0_50 = arith.constant 0 : index
    %c0_51 = arith.constant 0 : index
    %91 = vector.load %arg12[%c0_49, %c0_50, %c0_51] : memref<2x32x32xf32, #tpu.memory_space<vmem>>, vector<1x32x32xf32>
    %92 = vector.shape_cast %91 : vector<1x32x32xf32> to vector<32x32xf32>
    %c0_52 = arith.constant 0 : index
    %c0_53 = arith.constant 0 : index
    %c0_54 = arith.constant 0 : index
    %93 = vector.load %arg13[%c0_52, %c0_53, %c0_54] : memref<2x1x32xf32, #tpu.memory_space<vmem>>, vector<1x1x32xf32>
    %94 = vector.shape_cast %93 : vector<1x1x32xf32> to vector<1x32xf32>
    %c0_55 = arith.constant 0 : index
    %c0_56 = arith.constant 0 : index
    %c0_57 = arith.constant 0 : index
    %95 = vector.load %arg14[%c0_55, %c0_56, %c0_57] : memref<2x32x32xf32, #tpu.memory_space<vmem>>, vector<1x32x32xf32>
    %96 = vector.shape_cast %95 : vector<1x32x32xf32> to vector<32x32xf32>
    %c0_58 = arith.constant 0 : index
    %c0_59 = arith.constant 0 : index
    %c0_60 = arith.constant 0 : index
    %97 = vector.load %arg15[%c0_58, %c0_59, %c0_60] : memref<2x1x32xf32, #tpu.memory_space<vmem>>, vector<1x1x32xf32>
    %98 = vector.shape_cast %97 : vector<1x1x32xf32> to vector<1x32xf32>
    %cst_61 = arith.constant dense<0.000000e+00> : vector<8x32xf32>
    %99 = tpu.matmul %90, %92, %cst_61 {dimension_numbers = #tpu.dot_dimension_numbers<[1], [0], [0], [1], [0, 0, 1, 1], [], []>} : vector<8x32xf32>, vector<32x32xf32>, vector<8x32xf32> -> vector<8x32xf32>
    %100 = vector.broadcast %94 : vector<1x32xf32> to vector<8x32xf32>
    %101 = arith.addf %99, %100 : vector<8x32xf32>
    %cst_62 = arith.constant 0.000000e+00 : f32
    %102 = vector.broadcast %cst_62 : f32 to vector<8x32xf32>
    %103 = arith.maximumf %101, %102 : vector<8x32xf32>
    %cst_63 = arith.constant dense<0.000000e+00> : vector<8x32xf32>
    %104 = tpu.matmul %103, %96, %cst_63 {dimension_numbers = #tpu.dot_dimension_numbers<[1], [0], [0], [1], [0, 0, 1, 1], [], []>} : vector<8x32xf32>, vector<32x32xf32>, vector<8x32xf32> -> vector<8x32xf32>
    %105 = vector.broadcast %98 : vector<1x32xf32> to vector<8x32xf32>
    %106 = arith.addf %104, %105 : vector<8x32xf32>
    %107 = arith.addf %90, %106 : vector<8x32xf32>
    %c0_64 = arith.constant 0 : index
    %c0_65 = arith.constant 0 : index
    %c0_66 = arith.constant 0 : index
    %108 = vector.load %arg16[%c0_64, %c0_65, %c0_66] : memref<2x1x32xf32, #tpu.memory_space<vmem>>, vector<1x1x32xf32>
    %109 = vector.shape_cast %108 : vector<1x1x32xf32> to vector<1x32xf32>
    %c0_67 = arith.constant 0 : index
    %c0_68 = arith.constant 0 : index
    %c0_69 = arith.constant 0 : index
    %110 = vector.load %arg17[%c0_67, %c0_68, %c0_69] : memref<2x1x32xf32, #tpu.memory_space<vmem>>, vector<1x1x32xf32>
    %111 = vector.shape_cast %110 : vector<1x1x32xf32> to vector<1x32xf32>
    %cst_70 = arith.constant dense<0.000000e+00> : vector<8xf32>
    %112 = vector.multi_reduction <add>, %107, %cst_70 [1] : vector<8x32xf32> to vector<8xf32>
    %113 = vector.shape_cast %112 : vector<8xf32> to vector<8x1xf32>
    %cst_71 = arith.constant 3.200000e+01 : f32
    %114 = vector.broadcast %cst_71 : f32 to vector<8x1xf32>
    %115 = arith.divf %113, %114 : vector<8x1xf32>
    %116 = vector.broadcast %115 : vector<8x1xf32> to vector<8x32xf32>
    %117 = arith.subf %107, %116 : vector<8x32xf32>
    %118 = arith.mulf %117, %117 : vector<8x32xf32>
    %cst_72 = arith.constant dense<0.000000e+00> : vector<8xf32>
    %119 = vector.multi_reduction <add>, %118, %cst_72 [1] : vector<8x32xf32> to vector<8xf32>
    %120 = vector.shape_cast %119 : vector<8xf32> to vector<8x1xf32>
    %cst_73 = arith.constant 3.200000e+01 : f32
    %121 = vector.broadcast %cst_73 : f32 to vector<8x1xf32>
    %122 = arith.divf %120, %121 : vector<8x1xf32>
    %cst_74 = arith.constant 9.99999974E-6 : f32
    %123 = vector.broadcast %cst_74 : f32 to vector<8x1xf32>
    %124 = arith.addf %122, %123 : vector<8x1xf32>
    %125 = math.rsqrt %124 : vector<8x1xf32>
    %126 = vector.broadcast %125 : vector<8x1xf32> to vector<8x32xf32>
    %127 = arith.mulf %117, %126 : vector<8x32xf32>
    %128 = vector.broadcast %109 : vector<1x32xf32> to vector<8x32xf32>
    %129 = arith.mulf %127, %128 : vector<8x32xf32>
    %130 = vector.broadcast %111 : vector<1x32xf32> to vector<8x32xf32>
    %131 = arith.addf %129, %130 : vector<8x32xf32>
    %c1 = arith.constant 1 : index
    %c0_75 = arith.constant 0 : index
    %c0_76 = arith.constant 0 : index
    %132 = vector.load %arg4[%c1, %c0_75, %c0_76] : memref<2x32x32xf32, #tpu.memory_space<vmem>>, vector<1x32x32xf32>
    %133 = vector.shape_cast %132 : vector<1x32x32xf32> to vector<32x32xf32>
    %c1_77 = arith.constant 1 : index
    %c0_78 = arith.constant 0 : index
    %c0_79 = arith.constant 0 : index
    %134 = vector.load %arg5[%c1_77, %c0_78, %c0_79] : memref<2x1x32xf32, #tpu.memory_space<vmem>>, vector<1x1x32xf32>
    %135 = vector.shape_cast %134 : vector<1x1x32xf32> to vector<1x32xf32>
    %c1_80 = arith.constant 1 : index
    %c0_81 = arith.constant 0 : index
    %c0_82 = arith.constant 0 : index
    %136 = vector.load %arg6[%c1_80, %c0_81, %c0_82] : memref<2x32x64xf32, #tpu.memory_space<vmem>>, vector<1x32x64xf32>
    %137 = vector.shape_cast %136 : vector<1x32x64xf32> to vector<32x64xf32>
    %c1_83 = arith.constant 1 : index
    %c0_84 = arith.constant 0 : index
    %c0_85 = arith.constant 0 : index
    %138 = vector.load %arg7[%c1_83, %c0_84, %c0_85] : memref<2x1x64xf32, #tpu.memory_space<vmem>>, vector<1x1x64xf32>
    %139 = vector.shape_cast %138 : vector<1x1x64xf32> to vector<1x64xf32>
    %c1_86 = arith.constant 1 : index
    %c0_87 = arith.constant 0 : index
    %c0_88 = arith.constant 0 : index
    %140 = vector.load %arg8[%c1_86, %c0_87, %c0_88] : memref<2x32x32xf32, #tpu.memory_space<vmem>>, vector<1x32x32xf32>
    %141 = vector.shape_cast %140 : vector<1x32x32xf32> to vector<32x32xf32>
    %c1_89 = arith.constant 1 : index
    %c0_90 = arith.constant 0 : index
    %c0_91 = arith.constant 0 : index
    %142 = vector.load %arg9[%c1_89, %c0_90, %c0_91] : memref<2x1x32xf32, #tpu.memory_space<vmem>>, vector<1x1x32xf32>
    %143 = vector.shape_cast %142 : vector<1x1x32xf32> to vector<1x32xf32>
    %cst_92 = arith.constant dense<0.000000e+00> : vector<8x32xf32>
    %144 = tpu.matmul %131, %133, %cst_92 {dimension_numbers = #tpu.dot_dimension_numbers<[1], [0], [0], [1], [0, 0, 1, 1], [], []>} : vector<8x32xf32>, vector<32x32xf32>, vector<8x32xf32> -> vector<8x32xf32>
    %145 = vector.broadcast %135 : vector<1x32xf32> to vector<8x32xf32>
    %146 = arith.addf %144, %145 : vector<8x32xf32>
    %cst_93 = arith.constant dense<0.000000e+00> : vector<8x64xf32>
    %147 = tpu.matmul %131, %137, %cst_93 {dimension_numbers = #tpu.dot_dimension_numbers<[1], [0], [0], [1], [0, 0, 1, 1], [], []>} : vector<8x32xf32>, vector<32x64xf32>, vector<8x64xf32> -> vector<8x64xf32>
    %148 = vector.broadcast %139 : vector<1x64xf32> to vector<8x64xf32>
    %149 = arith.addf %147, %148 : vector<8x64xf32>
    %150 = vector.extract_strided_slice %149 {offsets = [0, 0], sizes = [8, 32], strides = [1, 1]} : vector<8x64xf32> to vector<8x32xf32>
    %151 = vector.extract_strided_slice %149 {offsets = [0, 32], sizes = [8, 32], strides = [1, 1]} : vector<8x64xf32> to vector<8x32xf32>
    %152 = vector.extract_strided_slice %146 {offsets = [0, 0], sizes = [8, 16], strides = [1, 1]} : vector<8x32xf32> to vector<8x16xf32>
    %153 = vector.extract_strided_slice %150 {offsets = [0, 0], sizes = [8, 16], strides = [1, 1]} : vector<8x32xf32> to vector<8x16xf32>
    %154 = vector.extract_strided_slice %151 {offsets = [0, 0], sizes = [8, 16], strides = [1, 1]} : vector<8x32xf32> to vector<8x16xf32>
    %cst_94 = arith.constant dense<0.000000e+00> : vector<8x8xf32>
    %155 = tpu.matmul %152, %153, %cst_94 {dimension_numbers = #tpu.dot_dimension_numbers<[1], [1], [0], [0], [0, 0, 1, 0], [], []>} : vector<8x16xf32>, vector<8x16xf32>, vector<8x8xf32> -> vector<8x8xf32>
    %cst_95 = arith.constant 2.500000e-01 : f32
    %156 = vector.broadcast %cst_95 : f32 to vector<8x8xf32>
    %157 = arith.mulf %155, %156 : vector<8x8xf32>
    %cst_96 = arith.constant dense<0xFF800000> : vector<8xf32>
    %158 = vector.multi_reduction <maximumf>, %157, %cst_96 [1] : vector<8x8xf32> to vector<8xf32>
    %159 = vector.shape_cast %158 : vector<8xf32> to vector<8x1xf32>
    %160 = vector.broadcast %159 : vector<8x1xf32> to vector<8x8xf32>
    %161 = arith.subf %157, %160 : vector<8x8xf32>
    %162 = math.exp %161 : vector<8x8xf32>
    %cst_97 = arith.constant dense<0.000000e+00> : vector<8xf32>
    %163 = vector.multi_reduction <add>, %162, %cst_97 [1] : vector<8x8xf32> to vector<8xf32>
    %164 = vector.shape_cast %163 : vector<8xf32> to vector<8x1xf32>
    %165 = tpu.reciprocal %164 {approx = true} : vector<8x1xf32> -> vector<8x1xf32>
    %166 = vector.broadcast %165 : vector<8x1xf32> to vector<8x8xf32>
    %167 = arith.mulf %162, %166 : vector<8x8xf32>
    %cst_98 = arith.constant dense<0.000000e+00> : vector<8x16xf32>
    %168 = tpu.matmul %167, %154, %cst_98 {dimension_numbers = #tpu.dot_dimension_numbers<[1], [0], [0], [1], [0, 0, 1, 1], [], []>} : vector<8x8xf32>, vector<8x16xf32>, vector<8x16xf32> -> vector<8x16xf32>
    %169 = vector.extract_strided_slice %141 {offsets = [0, 0], sizes = [16, 32], strides = [1, 1]} : vector<32x32xf32> to vector<16x32xf32>
    %cst_99 = arith.constant dense<0.000000e+00> : vector<8x32xf32>
    %170 = tpu.matmul %168, %169, %cst_99 {dimension_numbers = #tpu.dot_dimension_numbers<[1], [0], [0], [1], [0, 0, 1, 1], [], []>} : vector<8x16xf32>, vector<16x32xf32>, vector<8x32xf32> -> vector<8x32xf32>
    %171 = vector.extract_strided_slice %146 {offsets = [0, 16], sizes = [8, 16], strides = [1, 1]} : vector<8x32xf32> to vector<8x16xf32>
    %172 = vector.extract_strided_slice %150 {offsets = [0, 16], sizes = [8, 16], strides = [1, 1]} : vector<8x32xf32> to vector<8x16xf32>
    %173 = vector.extract_strided_slice %151 {offsets = [0, 16], sizes = [8, 16], strides = [1, 1]} : vector<8x32xf32> to vector<8x16xf32>
    %cst_100 = arith.constant dense<0.000000e+00> : vector<8x8xf32>
    %174 = tpu.matmul %171, %172, %cst_100 {dimension_numbers = #tpu.dot_dimension_numbers<[1], [1], [0], [0], [0, 0, 1, 0], [], []>} : vector<8x16xf32>, vector<8x16xf32>, vector<8x8xf32> -> vector<8x8xf32>
    %cst_101 = arith.constant 2.500000e-01 : f32
    %175 = vector.broadcast %cst_101 : f32 to vector<8x8xf32>
    %176 = arith.mulf %174, %175 : vector<8x8xf32>
    %cst_102 = arith.constant dense<0xFF800000> : vector<8xf32>
    %177 = vector.multi_reduction <maximumf>, %176, %cst_102 [1] : vector<8x8xf32> to vector<8xf32>
    %178 = vector.shape_cast %177 : vector<8xf32> to vector<8x1xf32>
    %179 = vector.broadcast %178 : vector<8x1xf32> to vector<8x8xf32>
    %180 = arith.subf %176, %179 : vector<8x8xf32>
    %181 = math.exp %180 : vector<8x8xf32>
    %cst_103 = arith.constant dense<0.000000e+00> : vector<8xf32>
    %182 = vector.multi_reduction <add>, %181, %cst_103 [1] : vector<8x8xf32> to vector<8xf32>
    %183 = vector.shape_cast %182 : vector<8xf32> to vector<8x1xf32>
    %184 = tpu.reciprocal %183 {approx = true} : vector<8x1xf32> -> vector<8x1xf32>
    %185 = vector.broadcast %184 : vector<8x1xf32> to vector<8x8xf32>
    %186 = arith.mulf %181, %185 : vector<8x8xf32>
    %cst_104 = arith.constant dense<0.000000e+00> : vector<8x16xf32>
    %187 = tpu.matmul %186, %173, %cst_104 {dimension_numbers = #tpu.dot_dimension_numbers<[1], [0], [0], [1], [0, 0, 1, 1], [], []>} : vector<8x8xf32>, vector<8x16xf32>, vector<8x16xf32> -> vector<8x16xf32>
    %188 = vector.extract_strided_slice %141 {offsets = [16, 0], sizes = [16, 32], strides = [1, 1]} : vector<32x32xf32> to vector<16x32xf32>
    %cst_105 = arith.constant dense<0.000000e+00> : vector<8x32xf32>
    %189 = tpu.matmul %187, %188, %cst_105 {dimension_numbers = #tpu.dot_dimension_numbers<[1], [0], [0], [1], [0, 0, 1, 1], [], []>} : vector<8x16xf32>, vector<16x32xf32>, vector<8x32xf32> -> vector<8x32xf32>
    %190 = arith.addf %170, %189 : vector<8x32xf32>
    %191 = vector.broadcast %143 : vector<1x32xf32> to vector<8x32xf32>
    %192 = arith.addf %190, %191 : vector<8x32xf32>
    %193 = arith.addf %131, %192 : vector<8x32xf32>
    %c1_106 = arith.constant 1 : index
    %c0_107 = arith.constant 0 : index
    %c0_108 = arith.constant 0 : index
    %194 = vector.load %arg10[%c1_106, %c0_107, %c0_108] : memref<2x1x32xf32, #tpu.memory_space<vmem>>, vector<1x1x32xf32>
    %195 = vector.shape_cast %194 : vector<1x1x32xf32> to vector<1x32xf32>
    %c1_109 = arith.constant 1 : index
    %c0_110 = arith.constant 0 : index
    %c0_111 = arith.constant 0 : index
    %196 = vector.load %arg11[%c1_109, %c0_110, %c0_111] : memref<2x1x32xf32, #tpu.memory_space<vmem>>, vector<1x1x32xf32>
    %197 = vector.shape_cast %196 : vector<1x1x32xf32> to vector<1x32xf32>
    %cst_112 = arith.constant dense<0.000000e+00> : vector<8xf32>
    %198 = vector.multi_reduction <add>, %193, %cst_112 [1] : vector<8x32xf32> to vector<8xf32>
    %199 = vector.shape_cast %198 : vector<8xf32> to vector<8x1xf32>
    %cst_113 = arith.constant 3.200000e+01 : f32
    %200 = vector.broadcast %cst_113 : f32 to vector<8x1xf32>
    %201 = arith.divf %199, %200 : vector<8x1xf32>
    %202 = vector.broadcast %201 : vector<8x1xf32> to vector<8x32xf32>
    %203 = arith.subf %193, %202 : vector<8x32xf32>
    %204 = arith.mulf %203, %203 : vector<8x32xf32>
    %cst_114 = arith.constant dense<0.000000e+00> : vector<8xf32>
    %205 = vector.multi_reduction <add>, %204, %cst_114 [1] : vector<8x32xf32> to vector<8xf32>
    %206 = vector.shape_cast %205 : vector<8xf32> to vector<8x1xf32>
    %cst_115 = arith.constant 3.200000e+01 : f32
    %207 = vector.broadcast %cst_115 : f32 to vector<8x1xf32>
    %208 = arith.divf %206, %207 : vector<8x1xf32>
    %cst_116 = arith.constant 9.99999974E-6 : f32
    %209 = vector.broadcast %cst_116 : f32 to vector<8x1xf32>
    %210 = arith.addf %208, %209 : vector<8x1xf32>
    %211 = math.rsqrt %210 : vector<8x1xf32>
    %212 = vector.broadcast %211 : vector<8x1xf32> to vector<8x32xf32>
    %213 = arith.mulf %203, %212 : vector<8x32xf32>
    %214 = vector.broadcast %195 : vector<1x32xf32> to vector<8x32xf32>
    %215 = arith.mulf %213, %214 : vector<8x32xf32>
    %216 = vector.broadcast %197 : vector<1x32xf32> to vector<8x32xf32>
    %217 = arith.addf %215, %216 : vector<8x32xf32>
    %c1_117 = arith.constant 1 : index
    %c0_118 = arith.constant 0 : index
    %c0_119 = arith.constant 0 : index
    %218 = vector.load %arg12[%c1_117, %c0_118, %c0_119] : memref<2x32x32xf32, #tpu.memory_space<vmem>>, vector<1x32x32xf32>
    %219 = vector.shape_cast %218 : vector<1x32x32xf32> to vector<32x32xf32>
    %c1_120 = arith.constant 1 : index
    %c0_121 = arith.constant 0 : index
    %c0_122 = arith.constant 0 : index
    %220 = vector.load %arg13[%c1_120, %c0_121, %c0_122] : memref<2x1x32xf32, #tpu.memory_space<vmem>>, vector<1x1x32xf32>
    %221 = vector.shape_cast %220 : vector<1x1x32xf32> to vector<1x32xf32>
    %c1_123 = arith.constant 1 : index
    %c0_124 = arith.constant 0 : index
    %c0_125 = arith.constant 0 : index
    %222 = vector.load %arg14[%c1_123, %c0_124, %c0_125] : memref<2x32x32xf32, #tpu.memory_space<vmem>>, vector<1x32x32xf32>
    %223 = vector.shape_cast %222 : vector<1x32x32xf32> to vector<32x32xf32>
    %c1_126 = arith.constant 1 : index
    %c0_127 = arith.constant 0 : index
    %c0_128 = arith.constant 0 : index
    %224 = vector.load %arg15[%c1_126, %c0_127, %c0_128] : memref<2x1x32xf32, #tpu.memory_space<vmem>>, vector<1x1x32xf32>
    %225 = vector.shape_cast %224 : vector<1x1x32xf32> to vector<1x32xf32>
    %cst_129 = arith.constant dense<0.000000e+00> : vector<8x32xf32>
    %226 = tpu.matmul %217, %219, %cst_129 {dimension_numbers = #tpu.dot_dimension_numbers<[1], [0], [0], [1], [0, 0, 1, 1], [], []>} : vector<8x32xf32>, vector<32x32xf32>, vector<8x32xf32> -> vector<8x32xf32>
    %227 = vector.broadcast %221 : vector<1x32xf32> to vector<8x32xf32>
    %228 = arith.addf %226, %227 : vector<8x32xf32>
    %cst_130 = arith.constant 0.000000e+00 : f32
    %229 = vector.broadcast %cst_130 : f32 to vector<8x32xf32>
    %230 = arith.maximumf %228, %229 : vector<8x32xf32>
    %cst_131 = arith.constant dense<0.000000e+00> : vector<8x32xf32>
    %231 = tpu.matmul %230, %223, %cst_131 {dimension_numbers = #tpu.dot_dimension_numbers<[1], [0], [0], [1], [0, 0, 1, 1], [], []>} : vector<8x32xf32>, vector<32x32xf32>, vector<8x32xf32> -> vector<8x32xf32>
    %232 = vector.broadcast %225 : vector<1x32xf32> to vector<8x32xf32>
    %233 = arith.addf %231, %232 : vector<8x32xf32>
    %234 = arith.addf %217, %233 : vector<8x32xf32>
    %c1_132 = arith.constant 1 : index
    %c0_133 = arith.constant 0 : index
    %c0_134 = arith.constant 0 : index
    %235 = vector.load %arg16[%c1_132, %c0_133, %c0_134] : memref<2x1x32xf32, #tpu.memory_space<vmem>>, vector<1x1x32xf32>
    %236 = vector.shape_cast %235 : vector<1x1x32xf32> to vector<1x32xf32>
    %c1_135 = arith.constant 1 : index
    %c0_136 = arith.constant 0 : index
    %c0_137 = arith.constant 0 : index
    %237 = vector.load %arg17[%c1_135, %c0_136, %c0_137] : memref<2x1x32xf32, #tpu.memory_space<vmem>>, vector<1x1x32xf32>
    %238 = vector.shape_cast %237 : vector<1x1x32xf32> to vector<1x32xf32>
    %cst_138 = arith.constant dense<0.000000e+00> : vector<8xf32>
    %239 = vector.multi_reduction <add>, %234, %cst_138 [1] : vector<8x32xf32> to vector<8xf32>
    %240 = vector.shape_cast %239 : vector<8xf32> to vector<8x1xf32>
    %cst_139 = arith.constant 3.200000e+01 : f32
    %241 = vector.broadcast %cst_139 : f32 to vector<8x1xf32>
    %242 = arith.divf %240, %241 : vector<8x1xf32>
    %243 = vector.broadcast %242 : vector<8x1xf32> to vector<8x32xf32>
    %244 = arith.subf %234, %243 : vector<8x32xf32>
    %245 = arith.mulf %244, %244 : vector<8x32xf32>
    %cst_140 = arith.constant dense<0.000000e+00> : vector<8xf32>
    %246 = vector.multi_reduction <add>, %245, %cst_140 [1] : vector<8x32xf32> to vector<8xf32>
    %247 = vector.shape_cast %246 : vector<8xf32> to vector<8x1xf32>
    %cst_141 = arith.constant 3.200000e+01 : f32
    %248 = vector.broadcast %cst_141 : f32 to vector<8x1xf32>
    %249 = arith.divf %247, %248 : vector<8x1xf32>
    %cst_142 = arith.constant 9.99999974E-6 : f32
    %250 = vector.broadcast %cst_142 : f32 to vector<8x1xf32>
    %251 = arith.addf %249, %250 : vector<8x1xf32>
    %252 = math.rsqrt %251 : vector<8x1xf32>
    %253 = vector.broadcast %252 : vector<8x1xf32> to vector<8x32xf32>
    %254 = arith.mulf %244, %253 : vector<8x32xf32>
    %255 = vector.broadcast %236 : vector<1x32xf32> to vector<8x32xf32>
    %256 = arith.mulf %254, %255 : vector<8x32xf32>
    %257 = vector.broadcast %238 : vector<1x32xf32> to vector<8x32xf32>
    %258 = arith.addf %256, %257 : vector<8x32xf32>
    %c0_143 = arith.constant 0 : index
    %c0_144 = arith.constant 0 : index
    %c0_145 = arith.constant 0 : index
    %259 = vector.load %arg18[%c0_143, %c0_144, %c0_145] : memref<2x32x32xf32, #tpu.memory_space<vmem>>, vector<1x32x32xf32>
    %260 = vector.shape_cast %259 : vector<1x32x32xf32> to vector<32x32xf32>
    %c0_146 = arith.constant 0 : index
    %c0_147 = arith.constant 0 : index
    %c0_148 = arith.constant 0 : index
    %261 = vector.load %arg19[%c0_146, %c0_147, %c0_148] : memref<2x1x32xf32, #tpu.memory_space<vmem>>, vector<1x1x32xf32>
    %262 = vector.shape_cast %261 : vector<1x1x32xf32> to vector<1x32xf32>
    %c0_149 = arith.constant 0 : index
    %c0_150 = arith.constant 0 : index
    %c0_151 = arith.constant 0 : index
    %263 = vector.load %arg20[%c0_149, %c0_150, %c0_151] : memref<2x32x64xf32, #tpu.memory_space<vmem>>, vector<1x32x64xf32>
    %264 = vector.shape_cast %263 : vector<1x32x64xf32> to vector<32x64xf32>
    %c0_152 = arith.constant 0 : index
    %c0_153 = arith.constant 0 : index
    %c0_154 = arith.constant 0 : index
    %265 = vector.load %arg21[%c0_152, %c0_153, %c0_154] : memref<2x1x64xf32, #tpu.memory_space<vmem>>, vector<1x1x64xf32>
    %266 = vector.shape_cast %265 : vector<1x1x64xf32> to vector<1x64xf32>
    %c0_155 = arith.constant 0 : index
    %c0_156 = arith.constant 0 : index
    %c0_157 = arith.constant 0 : index
    %267 = vector.load %arg22[%c0_155, %c0_156, %c0_157] : memref<2x32x32xf32, #tpu.memory_space<vmem>>, vector<1x32x32xf32>
    %268 = vector.shape_cast %267 : vector<1x32x32xf32> to vector<32x32xf32>
    %c0_158 = arith.constant 0 : index
    %c0_159 = arith.constant 0 : index
    %c0_160 = arith.constant 0 : index
    %269 = vector.load %arg23[%c0_158, %c0_159, %c0_160] : memref<2x1x32xf32, #tpu.memory_space<vmem>>, vector<1x1x32xf32>
    %270 = vector.shape_cast %269 : vector<1x1x32xf32> to vector<1x32xf32>
    %cst_161 = arith.constant dense<0.000000e+00> : vector<6x32xf32>
    %271 = tpu.matmul %3, %260, %cst_161 {dimension_numbers = #tpu.dot_dimension_numbers<[1], [0], [0], [1], [0, 0, 1, 1], [], []>} : vector<6x32xf32>, vector<32x32xf32>, vector<6x32xf32> -> vector<6x32xf32>
    %272 = vector.broadcast %262 : vector<1x32xf32> to vector<6x32xf32>
    %273 = arith.addf %271, %272 : vector<6x32xf32>
    %cst_162 = arith.constant dense<0.000000e+00> : vector<6x64xf32>
    %274 = tpu.matmul %3, %264, %cst_162 {dimension_numbers = #tpu.dot_dimension_numbers<[1], [0], [0], [1], [0, 0, 1, 1], [], []>} : vector<6x32xf32>, vector<32x64xf32>, vector<6x64xf32> -> vector<6x64xf32>
    %275 = vector.broadcast %266 : vector<1x64xf32> to vector<6x64xf32>
    %276 = arith.addf %274, %275 : vector<6x64xf32>
    %277 = vector.extract_strided_slice %276 {offsets = [0, 0], sizes = [6, 32], strides = [1, 1]} : vector<6x64xf32> to vector<6x32xf32>
    %278 = vector.extract_strided_slice %276 {offsets = [0, 32], sizes = [6, 32], strides = [1, 1]} : vector<6x64xf32> to vector<6x32xf32>
    %279 = vector.extract_strided_slice %273 {offsets = [0, 0], sizes = [6, 16], strides = [1, 1]} : vector<6x32xf32> to vector<6x16xf32>
    %280 = vector.extract_strided_slice %277 {offsets = [0, 0], sizes = [6, 16], strides = [1, 1]} : vector<6x32xf32> to vector<6x16xf32>
    %281 = vector.extract_strided_slice %278 {offsets = [0, 0], sizes = [6, 16], strides = [1, 1]} : vector<6x32xf32> to vector<6x16xf32>
    %cst_163 = arith.constant dense<0.000000e+00> : vector<6x6xf32>
    %282 = tpu.matmul %279, %280, %cst_163 {dimension_numbers = #tpu.dot_dimension_numbers<[1], [1], [0], [0], [0, 0, 1, 0], [], []>} : vector<6x16xf32>, vector<6x16xf32>, vector<6x6xf32> -> vector<6x6xf32>
    %cst_164 = arith.constant 2.500000e-01 : f32
    %283 = vector.broadcast %cst_164 : f32 to vector<6x6xf32>
    %284 = arith.mulf %282, %283 : vector<6x6xf32>
    %285 = arith.addf %284, %4 : vector<6x6xf32>
    %cst_165 = arith.constant dense<0xFF800000> : vector<6xf32>
    %286 = vector.multi_reduction <maximumf>, %285, %cst_165 [1] : vector<6x6xf32> to vector<6xf32>
    %287 = vector.shape_cast %286 : vector<6xf32> to vector<6x1xf32>
    %288 = vector.broadcast %287 : vector<6x1xf32> to vector<6x6xf32>
    %289 = arith.subf %285, %288 : vector<6x6xf32>
    %290 = math.exp %289 : vector<6x6xf32>
    %cst_166 = arith.constant dense<0.000000e+00> : vector<6xf32>
    %291 = vector.multi_reduction <add>, %290, %cst_166 [1] : vector<6x6xf32> to vector<6xf32>
    %292 = vector.shape_cast %291 : vector<6xf32> to vector<6x1xf32>
    %293 = tpu.reciprocal %292 {approx = true} : vector<6x1xf32> -> vector<6x1xf32>
    %294 = vector.broadcast %293 : vector<6x1xf32> to vector<6x6xf32>
    %295 = arith.mulf %290, %294 : vector<6x6xf32>
    %cst_167 = arith.constant dense<0.000000e+00> : vector<6x16xf32>
    %296 = tpu.matmul %295, %281, %cst_167 {dimension_numbers = #tpu.dot_dimension_numbers<[1], [0], [0], [1], [0, 0, 1, 1], [], []>} : vector<6x6xf32>, vector<6x16xf32>, vector<6x16xf32> -> vector<6x16xf32>
    %297 = vector.extract_strided_slice %268 {offsets = [0, 0], sizes = [16, 32], strides = [1, 1]} : vector<32x32xf32> to vector<16x32xf32>
    %cst_168 = arith.constant dense<0.000000e+00> : vector<6x32xf32>
    %298 = tpu.matmul %296, %297, %cst_168 {dimension_numbers = #tpu.dot_dimension_numbers<[1], [0], [0], [1], [0, 0, 1, 1], [], []>} : vector<6x16xf32>, vector<16x32xf32>, vector<6x32xf32> -> vector<6x32xf32>
    %299 = vector.extract_strided_slice %273 {offsets = [0, 16], sizes = [6, 16], strides = [1, 1]} : vector<6x32xf32> to vector<6x16xf32>
    %300 = vector.extract_strided_slice %277 {offsets = [0, 16], sizes = [6, 16], strides = [1, 1]} : vector<6x32xf32> to vector<6x16xf32>
    %301 = vector.extract_strided_slice %278 {offsets = [0, 16], sizes = [6, 16], strides = [1, 1]} : vector<6x32xf32> to vector<6x16xf32>
    %cst_169 = arith.constant dense<0.000000e+00> : vector<6x6xf32>
    %302 = tpu.matmul %299, %300, %cst_169 {dimension_numbers = #tpu.dot_dimension_numbers<[1], [1], [0], [0], [0, 0, 1, 0], [], []>} : vector<6x16xf32>, vector<6x16xf32>, vector<6x6xf32> -> vector<6x6xf32>
    %cst_170 = arith.constant 2.500000e-01 : f32
    %303 = vector.broadcast %cst_170 : f32 to vector<6x6xf32>
    %304 = arith.mulf %302, %303 : vector<6x6xf32>
    %305 = arith.addf %304, %4 : vector<6x6xf32>
    %cst_171 = arith.constant dense<0xFF800000> : vector<6xf32>
    %306 = vector.multi_reduction <maximumf>, %305, %cst_171 [1] : vector<6x6xf32> to vector<6xf32>
    %307 = vector.shape_cast %306 : vector<6xf32> to vector<6x1xf32>
    %308 = vector.broadcast %307 : vector<6x1xf32> to vector<6x6xf32>
    %309 = arith.subf %305, %308 : vector<6x6xf32>
    %310 = math.exp %309 : vector<6x6xf32>
    %cst_172 = arith.constant dense<0.000000e+00> : vector<6xf32>
    %311 = vector.multi_reduction <add>, %310, %cst_172 [1] : vector<6x6xf32> to vector<6xf32>
    %312 = vector.shape_cast %311 : vector<6xf32> to vector<6x1xf32>
    %313 = tpu.reciprocal %312 {approx = true} : vector<6x1xf32> -> vector<6x1xf32>
    %314 = vector.broadcast %313 : vector<6x1xf32> to vector<6x6xf32>
    %315 = arith.mulf %310, %314 : vector<6x6xf32>
    %cst_173 = arith.constant dense<0.000000e+00> : vector<6x16xf32>
    %316 = tpu.matmul %315, %301, %cst_173 {dimension_numbers = #tpu.dot_dimension_numbers<[1], [0], [0], [1], [0, 0, 1, 1], [], []>} : vector<6x6xf32>, vector<6x16xf32>, vector<6x16xf32> -> vector<6x16xf32>
    %317 = vector.extract_strided_slice %268 {offsets = [16, 0], sizes = [16, 32], strides = [1, 1]} : vector<32x32xf32> to vector<16x32xf32>
    %cst_174 = arith.constant dense<0.000000e+00> : vector<6x32xf32>
    %318 = tpu.matmul %316, %317, %cst_174 {dimension_numbers = #tpu.dot_dimension_numbers<[1], [0], [0], [1], [0, 0, 1, 1], [], []>} : vector<6x16xf32>, vector<16x32xf32>, vector<6x32xf32> -> vector<6x32xf32>
    %319 = arith.addf %298, %318 : vector<6x32xf32>
    %320 = vector.broadcast %270 : vector<1x32xf32> to vector<6x32xf32>
    %321 = arith.addf %319, %320 : vector<6x32xf32>
    %322 = arith.addf %3, %321 : vector<6x32xf32>
    %c0_175 = arith.constant 0 : index
    %c0_176 = arith.constant 0 : index
    %c0_177 = arith.constant 0 : index
    %323 = vector.load %arg30[%c0_175, %c0_176, %c0_177] : memref<2x1x32xf32, #tpu.memory_space<vmem>>, vector<1x1x32xf32>
    %324 = vector.shape_cast %323 : vector<1x1x32xf32> to vector<1x32xf32>
    %c0_178 = arith.constant 0 : index
    %c0_179 = arith.constant 0 : index
    %c0_180 = arith.constant 0 : index
    %325 = vector.load %arg31[%c0_178, %c0_179, %c0_180] : memref<2x1x32xf32, #tpu.memory_space<vmem>>, vector<1x1x32xf32>
    %326 = vector.shape_cast %325 : vector<1x1x32xf32> to vector<1x32xf32>
    %cst_181 = arith.constant dense<0.000000e+00> : vector<6xf32>
    %327 = vector.multi_reduction <add>, %322, %cst_181 [1] : vector<6x32xf32> to vector<6xf32>
    %328 = vector.shape_cast %327 : vector<6xf32> to vector<6x1xf32>
    %cst_182 = arith.constant 3.200000e+01 : f32
    %329 = vector.broadcast %cst_182 : f32 to vector<6x1xf32>
    %330 = arith.divf %328, %329 : vector<6x1xf32>
    %331 = vector.broadcast %330 : vector<6x1xf32> to vector<6x32xf32>
    %332 = arith.subf %322, %331 : vector<6x32xf32>
    %333 = arith.mulf %332, %332 : vector<6x32xf32>
    %cst_183 = arith.constant dense<0.000000e+00> : vector<6xf32>
    %334 = vector.multi_reduction <add>, %333, %cst_183 [1] : vector<6x32xf32> to vector<6xf32>
    %335 = vector.shape_cast %334 : vector<6xf32> to vector<6x1xf32>
    %cst_184 = arith.constant 3.200000e+01 : f32
    %336 = vector.broadcast %cst_184 : f32 to vector<6x1xf32>
    %337 = arith.divf %335, %336 : vector<6x1xf32>
    %cst_185 = arith.constant 9.99999974E-6 : f32
    %338 = vector.broadcast %cst_185 : f32 to vector<6x1xf32>
    %339 = arith.addf %337, %338 : vector<6x1xf32>
    %340 = math.rsqrt %339 : vector<6x1xf32>
    %341 = vector.broadcast %340 : vector<6x1xf32> to vector<6x32xf32>
    %342 = arith.mulf %332, %341 : vector<6x32xf32>
    %343 = vector.broadcast %324 : vector<1x32xf32> to vector<6x32xf32>
    %344 = arith.mulf %342, %343 : vector<6x32xf32>
    %345 = vector.broadcast %326 : vector<1x32xf32> to vector<6x32xf32>
    %346 = arith.addf %344, %345 : vector<6x32xf32>
    %c0_186 = arith.constant 0 : index
    %c0_187 = arith.constant 0 : index
    %c0_188 = arith.constant 0 : index
    %347 = vector.load %arg24[%c0_186, %c0_187, %c0_188] : memref<2x32x32xf32, #tpu.memory_space<vmem>>, vector<1x32x32xf32>
    %348 = vector.shape_cast %347 : vector<1x32x32xf32> to vector<32x32xf32>
    %c0_189 = arith.constant 0 : index
    %c0_190 = arith.constant 0 : index
    %c0_191 = arith.constant 0 : index
    %349 = vector.load %arg25[%c0_189, %c0_190, %c0_191] : memref<2x1x32xf32, #tpu.memory_space<vmem>>, vector<1x1x32xf32>
    %350 = vector.shape_cast %349 : vector<1x1x32xf32> to vector<1x32xf32>
    %c0_192 = arith.constant 0 : index
    %c0_193 = arith.constant 0 : index
    %c0_194 = arith.constant 0 : index
    %351 = vector.load %arg26[%c0_192, %c0_193, %c0_194] : memref<2x32x64xf32, #tpu.memory_space<vmem>>, vector<1x32x64xf32>
    %352 = vector.shape_cast %351 : vector<1x32x64xf32> to vector<32x64xf32>
    %c0_195 = arith.constant 0 : index
    %c0_196 = arith.constant 0 : index
    %c0_197 = arith.constant 0 : index
    %353 = vector.load %arg27[%c0_195, %c0_196, %c0_197] : memref<2x1x64xf32, #tpu.memory_space<vmem>>, vector<1x1x64xf32>
    %354 = vector.shape_cast %353 : vector<1x1x64xf32> to vector<1x64xf32>
    %c0_198 = arith.constant 0 : index
    %c0_199 = arith.constant 0 : index
    %c0_200 = arith.constant 0 : index
    %355 = vector.load %arg28[%c0_198, %c0_199, %c0_200] : memref<2x32x32xf32, #tpu.memory_space<vmem>>, vector<1x32x32xf32>
    %356 = vector.shape_cast %355 : vector<1x32x32xf32> to vector<32x32xf32>
    %c0_201 = arith.constant 0 : index
    %c0_202 = arith.constant 0 : index
    %c0_203 = arith.constant 0 : index
    %357 = vector.load %arg29[%c0_201, %c0_202, %c0_203] : memref<2x1x32xf32, #tpu.memory_space<vmem>>, vector<1x1x32xf32>
    %358 = vector.shape_cast %357 : vector<1x1x32xf32> to vector<1x32xf32>
    %cst_204 = arith.constant dense<0.000000e+00> : vector<6x32xf32>
    %359 = tpu.matmul %346, %348, %cst_204 {dimension_numbers = #tpu.dot_dimension_numbers<[1], [0], [0], [1], [0, 0, 1, 1], [], []>} : vector<6x32xf32>, vector<32x32xf32>, vector<6x32xf32> -> vector<6x32xf32>
    %360 = vector.broadcast %350 : vector<1x32xf32> to vector<6x32xf32>
    %361 = arith.addf %359, %360 : vector<6x32xf32>
    %cst_205 = arith.constant dense<0.000000e+00> : vector<8x64xf32>
    %362 = tpu.matmul %258, %352, %cst_205 {dimension_numbers = #tpu.dot_dimension_numbers<[1], [0], [0], [1], [0, 0, 1, 1], [], []>} : vector<8x32xf32>, vector<32x64xf32>, vector<8x64xf32> -> vector<8x64xf32>
    %363 = vector.broadcast %354 : vector<1x64xf32> to vector<8x64xf32>
    %364 = arith.addf %362, %363 : vector<8x64xf32>
    %365 = vector.extract_strided_slice %364 {offsets = [0, 0], sizes = [8, 32], strides = [1, 1]} : vector<8x64xf32> to vector<8x32xf32>
    %366 = vector.extract_strided_slice %364 {offsets = [0, 32], sizes = [8, 32], strides = [1, 1]} : vector<8x64xf32> to vector<8x32xf32>
    %367 = vector.extract_strided_slice %361 {offsets = [0, 0], sizes = [6, 16], strides = [1, 1]} : vector<6x32xf32> to vector<6x16xf32>
    %368 = vector.extract_strided_slice %365 {offsets = [0, 0], sizes = [8, 16], strides = [1, 1]} : vector<8x32xf32> to vector<8x16xf32>
    %369 = vector.extract_strided_slice %366 {offsets = [0, 0], sizes = [8, 16], strides = [1, 1]} : vector<8x32xf32> to vector<8x16xf32>
    %cst_206 = arith.constant dense<0.000000e+00> : vector<6x8xf32>
    %370 = tpu.matmul %367, %368, %cst_206 {dimension_numbers = #tpu.dot_dimension_numbers<[1], [1], [0], [0], [0, 0, 1, 0], [], []>} : vector<6x16xf32>, vector<8x16xf32>, vector<6x8xf32> -> vector<6x8xf32>
    %cst_207 = arith.constant 2.500000e-01 : f32
    %371 = vector.broadcast %cst_207 : f32 to vector<6x8xf32>
    %372 = arith.mulf %370, %371 : vector<6x8xf32>
    %cst_208 = arith.constant dense<0xFF800000> : vector<6xf32>
    %373 = vector.multi_reduction <maximumf>, %372, %cst_208 [1] : vector<6x8xf32> to vector<6xf32>
    %374 = vector.shape_cast %373 : vector<6xf32> to vector<6x1xf32>
    %375 = vector.broadcast %374 : vector<6x1xf32> to vector<6x8xf32>
    %376 = arith.subf %372, %375 : vector<6x8xf32>
    %377 = math.exp %376 : vector<6x8xf32>
    %cst_209 = arith.constant dense<0.000000e+00> : vector<6xf32>
    %378 = vector.multi_reduction <add>, %377, %cst_209 [1] : vector<6x8xf32> to vector<6xf32>
    %379 = vector.shape_cast %378 : vector<6xf32> to vector<6x1xf32>
    %380 = tpu.reciprocal %379 {approx = true} : vector<6x1xf32> -> vector<6x1xf32>
    %381 = vector.broadcast %380 : vector<6x1xf32> to vector<6x8xf32>
    %382 = arith.mulf %377, %381 : vector<6x8xf32>
    %cst_210 = arith.constant dense<0.000000e+00> : vector<6x16xf32>
    %383 = tpu.matmul %382, %369, %cst_210 {dimension_numbers = #tpu.dot_dimension_numbers<[1], [0], [0], [1], [0, 0, 1, 1], [], []>} : vector<6x8xf32>, vector<8x16xf32>, vector<6x16xf32> -> vector<6x16xf32>
    %384 = vector.extract_strided_slice %356 {offsets = [0, 0], sizes = [16, 32], strides = [1, 1]} : vector<32x32xf32> to vector<16x32xf32>
    %cst_211 = arith.constant dense<0.000000e+00> : vector<6x32xf32>
    %385 = tpu.matmul %383, %384, %cst_211 {dimension_numbers = #tpu.dot_dimension_numbers<[1], [0], [0], [1], [0, 0, 1, 1], [], []>} : vector<6x16xf32>, vector<16x32xf32>, vector<6x32xf32> -> vector<6x32xf32>
    %386 = vector.extract_strided_slice %361 {offsets = [0, 16], sizes = [6, 16], strides = [1, 1]} : vector<6x32xf32> to vector<6x16xf32>
    %387 = vector.extract_strided_slice %365 {offsets = [0, 16], sizes = [8, 16], strides = [1, 1]} : vector<8x32xf32> to vector<8x16xf32>
    %388 = vector.extract_strided_slice %366 {offsets = [0, 16], sizes = [8, 16], strides = [1, 1]} : vector<8x32xf32> to vector<8x16xf32>
    %cst_212 = arith.constant dense<0.000000e+00> : vector<6x8xf32>
    %389 = tpu.matmul %386, %387, %cst_212 {dimension_numbers = #tpu.dot_dimension_numbers<[1], [1], [0], [0], [0, 0, 1, 0], [], []>} : vector<6x16xf32>, vector<8x16xf32>, vector<6x8xf32> -> vector<6x8xf32>
    %cst_213 = arith.constant 2.500000e-01 : f32
    %390 = vector.broadcast %cst_213 : f32 to vector<6x8xf32>
    %391 = arith.mulf %389, %390 : vector<6x8xf32>
    %cst_214 = arith.constant dense<0xFF800000> : vector<6xf32>
    %392 = vector.multi_reduction <maximumf>, %391, %cst_214 [1] : vector<6x8xf32> to vector<6xf32>
    %393 = vector.shape_cast %392 : vector<6xf32> to vector<6x1xf32>
    %394 = vector.broadcast %393 : vector<6x1xf32> to vector<6x8xf32>
    %395 = arith.subf %391, %394 : vector<6x8xf32>
    %396 = math.exp %395 : vector<6x8xf32>
    %cst_215 = arith.constant dense<0.000000e+00> : vector<6xf32>
    %397 = vector.multi_reduction <add>, %396, %cst_215 [1] : vector<6x8xf32> to vector<6xf32>
    %398 = vector.shape_cast %397 : vector<6xf32> to vector<6x1xf32>
    %399 = tpu.reciprocal %398 {approx = true} : vector<6x1xf32> -> vector<6x1xf32>
    %400 = vector.broadcast %399 : vector<6x1xf32> to vector<6x8xf32>
    %401 = arith.mulf %396, %400 : vector<6x8xf32>
    %cst_216 = arith.constant dense<0.000000e+00> : vector<6x16xf32>
    %402 = tpu.matmul %401, %388, %cst_216 {dimension_numbers = #tpu.dot_dimension_numbers<[1], [0], [0], [1], [0, 0, 1, 1], [], []>} : vector<6x8xf32>, vector<8x16xf32>, vector<6x16xf32> -> vector<6x16xf32>
    %403 = vector.extract_strided_slice %356 {offsets = [16, 0], sizes = [16, 32], strides = [1, 1]} : vector<32x32xf32> to vector<16x32xf32>
    %cst_217 = arith.constant dense<0.000000e+00> : vector<6x32xf32>
    %404 = tpu.matmul %402, %403, %cst_217 {dimension_numbers = #tpu.dot_dimension_numbers<[1], [0], [0], [1], [0, 0, 1, 1], [], []>} : vector<6x16xf32>, vector<16x32xf32>, vector<6x32xf32> -> vector<6x32xf32>
    %405 = arith.addf %385, %404 : vector<6x32xf32>
    %406 = vector.broadcast %358 : vector<1x32xf32> to vector<6x32xf32>
    %407 = arith.addf %405, %406 : vector<6x32xf32>
    %408 = arith.addf %346, %407 : vector<6x32xf32>
    %c0_218 = arith.constant 0 : index
    %c0_219 = arith.constant 0 : index
    %c0_220 = arith.constant 0 : index
    %409 = vector.load %arg32[%c0_218, %c0_219, %c0_220] : memref<2x1x32xf32, #tpu.memory_space<vmem>>, vector<1x1x32xf32>
    %410 = vector.shape_cast %409 : vector<1x1x32xf32> to vector<1x32xf32>
    %c0_221 = arith.constant 0 : index
    %c0_222 = arith.constant 0 : index
    %c0_223 = arith.constant 0 : index
    %411 = vector.load %arg33[%c0_221, %c0_222, %c0_223] : memref<2x1x32xf32, #tpu.memory_space<vmem>>, vector<1x1x32xf32>
    %412 = vector.shape_cast %411 : vector<1x1x32xf32> to vector<1x32xf32>
    %cst_224 = arith.constant dense<0.000000e+00> : vector<6xf32>
    %413 = vector.multi_reduction <add>, %408, %cst_224 [1] : vector<6x32xf32> to vector<6xf32>
    %414 = vector.shape_cast %413 : vector<6xf32> to vector<6x1xf32>
    %cst_225 = arith.constant 3.200000e+01 : f32
    %415 = vector.broadcast %cst_225 : f32 to vector<6x1xf32>
    %416 = arith.divf %414, %415 : vector<6x1xf32>
    %417 = vector.broadcast %416 : vector<6x1xf32> to vector<6x32xf32>
    %418 = arith.subf %408, %417 : vector<6x32xf32>
    %419 = arith.mulf %418, %418 : vector<6x32xf32>
    %cst_226 = arith.constant dense<0.000000e+00> : vector<6xf32>
    %420 = vector.multi_reduction <add>, %419, %cst_226 [1] : vector<6x32xf32> to vector<6xf32>
    %421 = vector.shape_cast %420 : vector<6xf32> to vector<6x1xf32>
    %cst_227 = arith.constant 3.200000e+01 : f32
    %422 = vector.broadcast %cst_227 : f32 to vector<6x1xf32>
    %423 = arith.divf %421, %422 : vector<6x1xf32>
    %cst_228 = arith.constant 9.99999974E-6 : f32
    %424 = vector.broadcast %cst_228 : f32 to vector<6x1xf32>
    %425 = arith.addf %423, %424 : vector<6x1xf32>
    %426 = math.rsqrt %425 : vector<6x1xf32>
    %427 = vector.broadcast %426 : vector<6x1xf32> to vector<6x32xf32>
    %428 = arith.mulf %418, %427 : vector<6x32xf32>
    %429 = vector.broadcast %410 : vector<1x32xf32> to vector<6x32xf32>
    %430 = arith.mulf %428, %429 : vector<6x32xf32>
    %431 = vector.broadcast %412 : vector<1x32xf32> to vector<6x32xf32>
    %432 = arith.addf %430, %431 : vector<6x32xf32>
    %c0_229 = arith.constant 0 : index
    %c0_230 = arith.constant 0 : index
    %c0_231 = arith.constant 0 : index
    %433 = vector.load %arg36[%c0_229, %c0_230, %c0_231] : memref<2x32x32xf32, #tpu.memory_space<vmem>>, vector<1x32x32xf32>
    %434 = vector.shape_cast %433 : vector<1x32x32xf32> to vector<32x32xf32>
    %c0_232 = arith.constant 0 : index
    %c0_233 = arith.constant 0 : index
    %c0_234 = arith.constant 0 : index
    %435 = vector.load %arg37[%c0_232, %c0_233, %c0_234] : memref<2x1x32xf32, #tpu.memory_space<vmem>>, vector<1x1x32xf32>
    %436 = vector.shape_cast %435 : vector<1x1x32xf32> to vector<1x32xf32>
    %c0_235 = arith.constant 0 : index
    %c0_236 = arith.constant 0 : index
    %c0_237 = arith.constant 0 : index
    %437 = vector.load %arg38[%c0_235, %c0_236, %c0_237] : memref<2x32x32xf32, #tpu.memory_space<vmem>>, vector<1x32x32xf32>
    %438 = vector.shape_cast %437 : vector<1x32x32xf32> to vector<32x32xf32>
    %c0_238 = arith.constant 0 : index
    %c0_239 = arith.constant 0 : index
    %c0_240 = arith.constant 0 : index
    %439 = vector.load %arg39[%c0_238, %c0_239, %c0_240] : memref<2x1x32xf32, #tpu.memory_space<vmem>>, vector<1x1x32xf32>
    %440 = vector.shape_cast %439 : vector<1x1x32xf32> to vector<1x32xf32>
    %cst_241 = arith.constant dense<0.000000e+00> : vector<6x32xf32>
    %441 = tpu.matmul %432, %434, %cst_241 {dimension_numbers = #tpu.dot_dimension_numbers<[1], [0], [0], [1], [0, 0, 1, 1], [], []>} : vector<6x32xf32>, vector<32x32xf32>, vector<6x32xf32> -> vector<6x32xf32>
    %442 = vector.broadcast %436 : vector<1x32xf32> to vector<6x32xf32>
    %443 = arith.addf %441, %442 : vector<6x32xf32>
    %cst_242 = arith.constant 0.000000e+00 : f32
    %444 = vector.broadcast %cst_242 : f32 to vector<6x32xf32>
    %445 = arith.maximumf %443, %444 : vector<6x32xf32>
    %cst_243 = arith.constant dense<0.000000e+00> : vector<6x32xf32>
    %446 = tpu.matmul %445, %438, %cst_243 {dimension_numbers = #tpu.dot_dimension_numbers<[1], [0], [0], [1], [0, 0, 1, 1], [], []>} : vector<6x32xf32>, vector<32x32xf32>, vector<6x32xf32> -> vector<6x32xf32>
    %447 = vector.broadcast %440 : vector<1x32xf32> to vector<6x32xf32>
    %448 = arith.addf %446, %447 : vector<6x32xf32>
    %449 = arith.addf %432, %448 : vector<6x32xf32>
    %c0_244 = arith.constant 0 : index
    %c0_245 = arith.constant 0 : index
    %c0_246 = arith.constant 0 : index
    %450 = vector.load %arg34[%c0_244, %c0_245, %c0_246] : memref<2x1x32xf32, #tpu.memory_space<vmem>>, vector<1x1x32xf32>
    %451 = vector.shape_cast %450 : vector<1x1x32xf32> to vector<1x32xf32>
    %c0_247 = arith.constant 0 : index
    %c0_248 = arith.constant 0 : index
    %c0_249 = arith.constant 0 : index
    %452 = vector.load %arg35[%c0_247, %c0_248, %c0_249] : memref<2x1x32xf32, #tpu.memory_space<vmem>>, vector<1x1x32xf32>
    %453 = vector.shape_cast %452 : vector<1x1x32xf32> to vector<1x32xf32>
    %cst_250 = arith.constant dense<0.000000e+00> : vector<6xf32>
    %454 = vector.multi_reduction <add>, %449, %cst_250 [1] : vector<6x32xf32> to vector<6xf32>
    %455 = vector.shape_cast %454 : vector<6xf32> to vector<6x1xf32>
    %cst_251 = arith.constant 3.200000e+01 : f32
    %456 = vector.broadcast %cst_251 : f32 to vector<6x1xf32>
    %457 = arith.divf %455, %456 : vector<6x1xf32>
    %458 = vector.broadcast %457 : vector<6x1xf32> to vector<6x32xf32>
    %459 = arith.subf %449, %458 : vector<6x32xf32>
    %460 = arith.mulf %459, %459 : vector<6x32xf32>
    %cst_252 = arith.constant dense<0.000000e+00> : vector<6xf32>
    %461 = vector.multi_reduction <add>, %460, %cst_252 [1] : vector<6x32xf32> to vector<6xf32>
    %462 = vector.shape_cast %461 : vector<6xf32> to vector<6x1xf32>
    %cst_253 = arith.constant 3.200000e+01 : f32
    %463 = vector.broadcast %cst_253 : f32 to vector<6x1xf32>
    %464 = arith.divf %462, %463 : vector<6x1xf32>
    %cst_254 = arith.constant 9.99999974E-6 : f32
    %465 = vector.broadcast %cst_254 : f32 to vector<6x1xf32>
    %466 = arith.addf %464, %465 : vector<6x1xf32>
    %467 = math.rsqrt %466 : vector<6x1xf32>
    %468 = vector.broadcast %467 : vector<6x1xf32> to vector<6x32xf32>
    %469 = arith.mulf %459, %468 : vector<6x32xf32>
    %470 = vector.broadcast %451 : vector<1x32xf32> to vector<6x32xf32>
    %471 = arith.mulf %469, %470 : vector<6x32xf32>
    %472 = vector.broadcast %453 : vector<1x32xf32> to vector<6x32xf32>
    %473 = arith.addf %471, %472 : vector<6x32xf32>
    %c1_255 = arith.constant 1 : index
    %c0_256 = arith.constant 0 : index
    %c0_257 = arith.constant 0 : index
    %474 = vector.load %arg18[%c1_255, %c0_256, %c0_257] : memref<2x32x32xf32, #tpu.memory_space<vmem>>, vector<1x32x32xf32>
    %475 = vector.shape_cast %474 : vector<1x32x32xf32> to vector<32x32xf32>
    %c1_258 = arith.constant 1 : index
    %c0_259 = arith.constant 0 : index
    %c0_260 = arith.constant 0 : index
    %476 = vector.load %arg19[%c1_258, %c0_259, %c0_260] : memref<2x1x32xf32, #tpu.memory_space<vmem>>, vector<1x1x32xf32>
    %477 = vector.shape_cast %476 : vector<1x1x32xf32> to vector<1x32xf32>
    %c1_261 = arith.constant 1 : index
    %c0_262 = arith.constant 0 : index
    %c0_263 = arith.constant 0 : index
    %478 = vector.load %arg20[%c1_261, %c0_262, %c0_263] : memref<2x32x64xf32, #tpu.memory_space<vmem>>, vector<1x32x64xf32>
    %479 = vector.shape_cast %478 : vector<1x32x64xf32> to vector<32x64xf32>
    %c1_264 = arith.constant 1 : index
    %c0_265 = arith.constant 0 : index
    %c0_266 = arith.constant 0 : index
    %480 = vector.load %arg21[%c1_264, %c0_265, %c0_266] : memref<2x1x64xf32, #tpu.memory_space<vmem>>, vector<1x1x64xf32>
    %481 = vector.shape_cast %480 : vector<1x1x64xf32> to vector<1x64xf32>
    %c1_267 = arith.constant 1 : index
    %c0_268 = arith.constant 0 : index
    %c0_269 = arith.constant 0 : index
    %482 = vector.load %arg22[%c1_267, %c0_268, %c0_269] : memref<2x32x32xf32, #tpu.memory_space<vmem>>, vector<1x32x32xf32>
    %483 = vector.shape_cast %482 : vector<1x32x32xf32> to vector<32x32xf32>
    %c1_270 = arith.constant 1 : index
    %c0_271 = arith.constant 0 : index
    %c0_272 = arith.constant 0 : index
    %484 = vector.load %arg23[%c1_270, %c0_271, %c0_272] : memref<2x1x32xf32, #tpu.memory_space<vmem>>, vector<1x1x32xf32>
    %485 = vector.shape_cast %484 : vector<1x1x32xf32> to vector<1x32xf32>
    %cst_273 = arith.constant dense<0.000000e+00> : vector<6x32xf32>
    %486 = tpu.matmul %473, %475, %cst_273 {dimension_numbers = #tpu.dot_dimension_numbers<[1], [0], [0], [1], [0, 0, 1, 1], [], []>} : vector<6x32xf32>, vector<32x32xf32>, vector<6x32xf32> -> vector<6x32xf32>
    %487 = vector.broadcast %477 : vector<1x32xf32> to vector<6x32xf32>
    %488 = arith.addf %486, %487 : vector<6x32xf32>
    %cst_274 = arith.constant dense<0.000000e+00> : vector<6x64xf32>
    %489 = tpu.matmul %473, %479, %cst_274 {dimension_numbers = #tpu.dot_dimension_numbers<[1], [0], [0], [1], [0, 0, 1, 1], [], []>} : vector<6x32xf32>, vector<32x64xf32>, vector<6x64xf32> -> vector<6x64xf32>
    %490 = vector.broadcast %481 : vector<1x64xf32> to vector<6x64xf32>
    %491 = arith.addf %489, %490 : vector<6x64xf32>
    %492 = vector.extract_strided_slice %491 {offsets = [0, 0], sizes = [6, 32], strides = [1, 1]} : vector<6x64xf32> to vector<6x32xf32>
    %493 = vector.extract_strided_slice %491 {offsets = [0, 32], sizes = [6, 32], strides = [1, 1]} : vector<6x64xf32> to vector<6x32xf32>
    %494 = vector.extract_strided_slice %488 {offsets = [0, 0], sizes = [6, 16], strides = [1, 1]} : vector<6x32xf32> to vector<6x16xf32>
    %495 = vector.extract_strided_slice %492 {offsets = [0, 0], sizes = [6, 16], strides = [1, 1]} : vector<6x32xf32> to vector<6x16xf32>
    %496 = vector.extract_strided_slice %493 {offsets = [0, 0], sizes = [6, 16], strides = [1, 1]} : vector<6x32xf32> to vector<6x16xf32>
    %cst_275 = arith.constant dense<0.000000e+00> : vector<6x6xf32>
    %497 = tpu.matmul %494, %495, %cst_275 {dimension_numbers = #tpu.dot_dimension_numbers<[1], [1], [0], [0], [0, 0, 1, 0], [], []>} : vector<6x16xf32>, vector<6x16xf32>, vector<6x6xf32> -> vector<6x6xf32>
    %cst_276 = arith.constant 2.500000e-01 : f32
    %498 = vector.broadcast %cst_276 : f32 to vector<6x6xf32>
    %499 = arith.mulf %497, %498 : vector<6x6xf32>
    %500 = arith.addf %499, %4 : vector<6x6xf32>
    %cst_277 = arith.constant dense<0xFF800000> : vector<6xf32>
    %501 = vector.multi_reduction <maximumf>, %500, %cst_277 [1] : vector<6x6xf32> to vector<6xf32>
    %502 = vector.shape_cast %501 : vector<6xf32> to vector<6x1xf32>
    %503 = vector.broadcast %502 : vector<6x1xf32> to vector<6x6xf32>
    %504 = arith.subf %500, %503 : vector<6x6xf32>
    %505 = math.exp %504 : vector<6x6xf32>
    %cst_278 = arith.constant dense<0.000000e+00> : vector<6xf32>
    %506 = vector.multi_reduction <add>, %505, %cst_278 [1] : vector<6x6xf32> to vector<6xf32>
    %507 = vector.shape_cast %506 : vector<6xf32> to vector<6x1xf32>
    %508 = tpu.reciprocal %507 {approx = true} : vector<6x1xf32> -> vector<6x1xf32>
    %509 = vector.broadcast %508 : vector<6x1xf32> to vector<6x6xf32>
    %510 = arith.mulf %505, %509 : vector<6x6xf32>
    %cst_279 = arith.constant dense<0.000000e+00> : vector<6x16xf32>
    %511 = tpu.matmul %510, %496, %cst_279 {dimension_numbers = #tpu.dot_dimension_numbers<[1], [0], [0], [1], [0, 0, 1, 1], [], []>} : vector<6x6xf32>, vector<6x16xf32>, vector<6x16xf32> -> vector<6x16xf32>
    %512 = vector.extract_strided_slice %483 {offsets = [0, 0], sizes = [16, 32], strides = [1, 1]} : vector<32x32xf32> to vector<16x32xf32>
    %cst_280 = arith.constant dense<0.000000e+00> : vector<6x32xf32>
    %513 = tpu.matmul %511, %512, %cst_280 {dimension_numbers = #tpu.dot_dimension_numbers<[1], [0], [0], [1], [0, 0, 1, 1], [], []>} : vector<6x16xf32>, vector<16x32xf32>, vector<6x32xf32> -> vector<6x32xf32>
    %514 = vector.extract_strided_slice %488 {offsets = [0, 16], sizes = [6, 16], strides = [1, 1]} : vector<6x32xf32> to vector<6x16xf32>
    %515 = vector.extract_strided_slice %492 {offsets = [0, 16], sizes = [6, 16], strides = [1, 1]} : vector<6x32xf32> to vector<6x16xf32>
    %516 = vector.extract_strided_slice %493 {offsets = [0, 16], sizes = [6, 16], strides = [1, 1]} : vector<6x32xf32> to vector<6x16xf32>
    %cst_281 = arith.constant dense<0.000000e+00> : vector<6x6xf32>
    %517 = tpu.matmul %514, %515, %cst_281 {dimension_numbers = #tpu.dot_dimension_numbers<[1], [1], [0], [0], [0, 0, 1, 0], [], []>} : vector<6x16xf32>, vector<6x16xf32>, vector<6x6xf32> -> vector<6x6xf32>
    %cst_282 = arith.constant 2.500000e-01 : f32
    %518 = vector.broadcast %cst_282 : f32 to vector<6x6xf32>
    %519 = arith.mulf %517, %518 : vector<6x6xf32>
    %520 = arith.addf %519, %4 : vector<6x6xf32>
    %cst_283 = arith.constant dense<0xFF800000> : vector<6xf32>
    %521 = vector.multi_reduction <maximumf>, %520, %cst_283 [1] : vector<6x6xf32> to vector<6xf32>
    %522 = vector.shape_cast %521 : vector<6xf32> to vector<6x1xf32>
    %523 = vector.broadcast %522 : vector<6x1xf32> to vector<6x6xf32>
    %524 = arith.subf %520, %523 : vector<6x6xf32>
    %525 = math.exp %524 : vector<6x6xf32>
    %cst_284 = arith.constant dense<0.000000e+00> : vector<6xf32>
    %526 = vector.multi_reduction <add>, %525, %cst_284 [1] : vector<6x6xf32> to vector<6xf32>
    %527 = vector.shape_cast %526 : vector<6xf32> to vector<6x1xf32>
    %528 = tpu.reciprocal %527 {approx = true} : vector<6x1xf32> -> vector<6x1xf32>
    %529 = vector.broadcast %528 : vector<6x1xf32> to vector<6x6xf32>
    %530 = arith.mulf %525, %529 : vector<6x6xf32>
    %cst_285 = arith.constant dense<0.000000e+00> : vector<6x16xf32>
    %531 = tpu.matmul %530, %516, %cst_285 {dimension_numbers = #tpu.dot_dimension_numbers<[1], [0], [0], [1], [0, 0, 1, 1], [], []>} : vector<6x6xf32>, vector<6x16xf32>, vector<6x16xf32> -> vector<6x16xf32>
    %532 = vector.extract_strided_slice %483 {offsets = [16, 0], sizes = [16, 32], strides = [1, 1]} : vector<32x32xf32> to vector<16x32xf32>
    %cst_286 = arith.constant dense<0.000000e+00> : vector<6x32xf32>
    %533 = tpu.matmul %531, %532, %cst_286 {dimension_numbers = #tpu.dot_dimension_numbers<[1], [0], [0], [1], [0, 0, 1, 1], [], []>} : vector<6x16xf32>, vector<16x32xf32>, vector<6x32xf32> -> vector<6x32xf32>
    %534 = arith.addf %513, %533 : vector<6x32xf32>
    %535 = vector.broadcast %485 : vector<1x32xf32> to vector<6x32xf32>
    %536 = arith.addf %534, %535 : vector<6x32xf32>
    %537 = arith.addf %473, %536 : vector<6x32xf32>
    %c1_287 = arith.constant 1 : index
    %c0_288 = arith.constant 0 : index
    %c0_289 = arith.constant 0 : index
    %538 = vector.load %arg30[%c1_287, %c0_288, %c0_289] : memref<2x1x32xf32, #tpu.memory_space<vmem>>, vector<1x1x32xf32>
    %539 = vector.shape_cast %538 : vector<1x1x32xf32> to vector<1x32xf32>
    %c1_290 = arith.constant 1 : index
    %c0_291 = arith.constant 0 : index
    %c0_292 = arith.constant 0 : index
    %540 = vector.load %arg31[%c1_290, %c0_291, %c0_292] : memref<2x1x32xf32, #tpu.memory_space<vmem>>, vector<1x1x32xf32>
    %541 = vector.shape_cast %540 : vector<1x1x32xf32> to vector<1x32xf32>
    %cst_293 = arith.constant dense<0.000000e+00> : vector<6xf32>
    %542 = vector.multi_reduction <add>, %537, %cst_293 [1] : vector<6x32xf32> to vector<6xf32>
    %543 = vector.shape_cast %542 : vector<6xf32> to vector<6x1xf32>
    %cst_294 = arith.constant 3.200000e+01 : f32
    %544 = vector.broadcast %cst_294 : f32 to vector<6x1xf32>
    %545 = arith.divf %543, %544 : vector<6x1xf32>
    %546 = vector.broadcast %545 : vector<6x1xf32> to vector<6x32xf32>
    %547 = arith.subf %537, %546 : vector<6x32xf32>
    %548 = arith.mulf %547, %547 : vector<6x32xf32>
    %cst_295 = arith.constant dense<0.000000e+00> : vector<6xf32>
    %549 = vector.multi_reduction <add>, %548, %cst_295 [1] : vector<6x32xf32> to vector<6xf32>
    %550 = vector.shape_cast %549 : vector<6xf32> to vector<6x1xf32>
    %cst_296 = arith.constant 3.200000e+01 : f32
    %551 = vector.broadcast %cst_296 : f32 to vector<6x1xf32>
    %552 = arith.divf %550, %551 : vector<6x1xf32>
    %cst_297 = arith.constant 9.99999974E-6 : f32
    %553 = vector.broadcast %cst_297 : f32 to vector<6x1xf32>
    %554 = arith.addf %552, %553 : vector<6x1xf32>
    %555 = math.rsqrt %554 : vector<6x1xf32>
    %556 = vector.broadcast %555 : vector<6x1xf32> to vector<6x32xf32>
    %557 = arith.mulf %547, %556 : vector<6x32xf32>
    %558 = vector.broadcast %539 : vector<1x32xf32> to vector<6x32xf32>
    %559 = arith.mulf %557, %558 : vector<6x32xf32>
    %560 = vector.broadcast %541 : vector<1x32xf32> to vector<6x32xf32>
    %561 = arith.addf %559, %560 : vector<6x32xf32>
    %c1_298 = arith.constant 1 : index
    %c0_299 = arith.constant 0 : index
    %c0_300 = arith.constant 0 : index
    %562 = vector.load %arg24[%c1_298, %c0_299, %c0_300] : memref<2x32x32xf32, #tpu.memory_space<vmem>>, vector<1x32x32xf32>
    %563 = vector.shape_cast %562 : vector<1x32x32xf32> to vector<32x32xf32>
    %c1_301 = arith.constant 1 : index
    %c0_302 = arith.constant 0 : index
    %c0_303 = arith.constant 0 : index
    %564 = vector.load %arg25[%c1_301, %c0_302, %c0_303] : memref<2x1x32xf32, #tpu.memory_space<vmem>>, vector<1x1x32xf32>
    %565 = vector.shape_cast %564 : vector<1x1x32xf32> to vector<1x32xf32>
    %c1_304 = arith.constant 1 : index
    %c0_305 = arith.constant 0 : index
    %c0_306 = arith.constant 0 : index
    %566 = vector.load %arg26[%c1_304, %c0_305, %c0_306] : memref<2x32x64xf32, #tpu.memory_space<vmem>>, vector<1x32x64xf32>
    %567 = vector.shape_cast %566 : vector<1x32x64xf32> to vector<32x64xf32>
    %c1_307 = arith.constant 1 : index
    %c0_308 = arith.constant 0 : index
    %c0_309 = arith.constant 0 : index
    %568 = vector.load %arg27[%c1_307, %c0_308, %c0_309] : memref<2x1x64xf32, #tpu.memory_space<vmem>>, vector<1x1x64xf32>
    %569 = vector.shape_cast %568 : vector<1x1x64xf32> to vector<1x64xf32>
    %c1_310 = arith.constant 1 : index
    %c0_311 = arith.constant 0 : index
    %c0_312 = arith.constant 0 : index
    %570 = vector.load %arg28[%c1_310, %c0_311, %c0_312] : memref<2x32x32xf32, #tpu.memory_space<vmem>>, vector<1x32x32xf32>
    %571 = vector.shape_cast %570 : vector<1x32x32xf32> to vector<32x32xf32>
    %c1_313 = arith.constant 1 : index
    %c0_314 = arith.constant 0 : index
    %c0_315 = arith.constant 0 : index
    %572 = vector.load %arg29[%c1_313, %c0_314, %c0_315] : memref<2x1x32xf32, #tpu.memory_space<vmem>>, vector<1x1x32xf32>
    %573 = vector.shape_cast %572 : vector<1x1x32xf32> to vector<1x32xf32>
    %cst_316 = arith.constant dense<0.000000e+00> : vector<6x32xf32>
    %574 = tpu.matmul %561, %563, %cst_316 {dimension_numbers = #tpu.dot_dimension_numbers<[1], [0], [0], [1], [0, 0, 1, 1], [], []>} : vector<6x32xf32>, vector<32x32xf32>, vector<6x32xf32> -> vector<6x32xf32>
    %575 = vector.broadcast %565 : vector<1x32xf32> to vector<6x32xf32>
    %576 = arith.addf %574, %575 : vector<6x32xf32>
    %cst_317 = arith.constant dense<0.000000e+00> : vector<8x64xf32>
    %577 = tpu.matmul %258, %567, %cst_317 {dimension_numbers = #tpu.dot_dimension_numbers<[1], [0], [0], [1], [0, 0, 1, 1], [], []>} : vector<8x32xf32>, vector<32x64xf32>, vector<8x64xf32> -> vector<8x64xf32>
    %578 = vector.broadcast %569 : vector<1x64xf32> to vector<8x64xf32>
    %579 = arith.addf %577, %578 : vector<8x64xf32>
    %580 = vector.extract_strided_slice %579 {offsets = [0, 0], sizes = [8, 32], strides = [1, 1]} : vector<8x64xf32> to vector<8x32xf32>
    %581 = vector.extract_strided_slice %579 {offsets = [0, 32], sizes = [8, 32], strides = [1, 1]} : vector<8x64xf32> to vector<8x32xf32>
    %582 = vector.extract_strided_slice %576 {offsets = [0, 0], sizes = [6, 16], strides = [1, 1]} : vector<6x32xf32> to vector<6x16xf32>
    %583 = vector.extract_strided_slice %580 {offsets = [0, 0], sizes = [8, 16], strides = [1, 1]} : vector<8x32xf32> to vector<8x16xf32>
    %584 = vector.extract_strided_slice %581 {offsets = [0, 0], sizes = [8, 16], strides = [1, 1]} : vector<8x32xf32> to vector<8x16xf32>
    %cst_318 = arith.constant dense<0.000000e+00> : vector<6x8xf32>
    %585 = tpu.matmul %582, %583, %cst_318 {dimension_numbers = #tpu.dot_dimension_numbers<[1], [1], [0], [0], [0, 0, 1, 0], [], []>} : vector<6x16xf32>, vector<8x16xf32>, vector<6x8xf32> -> vector<6x8xf32>
    %cst_319 = arith.constant 2.500000e-01 : f32
    %586 = vector.broadcast %cst_319 : f32 to vector<6x8xf32>
    %587 = arith.mulf %585, %586 : vector<6x8xf32>
    %cst_320 = arith.constant dense<0xFF800000> : vector<6xf32>
    %588 = vector.multi_reduction <maximumf>, %587, %cst_320 [1] : vector<6x8xf32> to vector<6xf32>
    %589 = vector.shape_cast %588 : vector<6xf32> to vector<6x1xf32>
    %590 = vector.broadcast %589 : vector<6x1xf32> to vector<6x8xf32>
    %591 = arith.subf %587, %590 : vector<6x8xf32>
    %592 = math.exp %591 : vector<6x8xf32>
    %cst_321 = arith.constant dense<0.000000e+00> : vector<6xf32>
    %593 = vector.multi_reduction <add>, %592, %cst_321 [1] : vector<6x8xf32> to vector<6xf32>
    %594 = vector.shape_cast %593 : vector<6xf32> to vector<6x1xf32>
    %595 = tpu.reciprocal %594 {approx = true} : vector<6x1xf32> -> vector<6x1xf32>
    %596 = vector.broadcast %595 : vector<6x1xf32> to vector<6x8xf32>
    %597 = arith.mulf %592, %596 : vector<6x8xf32>
    %cst_322 = arith.constant dense<0.000000e+00> : vector<6x16xf32>
    %598 = tpu.matmul %597, %584, %cst_322 {dimension_numbers = #tpu.dot_dimension_numbers<[1], [0], [0], [1], [0, 0, 1, 1], [], []>} : vector<6x8xf32>, vector<8x16xf32>, vector<6x16xf32> -> vector<6x16xf32>
    %599 = vector.extract_strided_slice %571 {offsets = [0, 0], sizes = [16, 32], strides = [1, 1]} : vector<32x32xf32> to vector<16x32xf32>
    %cst_323 = arith.constant dense<0.000000e+00> : vector<6x32xf32>
    %600 = tpu.matmul %598, %599, %cst_323 {dimension_numbers = #tpu.dot_dimension_numbers<[1], [0], [0], [1], [0, 0, 1, 1], [], []>} : vector<6x16xf32>, vector<16x32xf32>, vector<6x32xf32> -> vector<6x32xf32>
    %601 = vector.extract_strided_slice %576 {offsets = [0, 16], sizes = [6, 16], strides = [1, 1]} : vector<6x32xf32> to vector<6x16xf32>
    %602 = vector.extract_strided_slice %580 {offsets = [0, 16], sizes = [8, 16], strides = [1, 1]} : vector<8x32xf32> to vector<8x16xf32>
    %603 = vector.extract_strided_slice %581 {offsets = [0, 16], sizes = [8, 16], strides = [1, 1]} : vector<8x32xf32> to vector<8x16xf32>
    %cst_324 = arith.constant dense<0.000000e+00> : vector<6x8xf32>
    %604 = tpu.matmul %601, %602, %cst_324 {dimension_numbers = #tpu.dot_dimension_numbers<[1], [1], [0], [0], [0, 0, 1, 0], [], []>} : vector<6x16xf32>, vector<8x16xf32>, vector<6x8xf32> -> vector<6x8xf32>
    %cst_325 = arith.constant 2.500000e-01 : f32
    %605 = vector.broadcast %cst_325 : f32 to vector<6x8xf32>
    %606 = arith.mulf %604, %605 : vector<6x8xf32>
    %cst_326 = arith.constant dense<0xFF800000> : vector<6xf32>
    %607 = vector.multi_reduction <maximumf>, %606, %cst_326 [1] : vector<6x8xf32> to vector<6xf32>
    %608 = vector.shape_cast %607 : vector<6xf32> to vector<6x1xf32>
    %609 = vector.broadcast %608 : vector<6x1xf32> to vector<6x8xf32>
    %610 = arith.subf %606, %609 : vector<6x8xf32>
    %611 = math.exp %610 : vector<6x8xf32>
    %cst_327 = arith.constant dense<0.000000e+00> : vector<6xf32>
    %612 = vector.multi_reduction <add>, %611, %cst_327 [1] : vector<6x8xf32> to vector<6xf32>
    %613 = vector.shape_cast %612 : vector<6xf32> to vector<6x1xf32>
    %614 = tpu.reciprocal %613 {approx = true} : vector<6x1xf32> -> vector<6x1xf32>
    %615 = vector.broadcast %614 : vector<6x1xf32> to vector<6x8xf32>
    %616 = arith.mulf %611, %615 : vector<6x8xf32>
    %cst_328 = arith.constant dense<0.000000e+00> : vector<6x16xf32>
    %617 = tpu.matmul %616, %603, %cst_328 {dimension_numbers = #tpu.dot_dimension_numbers<[1], [0], [0], [1], [0, 0, 1, 1], [], []>} : vector<6x8xf32>, vector<8x16xf32>, vector<6x16xf32> -> vector<6x16xf32>
    %618 = vector.extract_strided_slice %571 {offsets = [16, 0], sizes = [16, 32], strides = [1, 1]} : vector<32x32xf32> to vector<16x32xf32>
    %cst_329 = arith.constant dense<0.000000e+00> : vector<6x32xf32>
    %619 = tpu.matmul %617, %618, %cst_329 {dimension_numbers = #tpu.dot_dimension_numbers<[1], [0], [0], [1], [0, 0, 1, 1], [], []>} : vector<6x16xf32>, vector<16x32xf32>, vector<6x32xf32> -> vector<6x32xf32>
    %620 = arith.addf %600, %619 : vector<6x32xf32>
    %621 = vector.broadcast %573 : vector<1x32xf32> to vector<6x32xf32>
    %622 = arith.addf %620, %621 : vector<6x32xf32>
    %623 = arith.addf %561, %622 : vector<6x32xf32>
    %c1_330 = arith.constant 1 : index
    %c0_331 = arith.constant 0 : index
    %c0_332 = arith.constant 0 : index
    %624 = vector.load %arg32[%c1_330, %c0_331, %c0_332] : memref<2x1x32xf32, #tpu.memory_space<vmem>>, vector<1x1x32xf32>
    %625 = vector.shape_cast %624 : vector<1x1x32xf32> to vector<1x32xf32>
    %c1_333 = arith.constant 1 : index
    %c0_334 = arith.constant 0 : index
    %c0_335 = arith.constant 0 : index
    %626 = vector.load %arg33[%c1_333, %c0_334, %c0_335] : memref<2x1x32xf32, #tpu.memory_space<vmem>>, vector<1x1x32xf32>
    %627 = vector.shape_cast %626 : vector<1x1x32xf32> to vector<1x32xf32>
    %cst_336 = arith.constant dense<0.000000e+00> : vector<6xf32>
    %628 = vector.multi_reduction <add>, %623, %cst_336 [1] : vector<6x32xf32> to vector<6xf32>
    %629 = vector.shape_cast %628 : vector<6xf32> to vector<6x1xf32>
    %cst_337 = arith.constant 3.200000e+01 : f32
    %630 = vector.broadcast %cst_337 : f32 to vector<6x1xf32>
    %631 = arith.divf %629, %630 : vector<6x1xf32>
    %632 = vector.broadcast %631 : vector<6x1xf32> to vector<6x32xf32>
    %633 = arith.subf %623, %632 : vector<6x32xf32>
    %634 = arith.mulf %633, %633 : vector<6x32xf32>
    %cst_338 = arith.constant dense<0.000000e+00> : vector<6xf32>
    %635 = vector.multi_reduction <add>, %634, %cst_338 [1] : vector<6x32xf32> to vector<6xf32>
    %636 = vector.shape_cast %635 : vector<6xf32> to vector<6x1xf32>
    %cst_339 = arith.constant 3.200000e+01 : f32
    %637 = vector.broadcast %cst_339 : f32 to vector<6x1xf32>
    %638 = arith.divf %636, %637 : vector<6x1xf32>
    %cst_340 = arith.constant 9.99999974E-6 : f32
    %639 = vector.broadcast %cst_340 : f32 to vector<6x1xf32>
    %640 = arith.addf %638, %639 : vector<6x1xf32>
    %641 = math.rsqrt %640 : vector<6x1xf32>
    %642 = vector.broadcast %641 : vector<6x1xf32> to vector<6x32xf32>
    %643 = arith.mulf %633, %642 : vector<6x32xf32>
    %644 = vector.broadcast %625 : vector<1x32xf32> to vector<6x32xf32>
    %645 = arith.mulf %643, %644 : vector<6x32xf32>
    %646 = vector.broadcast %627 : vector<1x32xf32> to vector<6x32xf32>
    %647 = arith.addf %645, %646 : vector<6x32xf32>
    %c1_341 = arith.constant 1 : index
    %c0_342 = arith.constant 0 : index
    %c0_343 = arith.constant 0 : index
    %648 = vector.load %arg36[%c1_341, %c0_342, %c0_343] : memref<2x32x32xf32, #tpu.memory_space<vmem>>, vector<1x32x32xf32>
    %649 = vector.shape_cast %648 : vector<1x32x32xf32> to vector<32x32xf32>
    %c1_344 = arith.constant 1 : index
    %c0_345 = arith.constant 0 : index
    %c0_346 = arith.constant 0 : index
    %650 = vector.load %arg37[%c1_344, %c0_345, %c0_346] : memref<2x1x32xf32, #tpu.memory_space<vmem>>, vector<1x1x32xf32>
    %651 = vector.shape_cast %650 : vector<1x1x32xf32> to vector<1x32xf32>
    %c1_347 = arith.constant 1 : index
    %c0_348 = arith.constant 0 : index
    %c0_349 = arith.constant 0 : index
    %652 = vector.load %arg38[%c1_347, %c0_348, %c0_349] : memref<2x32x32xf32, #tpu.memory_space<vmem>>, vector<1x32x32xf32>
    %653 = vector.shape_cast %652 : vector<1x32x32xf32> to vector<32x32xf32>
    %c1_350 = arith.constant 1 : index
    %c0_351 = arith.constant 0 : index
    %c0_352 = arith.constant 0 : index
    %654 = vector.load %arg39[%c1_350, %c0_351, %c0_352] : memref<2x1x32xf32, #tpu.memory_space<vmem>>, vector<1x1x32xf32>
    %655 = vector.shape_cast %654 : vector<1x1x32xf32> to vector<1x32xf32>
    %cst_353 = arith.constant dense<0.000000e+00> : vector<6x32xf32>
    %656 = tpu.matmul %647, %649, %cst_353 {dimension_numbers = #tpu.dot_dimension_numbers<[1], [0], [0], [1], [0, 0, 1, 1], [], []>} : vector<6x32xf32>, vector<32x32xf32>, vector<6x32xf32> -> vector<6x32xf32>
    %657 = vector.broadcast %651 : vector<1x32xf32> to vector<6x32xf32>
    %658 = arith.addf %656, %657 : vector<6x32xf32>
    %cst_354 = arith.constant 0.000000e+00 : f32
    %659 = vector.broadcast %cst_354 : f32 to vector<6x32xf32>
    %660 = arith.maximumf %658, %659 : vector<6x32xf32>
    %cst_355 = arith.constant dense<0.000000e+00> : vector<6x32xf32>
    %661 = tpu.matmul %660, %653, %cst_355 {dimension_numbers = #tpu.dot_dimension_numbers<[1], [0], [0], [1], [0, 0, 1, 1], [], []>} : vector<6x32xf32>, vector<32x32xf32>, vector<6x32xf32> -> vector<6x32xf32>
    %662 = vector.broadcast %655 : vector<1x32xf32> to vector<6x32xf32>
    %663 = arith.addf %661, %662 : vector<6x32xf32>
    %664 = arith.addf %647, %663 : vector<6x32xf32>
    %c1_356 = arith.constant 1 : index
    %c0_357 = arith.constant 0 : index
    %c0_358 = arith.constant 0 : index
    %665 = vector.load %arg34[%c1_356, %c0_357, %c0_358] : memref<2x1x32xf32, #tpu.memory_space<vmem>>, vector<1x1x32xf32>
    %666 = vector.shape_cast %665 : vector<1x1x32xf32> to vector<1x32xf32>
    %c1_359 = arith.constant 1 : index
    %c0_360 = arith.constant 0 : index
    %c0_361 = arith.constant 0 : index
    %667 = vector.load %arg35[%c1_359, %c0_360, %c0_361] : memref<2x1x32xf32, #tpu.memory_space<vmem>>, vector<1x1x32xf32>
    %668 = vector.shape_cast %667 : vector<1x1x32xf32> to vector<1x32xf32>
    %cst_362 = arith.constant dense<0.000000e+00> : vector<6xf32>
    %669 = vector.multi_reduction <add>, %664, %cst_362 [1] : vector<6x32xf32> to vector<6xf32>
    %670 = vector.shape_cast %669 : vector<6xf32> to vector<6x1xf32>
    %cst_363 = arith.constant 3.200000e+01 : f32
    %671 = vector.broadcast %cst_363 : f32 to vector<6x1xf32>
    %672 = arith.divf %670, %671 : vector<6x1xf32>
    %673 = vector.broadcast %672 : vector<6x1xf32> to vector<6x32xf32>
    %674 = arith.subf %664, %673 : vector<6x32xf32>
    %675 = arith.mulf %674, %674 : vector<6x32xf32>
    %cst_364 = arith.constant dense<0.000000e+00> : vector<6xf32>
    %676 = vector.multi_reduction <add>, %675, %cst_364 [1] : vector<6x32xf32> to vector<6xf32>
    %677 = vector.shape_cast %676 : vector<6xf32> to vector<6x1xf32>
    %cst_365 = arith.constant 3.200000e+01 : f32
    %678 = vector.broadcast %cst_365 : f32 to vector<6x1xf32>
    %679 = arith.divf %677, %678 : vector<6x1xf32>
    %cst_366 = arith.constant 9.99999974E-6 : f32
    %680 = vector.broadcast %cst_366 : f32 to vector<6x1xf32>
    %681 = arith.addf %679, %680 : vector<6x1xf32>
    %682 = math.rsqrt %681 : vector<6x1xf32>
    %683 = vector.broadcast %682 : vector<6x1xf32> to vector<6x32xf32>
    %684 = arith.mulf %674, %683 : vector<6x32xf32>
    %685 = vector.broadcast %666 : vector<1x32xf32> to vector<6x32xf32>
    %686 = arith.mulf %684, %685 : vector<6x32xf32>
    %687 = vector.broadcast %668 : vector<1x32xf32> to vector<6x32xf32>
    %688 = arith.addf %686, %687 : vector<6x32xf32>
    %c0_367 = arith.constant 0 : index
    %c0_368 = arith.constant 0 : index
    %689 = vector.load %arg40[%c0_367, %c0_368] : memref<32x128xf32, #tpu.memory_space<vmem>>, vector<32x128xf32>
    %cst_369 = arith.constant dense<0.000000e+00> : vector<6x128xf32>
    %690 = tpu.matmul %688, %689, %cst_369 {dimension_numbers = #tpu.dot_dimension_numbers<[1], [0], [0], [1], [0, 0, 1, 1], [], []>} : vector<6x32xf32>, vector<32x128xf32>, vector<6x128xf32> -> vector<6x128xf32>
    %c0_370 = arith.constant 0 : index
    %c0_371 = arith.constant 0 : index
    %691 = vector.load %arg41[%c0_370, %c0_371] : memref<1x128xf32, #tpu.memory_space<vmem>>, vector<1x128xf32>
    %692 = vector.broadcast %691 : vector<1x128xf32> to vector<6x128xf32>
    %693 = arith.addf %690, %692 : vector<6x128xf32>
    %c0_372 = arith.constant 0 : index
    %c0_373 = arith.constant 0 : index
    %c0_374 = arith.constant 0 : index
    %694 = vector.load %arg42[%c0_372, %c0_373, %c0_374] : memref<1x6x128xf32, #tpu.memory_space<vmem>>, vector<1x6x128xf32>
    %695 = vector.shape_cast %694 : vector<1x6x128xf32> to vector<6x128xf32>
    %696 = vector.shape_cast %693 : vector<6x128xf32> to vector<1x6x128xf32>
    tpu.vector_store %arg42[%c0_372, %c0_373, %c0_374], %696 {strides = array<i32>} : memref<1x6x128xf32, #tpu.memory_space<vmem>>, vector<1x6x128xf32>,
    return
  }
  func.func @transform_0(%arg0: i32) -> (i32, i32, i32) {
    %c0_i32 = arith.constant 0 : i32
    %c0_i32_0 = arith.constant 0 : i32
    %c0_i32_1 = arith.constant 0 : i32
    return %arg0, %c0_i32, %c0_i32_0 : i32, i32, i32
  }
  func.func @transform_1(%arg0: i32) -> (i32, i32, i32) {
    %c0_i32 = arith.constant 0 : i32
    %c0_i32_0 = arith.constant 0 : i32
    %c0_i32_1 = arith.constant 0 : i32
    return %arg0, %c0_i32, %c0_i32_0 : i32, i32, i32
  }
  func.func @transform_2(%arg0: i32) -> (i32, i32) {
    %c0_i32 = arith.constant 0 : i32
    %c0_i32_0 = arith.constant 0 : i32
    %c0_i32_1 = arith.constant 0 : i32
    return %c0_i32, %c0_i32_0 : i32, i32
  }
  func.func @transform_3(%arg0: i32) -> (i32, i32, i32) {
    %c0_i32 = arith.constant 0 : i32
    %c0_i32_0 = arith.constant 0 : i32
    %c0_i32_1 = arith.constant 0 : i32
    %c0_i32_2 = arith.constant 0 : i32
    return %c0_i32, %c0_i32_0, %c0_i32_1 : i32, i32, i32
  }
  func.func @transform_4(%arg0: i32) -> (i32, i32, i32) {
    %c0_i32 = arith.constant 0 : i32
    %c0_i32_0 = arith.constant 0 : i32
    %c0_i32_1 = arith.constant 0 : i32
    %c0_i32_2 = arith.constant 0 : i32
    return %c0_i32, %c0_i32_0, %c0_i32_1 : i32, i32, i32
  }
  func.func @transform_5(%arg0: i32) -> (i32, i32, i32) {
    %c0_i32 = arith.constant 0 : i32
    %c0_i32_0 = arith.constant 0 : i32
    %c0_i32_1 = arith.constant 0 : i32
    %c0_i32_2 = arith.constant 0 : i32
    return %c0_i32, %c0_i32_0, %c0_i32_1 : i32, i32, i32
  }
  func.func @transform_6(%arg0: i32) -> (i32, i32, i32) {
    %c0_i32 = arith.constant 0 : i32
    %c0_i32_0 = arith.constant 0 : i32
    %c0_i32_1 = arith.constant 0 : i32
    %c0_i32_2 = arith.constant 0 : i32
    return %c0_i32, %c0_i32_0, %c0_i32_1 : i32, i32, i32
  }
  func.func @transform_7(%arg0: i32) -> (i32, i32, i32) {
    %c0_i32 = arith.constant 0 : i32
    %c0_i32_0 = arith.constant 0 : i32
    %c0_i32_1 = arith.constant 0 : i32
    %c0_i32_2 = arith.constant 0 : i32
    return %c0_i32, %c0_i32_0, %c0_i32_1 : i32, i32, i32
  }
  func.func @transform_8(%arg0: i32) -> (i32, i32, i32) {
    %c0_i32 = arith.constant 0 : i32
    %c0_i32_0 = arith.constant 0 : i32
    %c0_i32_1 = arith.constant 0 : i32
    %c0_i32_2 = arith.constant 0 : i32
    return %c0_i32, %c0_i32_0, %c0_i32_1 : i32, i32, i32
  }
  func.func @transform_9(%arg0: i32) -> (i32, i32, i32) {
    %c0_i32 = arith.constant 0 : i32
    %c0_i32_0 = arith.constant 0 : i32
    %c0_i32_1 = arith.constant 0 : i32
    %c0_i32_2 = arith.constant 0 : i32
    return %c0_i32, %c0_i32_0, %c0_i32_1 : i32, i32, i32
  }
  func.func @transform_10(%arg0: i32) -> (i32, i32, i32) {
    %c0_i32 = arith.constant 0 : i32
    %c0_i32_0 = arith.constant 0 : i32
    %c0_i32_1 = arith.constant 0 : i32
    %c0_i32_2 = arith.constant 0 : i32
    return %c0_i32, %c0_i32_0, %c0_i32_1 : i32, i32, i32
  }
  func.func @transform_11(%arg0: i32) -> (i32, i32, i32) {
    %c0_i32 = arith.constant 0 : i32
    %c0_i32_0 = arith.constant 0 : i32
    %c0_i32_1 = arith.constant 0 : i32
    %c0_i32_2 = arith.constant 0 : i32
    return %c0_i32, %c0_i32_0, %c0_i32_1 : i32, i32, i32
  }
  func.func @transform_12(%arg0: i32) -> (i32, i32, i32) {
    %c0_i32 = arith.constant 0 : i32
    %c0_i32_0 = arith.constant 0 : i32
    %c0_i32_1 = arith.constant 0 : i32
    %c0_i32_2 = arith.constant 0 : i32
    return %c0_i32, %c0_i32_0, %c0_i32_1 : i32, i32, i32
  }
  func.func @transform_13(%arg0: i32) -> (i32, i32, i32) {
    %c0_i32 = arith.constant 0 : i32
    %c0_i32_0 = arith.constant 0 : i32
    %c0_i32_1 = arith.constant 0 : i32
    %c0_i32_2 = arith.constant 0 : i32
    return %c0_i32, %c0_i32_0, %c0_i32_1 : i32, i32, i32
  }
  func.func @transform_14(%arg0: i32) -> (i32, i32, i32) {
    %c0_i32 = arith.constant 0 : i32
    %c0_i32_0 = arith.constant 0 : i32
    %c0_i32_1 = arith.constant 0 : i32
    %c0_i32_2 = arith.constant 0 : i32
    return %c0_i32, %c0_i32_0, %c0_i32_1 : i32, i32, i32
  }
  func.func @transform_15(%arg0: i32) -> (i32, i32, i32) {
    %c0_i32 = arith.constant 0 : i32
    %c0_i32_0 = arith.constant 0 : i32
    %c0_i32_1 = arith.constant 0 : i32
    %c0_i32_2 = arith.constant 0 : i32
    return %c0_i32, %c0_i32_0, %c0_i32_1 : i32, i32, i32
  }
  func.func @transform_16(%arg0: i32) -> (i32, i32, i32) {
    %c0_i32 = arith.constant 0 : i32
    %c0_i32_0 = arith.constant 0 : i32
    %c0_i32_1 = arith.constant 0 : i32
    %c0_i32_2 = arith.constant 0 : i32
    return %c0_i32, %c0_i32_0, %c0_i32_1 : i32, i32, i32
  }
  func.func @transform_17(%arg0: i32) -> (i32, i32, i32) {
    %c0_i32 = arith.constant 0 : i32
    %c0_i32_0 = arith.constant 0 : i32
    %c0_i32_1 = arith.constant 0 : i32
    %c0_i32_2 = arith.constant 0 : i32
    return %c0_i32, %c0_i32_0, %c0_i32_1 : i32, i32, i32
  }
  func.func @transform_18(%arg0: i32) -> (i32, i32, i32) {
    %c0_i32 = arith.constant 0 : i32
    %c0_i32_0 = arith.constant 0 : i32
    %c0_i32_1 = arith.constant 0 : i32
    %c0_i32_2 = arith.constant 0 : i32
    return %c0_i32, %c0_i32_0, %c0_i32_1 : i32, i32, i32
  }
  func.func @transform_19(%arg0: i32) -> (i32, i32, i32) {
    %c0_i32 = arith.constant 0 : i32
    %c0_i32_0 = arith.constant 0 : i32
    %c0_i32_1 = arith.constant 0 : i32
    %c0_i32_2 = arith.constant 0 : i32
    return %c0_i32, %c0_i32_0, %c0_i32_1 : i32, i32, i32
  }
  func.func @transform_20(%arg0: i32) -> (i32, i32, i32) {
    %c0_i32 = arith.constant 0 : i32
    %c0_i32_0 = arith.constant 0 : i32
    %c0_i32_1 = arith.constant 0 : i32
    %c0_i32_2 = arith.constant 0 : i32
    return %c0_i32, %c0_i32_0, %c0_i32_1 : i32, i32, i32
  }
  func.func @transform_21(%arg0: i32) -> (i32, i32, i32) {
    %c0_i32 = arith.constant 0 : i32
    %c0_i32_0 = arith.constant 0 : i32
    %c0_i32_1 = arith.constant 0 : i32
    %c0_i32_2 = arith.constant 0 : i32
    return %c0_i32, %c0_i32_0, %c0_i32_1 : i32, i32, i32
  }
  func.func @transform_22(%arg0: i32) -> (i32, i32, i32) {
    %c0_i32 = arith.constant 0 : i32
    %c0_i32_0 = arith.constant 0 : i32
    %c0_i32_1 = arith.constant 0 : i32
    %c0_i32_2 = arith.constant 0 : i32
    return %c0_i32, %c0_i32_0, %c0_i32_1 : i32, i32, i32
  }
  func.func @transform_23(%arg0: i32) -> (i32, i32, i32) {
    %c0_i32 = arith.constant 0 : i32
    %c0_i32_0 = arith.constant 0 : i32
    %c0_i32_1 = arith.constant 0 : i32
    %c0_i32_2 = arith.constant 0 : i32
    return %c0_i32, %c0_i32_0, %c0_i32_1 : i32, i32, i32
  }
  func.func @transform_24(%arg0: i32) -> (i32, i32, i32) {
    %c0_i32 = arith.constant 0 : i32
    %c0_i32_0 = arith.constant 0 : i32
    %c0_i32_1 = arith.constant 0 : i32
    %c0_i32_2 = arith.constant 0 : i32
    return %c0_i32, %c0_i32_0, %c0_i32_1 : i32, i32, i32
  }
  func.func @transform_25(%arg0: i32) -> (i32, i32, i32) {
    %c0_i32 = arith.constant 0 : i32
    %c0_i32_0 = arith.constant 0 : i32
    %c0_i32_1 = arith.constant 0 : i32
    %c0_i32_2 = arith.constant 0 : i32
    return %c0_i32, %c0_i32_0, %c0_i32_1 : i32, i32, i32
  }
  func.func @transform_26(%arg0: i32) -> (i32, i32, i32) {
    %c0_i32 = arith.constant 0 : i32
    %c0_i32_0 = arith.constant 0 : i32
    %c0_i32_1 = arith.constant 0 : i32
    %c0_i32_2 = arith.constant 0 : i32
    return %c0_i32, %c0_i32_0, %c0_i32_1 : i32, i32, i32
  }
  func.func @transform_27(%arg0: i32) -> (i32, i32, i32) {
    %c0_i32 = arith.constant 0 : i32
    %c0_i32_0 = arith.constant 0 : i32
    %c0_i32_1 = arith.constant 0 : i32
    %c0_i32_2 = arith.constant 0 : i32
    return %c0_i32, %c0_i32_0, %c0_i32_1 : i32, i32, i32
  }
  func.func @transform_28(%arg0: i32) -> (i32, i32, i32) {
    %c0_i32 = arith.constant 0 : i32
    %c0_i32_0 = arith.constant 0 : i32
    %c0_i32_1 = arith.constant 0 : i32
    %c0_i32_2 = arith.constant 0 : i32
    return %c0_i32, %c0_i32_0, %c0_i32_1 : i32, i32, i32
  }
  func.func @transform_29(%arg0: i32) -> (i32, i32, i32) {
    %c0_i32 = arith.constant 0 : i32
    %c0_i32_0 = arith.constant 0 : i32
    %c0_i32_1 = arith.constant 0 : i32
    %c0_i32_2 = arith.constant 0 : i32
    return %c0_i32, %c0_i32_0, %c0_i32_1 : i32, i32, i32
  }
  func.func @transform_30(%arg0: i32) -> (i32, i32, i32) {
    %c0_i32 = arith.constant 0 : i32
    %c0_i32_0 = arith.constant 0 : i32
    %c0_i32_1 = arith.constant 0 : i32
    %c0_i32_2 = arith.constant 0 : i32
    return %c0_i32, %c0_i32_0, %c0_i32_1 : i32, i32, i32
  }
  func.func @transform_31(%arg0: i32) -> (i32, i32, i32) {
    %c0_i32 = arith.constant 0 : i32
    %c0_i32_0 = arith.constant 0 : i32
    %c0_i32_1 = arith.constant 0 : i32
    %c0_i32_2 = arith.constant 0 : i32
    return %c0_i32, %c0_i32_0, %c0_i32_1 : i32, i32, i32
  }
  func.func @transform_32(%arg0: i32) -> (i32, i32, i32) {
    %c0_i32 = arith.constant 0 : i32
    %c0_i32_0 = arith.constant 0 : i32
    %c0_i32_1 = arith.constant 0 : i32
    %c0_i32_2 = arith.constant 0 : i32
    return %c0_i32, %c0_i32_0, %c0_i32_1 : i32, i32, i32
  }
  func.func @transform_33(%arg0: i32) -> (i32, i32, i32) {
    %c0_i32 = arith.constant 0 : i32
    %c0_i32_0 = arith.constant 0 : i32
    %c0_i32_1 = arith.constant 0 : i32
    %c0_i32_2 = arith.constant 0 : i32
    return %c0_i32, %c0_i32_0, %c0_i32_1 : i32, i32, i32
  }
  func.func @transform_34(%arg0: i32) -> (i32, i32, i32) {
    %c0_i32 = arith.constant 0 : i32
    %c0_i32_0 = arith.constant 0 : i32
    %c0_i32_1 = arith.constant 0 : i32
    %c0_i32_2 = arith.constant 0 : i32
    return %c0_i32, %c0_i32_0, %c0_i32_1 : i32, i32, i32
  }
  func.func @transform_35(%arg0: i32) -> (i32, i32, i32) {
    %c0_i32 = arith.constant 0 : i32
    %c0_i32_0 = arith.constant 0 : i32
    %c0_i32_1 = arith.constant 0 : i32
    %c0_i32_2 = arith.constant 0 : i32
    return %c0_i32, %c0_i32_0, %c0_i32_1 : i32, i32, i32
  }
  func.func @transform_36(%arg0: i32) -> (i32, i32, i32) {
    %c0_i32 = arith.constant 0 : i32
    %c0_i32_0 = arith.constant 0 : i32
    %c0_i32_1 = arith.constant 0 : i32
    %c0_i32_2 = arith.constant 0 : i32
    return %c0_i32, %c0_i32_0, %c0_i32_1 : i32, i32, i32
  }
  func.func @transform_37(%arg0: i32) -> (i32, i32, i32) {
    %c0_i32 = arith.constant 0 : i32
    %c0_i32_0 = arith.constant 0 : i32
    %c0_i32_1 = arith.constant 0 : i32
    %c0_i32_2 = arith.constant 0 : i32
    return %c0_i32, %c0_i32_0, %c0_i32_1 : i32, i32, i32
  }
  func.func @transform_38(%arg0: i32) -> (i32, i32, i32) {
    %c0_i32 = arith.constant 0 : i32
    %c0_i32_0 = arith.constant 0 : i32
    %c0_i32_1 = arith.constant 0 : i32
    %c0_i32_2 = arith.constant 0 : i32
    return %c0_i32, %c0_i32_0, %c0_i32_1 : i32, i32, i32
  }
  func.func @transform_39(%arg0: i32) -> (i32, i32) {
    %c0_i32 = arith.constant 0 : i32
    %c0_i32_0 = arith.constant 0 : i32
    %c0_i32_1 = arith.constant 0 : i32
    return %c0_i32, %c0_i32_0 : i32, i32
  }
  func.func @transform_40(%arg0: i32) -> (i32, i32) {
    %c0_i32 = arith.constant 0 : i32
    %c0_i32_0 = arith.constant 0 : i32
    %c0_i32_1 = arith.constant 0 : i32
    return %c0_i32, %c0_i32_0 : i32, i32
  }
  func.func @transform_41(%arg0: i32) -> (i32, i32, i32) {
    %c0_i32 = arith.constant 0 : i32
    %c0_i32_0 = arith.constant 0 : i32
    %c0_i32_1 = arith.constant 0 : i32
    return %arg0, %c0_i32, %c0_i32_0 : i32, i32, i32
  }
}

</mosaic_0001>

<bundles_post_ra>
// kernel: transformer_forward.1
= control target key start
LH: loop header
LB: loop body
LE: loop exit
PB: predicated region body
PF: predicated region fallthrough
CT: control target
= control target key end

     0   :  { %s8420_s6 = smov 1   ;;  %s8421_s10 = smov 2   ;;  %s9448_s0 = inlined_call_operand.smem [shape: u32[42], index: -1, kind: input, shape index: {}] }
   0x1   :  { %s8495_s5 = sld [smem:[%s9448_s0]]   ;;  %s8422_s14 = smov 3  }
   0x2   :  { %s8500_s9 = sld [smem:[%s9448_s0 + %s8420_s6]]   ;;  %s8423_s18 = smov 4  }
   0x3   :  { %s8505_s13 = sld [smem:[%s9448_s0 + %s8421_s10]]   ;;  %s8424_s22 = smov 5  }
   0x4   :  { %s8510_s17 = sld [smem:[%s9448_s0 + %s8422_s14]]   ;;  %s8425_s26 = smov 6  }
   0x5   :  { %s8515_s21 = sld [smem:[%s9448_s0 + %s8423_s18]]   ;;  %s8426_s30 = smov 7  }
   0x6   :  { %s8520_s25 = sld [smem:[%s9448_s0 + %s8424_s22]]   ;;  %s8427_s4 = smov 8  }
   0x7   :  { %9491 = sst [smem:[#allocation37_spill]] %s8495_s5  ;;  %s8428_s10 = smov 9  }
   0x8   :  { %9492 = sst [smem:[#allocation38_spill]] %s8500_s9  ;;  %s8429_s15 = smov 10  }
   0x9   :  { %9493 = sst [smem:[#allocation39_spill]] %s8505_s13  ;;  %s8430_s20 = smov 11  }
   0xa   :  { %9494 = sst [smem:[#allocation40_spill]] %s8510_s17  ;;  %s8432_s1 = smov 13  }
   0xb   :  { %9495 = sst [smem:[#allocation41_spill]] %s8515_s21  ;;  %s8433_s7 = smov 14  }
   0xc   :  { %9496 = sst [smem:[#allocation42_spill]] %s8520_s25  ;;  %s8435_s22 = smov 16  }
   0xd   :  { %s8525_s29 = sld [smem:[%s9448_s0 + %s8425_s26]]   ;;  %s8431_s26 = smov 12  }
   0xe   :  { %s8530_s3 = sld [smem:[%s9448_s0 + %s8426_s30]]   ;;  %s8436_s28 = smov 17  }
   0xf   :  { %s8535_s8 = sld [smem:[%s9448_s0 + %s8427_s4]]  }
  0x10   :  { %s8540_s14 = sld [smem:[%s9448_s0 + %s8428_s10]]  }
  0x11   :  { %s8545_s19 = sld [smem:[%s9448_s0 + %s8429_s15]]   ;;  %s8434_s15 = smov 15  }
  0x12   :  { %s8550_s24 = sld [smem:[%s9448_s0 + %s8430_s20]]  }
  0x13   :  { %9497 = sst [smem:[#allocation43_spill]] %s8525_s29 }
  0x14   :  { %9498 = sst [smem:[#allocation44_spill]] %s8530_s3 }
  0x15   :  { %9499 = sst [smem:[#allocation45_spill]] %s8535_s8 }
  0x16   :  { %9500 = sst [smem:[#allocation46_spill]] %s8540_s14 }
  0x17   :  { %9501 = sst [smem:[#allocation47_spill]] %s8545_s19 }
  0x18   :  { %9502 = sst [smem:[#allocation48_spill]] %s8550_s24 }
  0x19   :  { %s8555_s30 = sld [smem:[%s9448_s0 + %s8431_s26]]  }
  0x1a   :  { %s8560_s6 = sld [smem:[%s9448_s0 + %s8432_s1]]  }
  0x1b   :  { %s8565_s12 = sld [smem:[%s9448_s0 + %s8433_s7]]   ;;  %s8437_s7 = smov 18  }
  0x1c   :  { %s8570_s20 = sld [smem:[%s9448_s0 + %s8434_s15]]   ;;  %s8438_s15 = smov 19  }
  0x1d   :  { %s8575_s27 = sld [smem:[%s9448_s0 + %s8435_s22]]   ;;  %s8439_s22 = smov 20  }
  0x1e   :  { %s8580_s4 = sld [smem:[%s9448_s0 + %s8436_s28]]   ;;  %s8440_s28 = smov 21  }
  0x1f   :  { %9503 = sst [smem:[#allocation49_spill]] %s8555_s30 }
  0x20   :  { %9504 = sst [smem:[#allocation50_spill]] %s8560_s6 }
  0x21   :  { %9505 = sst [smem:[#allocation51_spill]] %s8565_s12 }
  0x22   :  { %9506 = sst [smem:[#allocation52_spill]] %s8570_s20 }
  0x23   :  { %9507 = sst [smem:[#allocation53_spill]] %s8575_s27 }
  0x24   :  { %9508 = sst [smem:[#allocation54_spill]] %s8580_s4 }
  0x25   :  { %s8585_s13 = sld [smem:[%s9448_s0 + %s8437_s7]]   ;;  %s8441_s7 = smov 22  }
  0x26   :  { %s8590_s9 = sld [smem:[%s9448_s0 + %s8438_s15]]   ;;  %s8442_s15 = smov 23  }
  0x27   :  { %s8595_s27 = sld [smem:[%s9448_s0 + %s8439_s22]]   ;;  %s8443_s22 = smov 24  }
  0x28   :  { %s8600_s4 = sld [smem:[%s9448_s0 + %s8440_s28]]   ;;  %s8444_s28 = smov 25  }
  0x2b   :  { %9509 = sst [smem:[#allocation55_spill]] %s8585_s13 }
  0x2c   :  { %9510 = sst [smem:[#allocation56_spill]] %s8590_s9 }
  0x2d   :  { %9511 = sst [smem:[#allocation57_spill]] %s8595_s27 }
  0x2e   :  { %9512 = sst [smem:[#allocation58_spill]] %s8600_s4 }
  0x2f   :  { %s8605_s13 = sld [smem:[%s9448_s0 + %s8441_s7]]   ;;  %s8445_s7 = smov 26  }
  0x30   :  { %s8610_s9 = sld [smem:[%s9448_s0 + %s8442_s15]]   ;;  %s8446_s15 = smov 27  }
  0x31   :  { %s8615_s27 = sld [smem:[%s9448_s0 + %s8443_s22]]   ;;  %s8447_s22 = smov 28  }
  0x32   :  { %s8620_s4 = sld [smem:[%s9448_s0 + %s8444_s28]]   ;;  %s8448_s28 = smov 29  }
  0x33   :  { %s8630_s20 = sld [smem:[%s9448_s0 + %s8446_s15]]   ;;  %s8450_s15 = smov 31  }
  0x34   :  { %s8640_s12 = sld [smem:[%s9448_s0 + %s8448_s28]]   ;;  %s8452_s28 = smov 33  }
  0x35   :  { %9513 = sst [smem:[#allocation59_spill]] %s8605_s13 }
  0x36   :  { %9514 = sst [smem:[#allocation60_spill]] %s8610_s9 }
  0x37   :  { %9515 = sst [smem:[#allocation61_spill]] %s8615_s27 }
  0x38   :  { %9516 = sst [smem:[#allocation62_spill]] %s8620_s4 }
  0x39   :  { %s8625_s13 = sld [smem:[%s9448_s0 + %s8445_s7]]   ;;  %s8449_s7 = smov 30  }
  0x3a   :  { %s8635_s27 = sld [smem:[%s9448_s0 + %s8447_s22]]   ;;  %s8451_s22 = smov 32  }
  0x3b   :  { %9517 = sst [smem:[#allocation63_spill]] %s8640_s12 }
  0x3c   :  { %s8645_s30 = sld [smem:[%s9448_s0 + %s8449_s7]]   ;;  %s8453_s7 = smov 34  }
  0x3d   :  { %s8650_s19 = sld [smem:[%s9448_s0 + %s8450_s15]]   ;;  %s8454_s15 = smov 35  }
  0x3e   :  { %s8655_s14 = sld [smem:[%s9448_s0 + %s8451_s22]]   ;;  %s8455_s22 = smov 36  }
  0x3f   :  { %s8660_s6 = sld [smem:[%s9448_s0 + %s8452_s28]]   ;;  %s8456_s28 = smov 37  }
  0x40   :  { %s8665_s24 = sld [smem:[%s9448_s0 + %s8453_s7]]   ;;  %s8457_s7 = smov 38  }
  0x41   :  { %s8670_s8 = sld [smem:[%s9448_s0 + %s8454_s15]]   ;;  %s8458_s15 = smov 39  }
  0x42   :  { %s8675_s3 = sld [smem:[%s9448_s0 + %s8455_s22]]   ;;  %s8459_s22 = smov 40  }
  0x43   :  { %s8680_s21 = sld [smem:[%s9448_s0 + %s8456_s28]]   ;;  %s8460_s28 = smov 41  }
  0x44   :  { %s8685_s29 = sld [smem:[%s9448_s0 + %s8457_s7]]  }
  0x45   :  { %9518 = sst [smem:[#allocation64_spill]] %s8660_s6 }
  0x46   :  { %s8690_s5 = sld [smem:[%s9448_s0 + %s8458_s15]]  }
  0x47   :  { %9519 = sst [smem:[#allocation65_spill]] %s8670_s8 }
  0x48   :  { %9520 = sst [smem:[#allocation66_spill]] %s8675_s3 }
  0x49   :  { %s8695_s17 = sld [smem:[%s9448_s0 + %s8459_s22]]  }
  0x4a   :  { %s8700_s25 = sld [smem:[%s9448_s0 + %s8460_s28]]  }
  0x4c   :  { %9521 = sst [smem:[#allocation67_spill]] %s8690_s5 }
  0x4d   :  { %88 = vsyncpa [#allocation3], 0 }
  0x4e   :  { %89 = vsyncpa [#allocation5], 0 }
  0x4f   :  { %90 = vsyncpa [#allocation8], 0 }
  0x50   :  { %91 = vsyncpa [#allocation11], 0 }
  0x51   :  { %92 = vsyncpa [#allocation14], 0 }
  0x52   :  { %93 = vsyncpa [#allocation17], 0 }
  0x53   :  { %94 = vsyncpa [#allocation20], 0 }
  0x54   :  { %95 = vsyncpa [#allocation23], 0 }
  0x55   :  { %96 = vsyncpa [#allocation26], 0  ;;  %s8702_s7 = smov 0  }
  0x56 LB: > { %s8708_s0 = sadd.s32 4294967295, %s8418_s7   ;;  %p6806_p0 = scmp.ge.s32.totalorder %s8418_s7, 1  ;;  %s8418_s7 = sphi %s8702_s7, %s102_s7  }
  0x57   : > { %p1004_p1 = scmp.lt.s32.totalorder %s8418_s7, 3  ;;  %p9474_p2 = scmp.eq.s32.totalorder %s8708_s0, 0 }
  0x58   : > { %s8461_s11 = smov [#allocation4]   ;;  %s8462_s16 = smov [#allocation7]  }
  0x59   : > { %p8713_p3 = pnand %p6806_p0, %p1004_p1  ;;  %s1095_s15 = sshll.u32 %s8461_s11, 4  ;;  %s1096_s15 = int_to_ptr.vmem [resolvable:$true] %s1095_s15 }
  0x5a   : > { %s1121_s18 = sshll.u32 %s8462_s16, 4  ;;  %s8463_s23 = smov [#allocation10]   ;;  %s8719_s18 = int_to_ptr.vmem [resolvable:$true] %s1121_s18 }
  0x5b   : > { %p7705_p4 = pneg %p8713_p3  ;;  %s1147_s26 = sshll.u32 %s8463_s23, 4  ;;  %s1148_s26 = int_to_ptr.vmem [resolvable:$true] %s1147_s26 }
  0x5c   : > { %s7945_s1 = scalar_lea.vmem %s1096_s15, 1024  ;;  %p7953_p10 = scmp.lt.s32.totalorder %s1096_s15, %s1096_s15 }
  0x5d   : > { %p8723_p5 = pnand %p9474_p2, %p7705_p4  ;;  %p7946_p7 = scmp.ne.s32.totalorder %s1096_s15, %s7945_s1 }
  0x5e   : > { %p7954_p11 = scmp.lt.s32.totalorder %s7945_s1, %s7945_s1 }
  0x5f   : > { %p8729_p6 = pneg %p8723_p5 }
  0x60   : > { %p7955_p12 = por %p7954_p11, %p7953_p10 }
  0x61   : > { %p7948_p8 = pnand %p7946_p7, %p8729_p6 }
  0x63   : > { %p7949_p9 = pneg %p7948_p8 }
  0x65   : > { %p7956_p13 = pnand %p7955_p12, %p7949_p9 }
  0x67   : > { %7959 = shalt.err (!%p7956_p13)
}
  0x68   : > { %s9470_s2 = smov 128   ;;  %s9525_s4 = sld [smem:[#allocation62_spill]] }
  0x69   : > { %s9472_s11 = smov 8   ;;  %s7971_s16 = scalar_lea.vmem %s8719_s18, 1024 }
  0x6a   : > { %p7972_p0 = scmp.ne.s32.totalorder %s8719_s18, %s7971_s16  ;;  %p7979_p7 = scmp.lt.s32.totalorder %s8719_s18, %s8719_s18 }
  0x6b   : > { %p7980_p8 = scmp.lt.s32.totalorder %s7971_s16, %s7971_s16 }
  0x6c   : > { %p7974_p1 = pnand %p7972_p0, %p8729_p6 }
  0x6d   : > { %p7981_p9 = por %p7980_p8, %p7979_p7 }
  0x6e   : > { %7711 = dma.hbm_to_vmem [thread:$0]  (!%p8723_p5), %s9525_s4, 1024, %s1096_s15, [#allocation5], %s9470_s2, %s9470_s2, %s9472_s11  }
  0x6f   : > { %p7975_p4 = pneg %p7974_p1 }
  0x71   : > { %p7982_p10 = pnand %p7981_p9, %p7975_p4 }
  0x73   : > { %7985 = shalt.err (!%p7982_p10)
}
  0x74   : > { %7717 = dma.hbm_to_vmem [thread:$0]  (!%p8723_p5), %s8630_s20, 1024, %s8719_s18, [#allocation8], %s9470_s2, %s9470_s2, %s9472_s11  }
  0x75   : > { %s8466_s15 = smov [#allocation13]   ;;  %s7997_s1 = scalar_lea.vmem %s1148_s26, 32 }
  0x76   : > { %s1173_s23 = sshll.u32 %s8466_s15, 4  ;;  %p7998_p11 = scmp.ne.s32.totalorder %s1148_s26, %s7997_s1  ;;  %s1174_s23 = int_to_ptr.vmem [resolvable:$true] %s1173_s23 }
  0x77   : > { %p8005_p0 = scmp.lt.s32.totalorder %s1148_s26, %s1148_s26  ;;  %p8006_p1 = scmp.lt.s32.totalorder %s7997_s1, %s7997_s1 }
  0x78   : > { %p8000_p12 = pnand %p7998_p11, %p8729_p6 }
  0x79   : > { %p8007_p4 = por %p8006_p1, %p8005_p0 }
  0x7a   : > { %p8001_p13 = pneg %p8000_p12 }
  0x7c   : > { %p8008_p7 = pnand %p8007_p4, %p8001_p13 }
  0x7e   : > { %8011 = shalt.err (!%p8008_p7)
}
  0x7f   : > { %s9475_s16 = smov 16   ;;  %s9526_s12 = sld [smem:[#allocation63_spill]] }
  0x80   : > { %s9477_s4 = smov 1   ;;  %s8023_s18 = scalar_lea.vmem %s1174_s23, 32 }
  0x81   : > { %p8024_p8 = scmp.ne.s32.totalorder %s1174_s23, %s8023_s18  ;;  %p8031_p11 = scmp.lt.s32.totalorder %s1174_s23, %s1174_s23 }
  0x82   : > { %p8032_p12 = scmp.lt.s32.totalorder %s8023_s18, %s8023_s18 }
  0x83   : > { %p8026_p9 = pnand %p8024_p8, %p8729_p6 }
  0x84   : > { %p8033_p13 = por %p8032_p12, %p8031_p11 }
  0x85   : > { %7723 = dma.hbm_to_vmem [thread:$0]  (!%p8723_p5), %s9526_s12, 32, %s1148_s26, [#allocation11], %s9475_s16, %s9475_s16, %s9477_s4  }
  0x86   : > { %p8027_p10 = pneg %p8026_p9 }
  0x88   : > { %p8034_p0 = pnand %p8033_p13, %p8027_p10 }
  0x8a   : > { %8037 = shalt.err (!%p8034_p0)
}
  0x8b   : > { %7729 = dma.hbm_to_vmem [thread:$0]  (!%p8723_p5), %s8650_s19, 32, %s1174_s23, [#allocation14], %s9475_s16, %s9475_s16, %s9477_s4  }
  0x8c   : > { %s8469_s26 = smov [#allocation16]   ;;  %s8470_s1 = smov [#allocation19]  }
  0x8d   : > { %s1199_s15 = sshll.u32 %s8469_s26, 4  ;;  %s1225_s2 = sshll.u32 %s8470_s1, 4  ;;  %s1200_s15 = int_to_ptr.vmem [resolvable:$true] %s1199_s15  ;;  %s1226_s2 = int_to_ptr.vmem [resolvable:$true] %s1225_s2 }
  0x8e   : > { %s8049_s11 = scalar_lea.vmem %s1200_s15, 32  ;;  %p8057_p8 = scmp.lt.s32.totalorder %s1200_s15, %s1200_s15 }
  0x8f   : > { %p8050_p1 = scmp.ne.s32.totalorder %s1200_s15, %s8049_s11  ;;  %p8058_p9 = scmp.lt.s32.totalorder %s8049_s11, %s8049_s11 }
  0x91   : > { %p8052_p4 = pnand %p8050_p1, %p8729_p6  ;;  %p8059_p10 = por %p8058_p9, %p8057_p8 }
  0x93   : > { %p8053_p7 = pneg %p8052_p4 }
  0x95   : > { %p8060_p11 = pnand %p8059_p10, %p8053_p7 }
  0x97   : > { %8063 = shalt.err (!%p8060_p11)
}
  0x98   : > { %s9527_s6 = sld [smem:[#allocation64_spill]]  ;;  %s8075_s23 = scalar_lea.vmem %s1226_s2, 1024 }
  0x99   : > { %p8076_p12 = scmp.ne.s32.totalorder %s1226_s2, %s8075_s23  ;;  %p8083_p1 = scmp.lt.s32.totalorder %s1226_s2, %s1226_s2 }
  0x9a   : > { %p8084_p4 = scmp.lt.s32.totalorder %s8075_s23, %s8075_s23 }
  0x9b   : > { %p8078_p13 = pnand %p8076_p12, %p8729_p6 }
  0x9c   : > { %p8085_p2 = por %p8084_p4, %p8083_p1 }
  0x9d   : > { %p8079_p0 = pneg %p8078_p13 }
  0x9e   : > { %7735 = dma.hbm_to_vmem [thread:$0]  (!%p8723_p5), %s9527_s6, 32, %s1200_s15, [#allocation17], %s9475_s16, %s9475_s16, %s9477_s4  }
  0x9f   : > { %p8086_p8 = pnand %p8085_p2, %p8079_p0 }
  0xa1   : > { %8089 = shalt.err (!%p8086_p8)
}
  0xa2   : > { %s9528_s11 = smov 8   ;;  %s9529_s18 = smov 128  }
  0xa3   : > { %s9530_s8 = sld [smem:[#allocation65_spill]]  ;;  %s8471_s26 = smov [#allocation22]  }
  0xa4   : > { %s1251_s15 = sshll.u32 %s8471_s26, 4  ;;  %s8472_s1 = smov [#allocation25]   ;;  %s1252_s15 = int_to_ptr.vmem [resolvable:$true] %s1251_s15 }
  0xa5   : > { %s1277_s16 = sshll.u32 %s8472_s1, 4  ;;  %s8101_s4 = scalar_lea.vmem %s1252_s15, 1024  ;;  %s1278_s16 = int_to_ptr.vmem [resolvable:$true] %s1277_s16 }
  0xa6   : > { %p8102_p7 = scmp.ne.s32.totalorder %s1252_s15, %s8101_s4  ;;  %p8109_p2 = scmp.lt.s32.totalorder %s1252_s15, %s1252_s15 }
  0xa7   : > { %p8110_p11 = scmp.lt.s32.totalorder %s8101_s4, %s8101_s4 }
  0xa8   : > { %p8104_p9 = pnand %p8102_p7, %p8729_p6 }
  0xa9   : > { %7741 = dma.hbm_to_vmem [thread:$0]  (!%p8723_p5), %s9530_s8, 1024, %s1226_s2, [#allocation20], %s9529_s18, %s9529_s18, %s9528_s11  }
  0xaa   : > { %p8105_p10 = pneg %p8104_p9  ;;  %p8111_p12 = por %p8110_p11, %p8109_p2 }
  0xac   : > { %p8112_p13 = pnand %p8111_p12, %p8105_p10 }
  0xae   : > { %8115 = shalt.err (!%p8112_p13)
}
  0xaf   : > { %7747 = dma.hbm_to_vmem [thread:$0]  (!%p8723_p5), %s8680_s21, 1024, %s1252_s15, [#allocation23], %s9529_s18, %s9529_s18, %s9528_s11  }
  0xb0   : > { %s8127_s2 = scalar_lea.vmem %s1278_s16, 512  ;;  %p8135_p8 = scmp.lt.s32.totalorder %s1278_s16, %s1278_s16 }
  0xb1   : > { %p8128_p0 = scmp.ne.s32.totalorder %s1278_s16, %s8127_s2  ;;  %p8136_p7 = scmp.lt.s32.totalorder %s8127_s2, %s8127_s2 }
  0xb3   : > { %p8130_p1 = pnand %p8128_p0, %p8729_p6  ;;  %p8137_p9 = por %p8136_p7, %p8135_p8 }
  0xb5   : > { %p8131_p4 = pneg %p8130_p1 }
  0xb7   : > { %p8138_p2 = pnand %p8137_p9, %p8131_p4 }
  0xb9   : > { %8141 = shalt.err (!%p8138_p2)
}
  0xba   : > { %s9531_s5 = sld [smem:[#allocation67_spill]]  ;;  %s8473_s4 = smov [#allocation2]  }
  0xbb   : > { %s1079_s23 = sshll.u32 %s8473_s4, 4  ;;  %s8474_s26 = smov [#allocation6]   ;;  %s1080_s23 = int_to_ptr.vmem [resolvable:$true] %s1079_s23 }
  0xbc   : > { %s1108_s15 = sshll.u32 %s8474_s26, 4  ;;  %s8153_s1 = scalar_lea.vmem %s1080_s23, 1024  ;;  %s1109_s15 = int_to_ptr.vmem [resolvable:$true] %s1108_s15 }
  0xbd   : > { %p8154_p10 = scmp.ne.s32.totalorder %s1080_s23, %s8153_s1  ;;  %p8161_p13 = scmp.lt.s32.totalorder %s1080_s23, %s1080_s23 }
  0xbe   : > { %p8162_p0 = scmp.lt.s32.totalorder %s8153_s1, %s8153_s1 }
  0xbf   : > { %p8156_p11 = pnand %p8154_p10, %p8729_p6 }
  0xc0   : > { %7753 = dma.hbm_to_vmem [thread:$0]  (!%p8723_p5), %s9531_s5, 512, %s1278_s16, [#allocation26], %s9529_s18, %s9529_s18, %s9528_s11  }
  0xc1   : > { %p8157_p12 = pneg %p8156_p11  ;;  %p8163_p1 = por %p8162_p0, %p8161_p13 }
  0xc3   : > { %p8164_p4 = pnand %p8163_p1, %p8157_p12 }
  0xc5   : > { %8167 = shalt.err (!%p8164_p4)
}
  0xc6   : > { %s9532_s9 = sld [smem:[#allocation60_spill]]  ;;  %s8179_s16 = scalar_lea.vmem %s1109_s15, 32 }
  0xc7   : > { %p8180_p8 = scmp.ne.s32.totalorder %s1109_s15, %s8179_s16  ;;  %p8187_p2 = scmp.lt.s32.totalorder %s1109_s15, %s1109_s15 }
  0xc8   : > { %p8188_p10 = scmp.lt.s32.totalorder %s8179_s16, %s8179_s16 }
  0xc9   : > { %p8182_p7 = pnand %p8180_p8, %p8729_p6 }
  0xca   : > { %p8189_p11 = por %p8188_p10, %p8187_p2 }
  0xcb   : > { %p8183_p9 = pneg %p8182_p7 }
  0xcc   : > { %7708 = dma.hbm_to_vmem [thread:$0]  (!%p8723_p5), %s9532_s9, 1024, %s1080_s23, [#allocation3], %s9529_s18, %s9529_s18, %s9528_s11  }
  0xcd   : > { %p8190_p13 = pnand %p8189_p11, %p8183_p9 }
  0xcf   : > { %8193 = shalt.err (!%p8190_p13)
}
  0xd0   : > { %s9533_s2 = smov 1   ;;  %s9534_s4 = smov 16  }
  0xd1   : > { %7714 = dma.hbm_to_vmem [thread:$0]  (!%p8723_p5), %s8625_s13, 32, %s1109_s15, [#allocation5], %s9534_s4, %s9534_s4, %s9533_s2  }
  0xd2   : > { %s8475_s11 = smov [#allocation9]   ;;  %s8476_s23 = smov [#allocation12]  }
  0xd3   : > { %s1134_s18 = sshll.u32 %s8475_s11, 4  ;;  %s1160_s26 = sshll.u32 %s8476_s23, 4  ;;  %s1135_s18 = int_to_ptr.vmem [resolvable:$true] %s1134_s18  ;;  %s1161_s26 = int_to_ptr.vmem [resolvable:$true] %s1160_s26 }
  0xd4   : > { %s8205_s1 = scalar_lea.vmem %s1135_s18, 32  ;;  %p8213_p4 = scmp.lt.s32.totalorder %s1135_s18, %s1135_s18 }
  0xd5   : > { %p8206_p12 = scmp.ne.s32.totalorder %s1135_s18, %s8205_s1  ;;  %p8214_p8 = scmp.lt.s32.totalorder %s8205_s1, %s8205_s1 }
  0xd7   : > { %p8208_p0 = pnand %p8206_p12, %p8729_p6  ;;  %p8215_p7 = por %p8214_p8, %p8213_p4 }
  0xd9   : > { %p8209_p1 = pneg %p8208_p0 }
  0xdb   : > { %p8216_p9 = pnand %p8215_p7, %p8209_p1 }
  0xdd   : > { %8219 = shalt.err (!%p8216_p9)
}
  0xde   : > { %7720 = dma.hbm_to_vmem [thread:$0]  (!%p8723_p5), %s8635_s27, 32, %s1135_s18, [#allocation8], %s9534_s4, %s9534_s4, %s9533_s2  }
  0xdf   : > { %s8231_s15 = scalar_lea.vmem %s1161_s26, 32  ;;  %p8239_p13 = scmp.lt.s32.totalorder %s1161_s26, %s1161_s26 }
  0xe0   : > { %p8232_p2 = scmp.ne.s32.totalorder %s1161_s26, %s8231_s15  ;;  %p8240_p12 = scmp.lt.s32.totalorder %s8231_s15, %s8231_s15 }
  0xe2   : > { %p8234_p10 = pnand %p8232_p2, %p8729_p6  ;;  %p8241_p0 = por %p8240_p12, %p8239_p13 }
  0xe4   : > { %p8235_p11 = pneg %p8234_p10 }
  0xe6   : > { %p8242_p4 = pnand %p8241_p0, %p8235_p11 }
  0xe8   : > { %8245 = shalt.err (!%p8242_p4)
}
  0xe9   : > { %7726 = dma.hbm_to_vmem [thread:$0]  (!%p8723_p5), %s8645_s30, 32, %s1161_s26, [#allocation11], %s9534_s4, %s9534_s4, %s9533_s2  }
  0xea   : > { %s8477_s16 = smov [#allocation15]   ;;  %s8478_s18 = smov [#allocation18]  }
  0xeb   : > { %s1186_s11 = sshll.u32 %s8477_s16, 4  ;;  %s1212_s23 = sshll.u32 %s8478_s18, 4  ;;  %s1187_s11 = int_to_ptr.vmem [resolvable:$true] %s1186_s11  ;;  %s1213_s23 = int_to_ptr.vmem [resolvable:$true] %s1212_s23 }
  0xec   : > { %s8257_s1 = scalar_lea.vmem %s1187_s11, 32  ;;  %p8265_p9 = scmp.lt.s32.totalorder %s1187_s11, %s1187_s11 }
  0xed   : > { %p8258_p1 = scmp.ne.s32.totalorder %s1187_s11, %s8257_s1  ;;  %p8266_p2 = scmp.lt.s32.totalorder %s8257_s1, %s8257_s1 }
  0xef   : > { %p8260_p8 = pnand %p8258_p1, %p8729_p6  ;;  %p8267_p10 = por %p8266_p2, %p8265_p9 }
  0xf1   : > { %p8261_p7 = pneg %p8260_p8 }
  0xf3   : > { %p8268_p11 = pnand %p8267_p10, %p8261_p7 }
  0xf5   : > { %8271 = shalt.err (!%p8268_p11)
}
  0xf6   : > { %7732 = dma.hbm_to_vmem [thread:$0]  (!%p8723_p5), %s8655_s14, 32, %s1187_s11, [#allocation14], %s9534_s4, %s9534_s4, %s9533_s2  }
  0xf7   : > { %s8283_s26 = scalar_lea.vmem %s1213_s23, 32  ;;  %p8291_p4 = scmp.lt.s32.totalorder %s1213_s23, %s1213_s23 }
  0xf8   : > { %p8284_p13 = scmp.ne.s32.totalorder %s1213_s23, %s8283_s26  ;;  %p8292_p1 = scmp.lt.s32.totalorder %s8283_s26, %s8283_s26 }
  0xfa   : > { %p8286_p12 = pnand %p8284_p13, %p8729_p6  ;;  %p8293_p8 = por %p8292_p1, %p8291_p4 }
  0xfc   : > { %p8287_p0 = pneg %p8286_p12 }
  0xfe   : > { %p8294_p9 = pnand %p8293_p8, %p8287_p0 }
 0x100   : > { %8297 = shalt.err (!%p8294_p9)
}
 0x101   : > { %7738 = dma.hbm_to_vmem [thread:$0]  (!%p8723_p5), %s8665_s24, 32, %s1213_s23, [#allocation17], %s9534_s4, %s9534_s4, %s9533_s2  }
 0x102   : > { %s8479_s15 = smov [#allocation21]   ;;  %s8480_s11 = smov [#allocation24]  }
 0x103   : > { %s1238_s16 = sshll.u32 %s8479_s15, 4  ;;  %s1264_s18 = sshll.u32 %s8480_s11, 4  ;;  %s1239_s16 = int_to_ptr.vmem [resolvable:$true] %s1238_s16  ;;  %s1265_s18 = int_to_ptr.vmem [resolvable:$true] %s1264_s18 }
 0x104   : > { %s8309_s1 = scalar_lea.vmem %s1239_s16, 32  ;;  %p8317_p11 = scmp.lt.s32.totalorder %s1239_s16, %s1239_s16 }
 0x105   : > { %p8310_p7 = scmp.ne.s32.totalorder %s1239_s16, %s8309_s1  ;;  %p8318_p13 = scmp.lt.s32.totalorder %s8309_s1, %s8309_s1 }
 0x107   : > { %p8312_p2 = pnand %p8310_p7, %p8729_p6  ;;  %p8319_p12 = por %p8318_p13, %p8317_p11 }
 0x109   : > { %p8313_p10 = pneg %p8312_p2 }
 0x10b   : > { %p8320_p0 = pnand %p8319_p12, %p8313_p10 }
 0x10d   : > { %8323 = shalt.err (!%p8320_p0)
}
 0x10e   : > { %s9535_s3 = sld [smem:[#allocation66_spill]]  ;;  %s8335_s23 = scalar_lea.vmem %s1265_s18, 32 }
 0x10f   : > { %p8336_p4 = scmp.ne.s32.totalorder %s1265_s18, %s8335_s23  ;;  %p8343_p9 = scmp.lt.s32.totalorder %s1265_s18, %s1265_s18 }
 0x110   : > { %p8344_p7 = scmp.lt.s32.totalorder %s8335_s23, %s8335_s23 }
 0x111   : > { %p8338_p1 = pnand %p8336_p4, %p8729_p6 }
 0x112   : > { %p8345_p2 = por %p8344_p7, %p8343_p9 }
 0x113   : > { %p8339_p8 = pneg %p8338_p1 }
 0x114   : > { %7744 = dma.hbm_to_vmem [thread:$0]  (!%p8723_p5), %s9535_s3, 32, %s1239_s16, [#allocation20], %s9534_s4, %s9534_s4, %s9533_s2  }
 0x115   : > { %p8346_p11 = pnand %p8345_p2, %p8339_p8 }
 0x117   : > { %8349 = shalt.err (!%p8346_p11)
}
 0x118   : > { %7750 = dma.hbm_to_vmem [thread:$0]  (!%p8723_p5), %s8685_s29, 32, %s1265_s18, [#allocation23], %s9534_s4, %s9534_s4, %s9533_s2  }
 0x119   : > { %s8481_s26 = smov [#allocation27]  }
 0x11a   : > { %s1291_s15 = sshll.u32 %s8481_s26, 4  ;;  %s1292_s15 = int_to_ptr.vmem [resolvable:$true] %s1291_s15 }
 0x11b   : > { %s8361_s16 = scalar_lea.vmem %s1292_s15, 16  ;;  %s8368_s11 = scalar_lea.vmem %s1292_s15, 32 }
 0x11c   : > { %p8362_p10 = scmp.ne.s32.totalorder %s1292_s15, %s8361_s16  ;;  %p8369_p0 = scmp.lt.s32.totalorder %s1292_s15, %s1292_s15 }
 0x11d   : > { %p8370_p4 = scmp.lt.s32.totalorder %s8368_s11, %s8361_s16 }
 0x11e   : > { %p8364_p13 = pnand %p8362_p10, %p8729_p6 }
 0x11f   : > { %p8371_p1 = por %p8370_p4, %p8369_p0 }
 0x120   : > { %p8365_p12 = pneg %p8364_p13 }
 0x122   : > { %p8372_p8 = pnand %p8371_p1, %p8365_p12 }
 0x124   : > { %8375 = shalt.err (!%p8372_p8)
}
 0x125   : > { %7756 = dma.hbm_to_vmem [thread:$0]  (!%p8723_p5), %s8695_s17, 16, %s1292_s15, [#allocation26]  }
 0x126   : > { %1318 = sbr.rel (%p8713_p3) target bundleno = 11966 (0x2ebe), region = 184  ;;  %p9536_p9 = scmp.eq.s32.totalorder (!%p8713_p3), %s8708_s0, 0 }
 0x12b   : > { %8381 = dma.done.wait (%p9536_p9), [#allocation3], 1024   ;;  %p9537_p7 = pmov %p9536_p9 }
 0x12d   : > { %8383 = vsyncadd (%p9537_p7), [#allocation3], 4294966272  ;;  %p9538_p6 = pmov %p9537_p7 }
 0x12f   : > { %8385 = dma.done.wait (%p9538_p6), [#allocation5], 1056   ;;  %p9539_p2 = pmov %p9538_p6 }
 0x131   : > { %8387 = vsyncadd (%p9539_p2), [#allocation5], 4294966240  ;;  %p9540_p11 = pmov %p9539_p2 }
 0x132   : > { %p9541_p5 = pmov %p9539_p2 }
 0x133   : > { %8389 = dma.done.wait (%p9540_p11), [#allocation8], 1056  }
 0x134   : > { %8391 = vsyncadd (%p9541_p5), [#allocation8], 4294966240  ;;  %p9542_p3 = pmov %p9539_p2 }
 0x135   : > { %p9543_p10 = pmov %p9539_p2 }
 0x136   : > { %8393 = dma.done.wait (%p9542_p3), [#allocation11], 64  }
 0x137   : > { %8395 = vsyncadd (%p9543_p10), [#allocation11], 4294967232  ;;  %p9544_p13 = pmov %p9539_p2 }
 0x138   : > { %p9545_p12 = pmov %p9539_p2 }
 0x139   : > { %8397 = dma.done.wait (%p9544_p13), [#allocation14], 64  }
 0x13a   : > { %8399 = vsyncadd (%p9545_p12), [#allocation14], 4294967232  ;;  %p9546_p0 = pmov %p9539_p2 }
 0x13c   : > { %8401 = dma.done.wait (%p9546_p0), [#allocation17], 64   ;;  %p9547_p4 = pmov %p9546_p0 }
 0x13d   : > { %p9548_p1 = pmov %p9546_p0 }
 0x13e   : > { %8403 = vsyncadd (%p9547_p4), [#allocation17], 4294967232 }
 0x13f   : > { %8405 = dma.done.wait (%p9548_p1), [#allocation20], 1056   ;;  %p9549_p8 = pmov %p9546_p0 }
 0x140   : > { %p9550_p9 = pmov %p9546_p0 }
 0x141   : > { %8407 = vsyncadd (%p9549_p8), [#allocation20], 4294966240 }
 0x142   : > { %8409 = dma.done.wait (%p9550_p9), [#allocation23], 1056   ;;  %p9551_p7 = pmov %p9546_p0 }
 0x143   : > { %p9552_p6 = pmov %p9546_p0 }
 0x144   : > { %8411 = vsyncadd (%p9551_p7), [#allocation23], 4294966240 }
 0x145   : > { %8413 = dma.done.wait (%p9552_p6), [#allocation26], 528   ;;  %p9553_p2 = pmov %p9546_p0 }
 0x146   : > { %s9554_s10 = sld [smem:[#allocation42_spill]]  ;;  %p1484_p11 = scmp.lt.s32.totalorder %s8708_s0, 1  ;;  %v8482_v0 = vmov 0.0   ;;  %vm8483_vm0 = vmmov 0   ;;  %vm1520_vm1 = vcmask 261120   ;;  %vm1670_vm2 = vcmask 130048  }
 0x147   : > { %8415 = vsyncadd (%p9553_p2), [#allocation26], 4294966768  ;;  %s9555_s22 = sld [smem:[#allocation40_spill]]  ;;  %7213 = vmatprep.subr.mxu1 %v8482_v0  ;;  %7202 = vmatprep.subr.mxu0 %v8482_v0  ;;  %s9483_s1 = smov 112   ;;  %vm1748_vm3 = vcmask 64512   ;;  %vm3529_vm4 = vcmask 46080  }
 0x148   : > { %s9556_s28 = sld [smem:[#allocation37_spill]]  ;;  %7221 = vmatprep.mubr.msk.f32.mxu1 %vm8483_vm0, %v8482_v0  ;;  %s9582_s0 = smov (!%p1484_p11, %s8708_s0), 1  ;;  %7210 = vmatprep.mubr.msk.f32.mxu0 %vm8483_vm0, %v8482_v0  ;;  %vm3547_vm5 = vcmask 1045504   ;;  %vm3543_vm6 = vcmask 48128   ;;  %vm3944_vm7 = vcmask 259072   ;;  %vm4222_vm8 = vcmask 62464  }
 0x149   : > { %s8917_s2 = sshll.u32 %s9582_s0, 3  ;;  %s9557_s0 = sld [smem:[#allocation43_spill]] }
 0x14a   : > { %s9558_s18 = sld [smem:[#allocation41_spill]]  ;;  %s9479_s23 = smov 96  }
 0x14b   : > { %s9559_s26 = sld [smem:[#allocation44_spill]]  ;;  %s9481_s15 = smov 80  }
 0x14c   : > { %v1507_v1 = vld [vmem:[%s9554_s10 + $0x18] sm:$0xff]  ;;  %v1506_v3 = vld [vmem:[%s9554_s10 + $0x10] sm:$0xff]  ;;  %v1505_v5 = vld [vmem:[%s9554_s10 + $0x8] sm:$0xff]  ;;  %s9560_s16 = sld [smem:[#allocation45_spill]]  ;;  %s9569_s6 = smov 112  }
 0x14d   : > { %v1502_v2 = vld [vmem:[%s9555_s22 + $0x18] sm:$0xff]  ;;  %7214 = vmatpush3.msra.mxu1 %v1507_v1  ;;  %v1501_v4 = vld [vmem:[%s9555_s22 + $0x10] sm:$0xff]  ;;  %v1500_v6 = vld [vmem:[%s9555_s22 + $0x8] sm:$0xff]  ;;  %s9561_s11 = sld [smem:[#allocation48_spill]]  ;;  %s9571_s8 = smov 96  }
 0x14e   : > { %7203 = vmatpush3.msra.mxu0 %v1502_v2  ;;  %7215 = vmatprep.subr.mxu1 %v8482_v0  ;;  %s1487_s4 = scalar_lea.vmem %s9556_s28, %s8917_s2  ;;  %v1504_v7 = vld [vmem:[%s9554_s10] sm:$0xff]  ;;  %s9562_s28 = sld [smem:[#allocation50_spill]] }
 0x14f   : > { %7204 = vmatprep.subr.mxu0 %v8482_v0  ;;  %7216 = vmatpush3.msra.mxu1 %v1506_v3  ;;  %v1499_v8 = vld [vmem:[%s9555_s22] sm:$0xff]  ;;  %s9567_s3 = sld [smem:[#allocation52_spill]] }
 0x150   : > { %7205 = vmatpush3.msra.mxu0 %v1501_v4  ;;  %7217 = vmatprep.subr.mxu1 %v8482_v0  ;;  %v8933_v9 = vld [vmem:[%s1487_s4] sm:$0xff]  ;;  %s9563_s4 = sld [smem:[#allocation46_spill]] }
 0x151   : > { %7206 = vmatprep.subr.mxu0 %v8482_v0  ;;  %7218 = vmatpush3.msra.mxu1 %v1505_v5  ;;  %v6848_v10 = vld [vmem:[%s9557_s0] ss:$0 sm:$0xff]  ;;  %v1512_v42 = vld [vmem:[%s9559_s26 + $0x18] sm:$0xff]  ;;  %v1510_v47 = vld [vmem:[%s9559_s26 + $0x8] sm:$0xff]  ;;  %s9568_s5 = sld [smem:[#allocation53_spill]] }
 0x152   : > { %7207 = vmatpush3.msra.mxu0 %v1500_v6  ;;  %7219 = vmatprep.subr.mxu1 %v8482_v0  ;;  %v6846_v11 = vld [vmem:[%s9558_s18] ss:$0 sm:$0xff]  ;;  %v1511_v49 = vld [vmem:[%s9559_s26 + $0x10] sm:$0xff]  ;;  %s9572_s9 = sld [smem:[#allocation54_spill]] }
 0x153   : > { %7208 = vmatprep.subr.mxu0 %v8482_v0  ;;  %7220 = vmatpush3.msra.mxu1 %v1504_v7  ;;  %v1509_v48 = vld [vmem:[%s9559_s26] sm:$0xff]  ;;  %v2189_v5 = vld [vmem:[%s9561_s11 + $0x18] sm:$0xff]  ;;  %v2188_v6 = vld [vmem:[%s9561_s11 + $0x10] sm:$0xff]  ;;  %s9577_s12 = sld [smem:[#allocation39_spill]] }
 0x154   : > { %7209 = vmatpush3.msra.mxu0 %v1499_v8  ;;  %7222 = vmatmul.mubr.msk.f32.vlgmr.msra.gmra.mxu1 %vm1520_vm1, %v8933_v9  ;;  %v6858_v56 = vld [vmem:[%s9560_s16] ss:$0 sm:$0xff]  ;;  %v2187_v7 = vld [vmem:[%s9561_s11 + $0x8] sm:$0xff] }
 0x155   : > { %7211 = vmatmul.mubr.msk.f32.vlgmr.msra.gmra.mxu0 %vm1520_vm1, %v8933_v9  ;;  %7224 = vmatprep.subr.mxu1 %v8482_v0  ;;  %v2186_v8 = vld [vmem:[%s9561_s11] sm:$0xff] }
 0x156   : > { %7226 = vmatprep.mubr.msk.f32.mxu1 %vm8483_vm0, %v8482_v0  ;;  %7234 = vmatprep.subr.mxu0 %v8482_v0 }
 0x157   : > { %7236 = vmatprep.mubr.msk.f32.mxu0 %vm8483_vm0, %v8482_v0 }
 0x214   : > { %v1666_v12 = vpop.f32.mrf.mxu1 }
 0x215   : > { %v1590_v13 = vpop.f32.mrf.mxu0  ;;  %v1667_v14 = vadd.f32 %v6848_v10, %v1666_v12 }
 0x216   : > { %v1591_v15 = vadd.f32 %v6846_v11, %v1590_v13  ;;  %v7223_v16 = vpop.f32.mrf.mxu1 }
 0x217   : > { %v7212_v17 = vpop.f32.mrf.mxu0  ;;  %1838 = vrot.lane.b32.xlu0 %v1667_v14, %s9483_s1  ;;  %7225 = vmatpush3.xpose.msk.msra.mxu1 %vm1670_vm2, %v1667_v14 }
 0x218   : > { %7229 = vmatprep.subr.mxu1 %v8482_v0 }
 0x21a   : > { %7227 = vmatmul.mubr.msk.f32.vlgmr.msra.gmra.mxu1 %vm1670_vm2, %v1591_v15 }
 0x21b   : > { %1836 = vrot.lane.b32.xlu0 %v1591_v15, %s9483_s1  ;;  %7231 = vmatprep.mubr.msk.f32.mxu1 %vm8483_vm0, %v8482_v0  ;;  %s9566_s1 = sld [smem:[#allocation51_spill]] }
 0x289   : > { %v1839_v18 = vpop.permute.xlu0 %1838 }
 0x28a   : > { %7235 = vmatpush3.xpose.msk.msra.mxu0 %vm1670_vm2, %v1839_v18 }
 0x28b   : > { %7244 = vmatprep.subr.mxu0 %v8482_v0 }
 0x28d   : > { %v1837_v19 = vpop.permute.xlu0 %1836 }
 0x28e   : > { %7237 = vmatmul.mubr.msk.f32.vlgmr.msra.gmra.mxu0 %vm1670_vm2, %v1837_v19  ;;  %v2193_v19 = vld [vmem:[%s9562_s28 + $0x10] sm:$0xff] }
 0x28f   : > { %7248 = vmatprep.mubr.msk.f32.mxu0 %vm8483_vm0, %v8482_v0  ;;  %7245 = vmatpush3.msra.mxu0 %v1512_v42  ;;  %v6868_v42 = vld [vmem:[%s9555_s22 + $0x28] sm:$0xff] }
 0x290   : > { %7246 = vmatprep.subr.mxu0 %v8482_v0 }
 0x291   : > { %7247 = vmatpush3.msra.mxu0 %v1511_v49 }
 0x292   : > { %7258 = vmatprep.subr.mxu0 %v8482_v0 }
 0x2da   : > { %v1743_v20 = vpop.f32.mrf.mxu1 }
 0x2db   : > { %v1747_v21 = vmul.f32 0.25, %v1743_v20  ;;  %v2192_v20 = vld [vmem:[%s9562_s28 + $0x8] sm:$0xff] }
 0x2dc   : > { %v7228_v22 = vpop.f32.mrf.mxu1 }
 0x2dd   : > { %v1749_v23 = vsel %vm1748_vm3, %v1747_v21, -inf }
 0x2de   : > { %1750 = vmax.xlane.f32.xlu1 %v1749_v23 }
 0x34e   : > { %v1910_v24 = vpop.f32.mrf.mxu0 }
 0x34f   : > { %v1914_v25 = vmul.f32 0.25, %v1910_v24 }
 0x350   : > { %v7238_v26 = vpop.f32.mrf.mxu0 }
 0x351   : > { %v1915_v27 = vsel %vm1748_vm3, %v1914_v25, -inf }
 0x352   : > { %1916 = vmax.xlane.f32.xlu1 %v1915_v27  ;;  %v6863_v27 = vld [vmem:[%s9566_s1] ss:$0 sm:$0xff] }
 0x363   : > { %1760 = vrot.lane.b32.xlu1 %v1667_v14, %s9479_s23  ;;  %s9564_s23 = sld [smem:[#allocation47_spill]] }
 0x367   : > { %v1751_v28 = vpop.xlane.xlu1 %1750 }
 0x368   : > { %v1752_v29 = vsub.f32 %v1747_v21, %v1751_v28  ;;  %v2191_v21 = vld [vmem:[%s9562_s28] sm:$0xff] }
 0x369   : > { %v6860_v16 = vld [vmem:[%s9564_s23] ss:$0 sm:$0xff] }
 0x36a   : > { %v1753_v30 = vmul.f32 1.442695, %v1752_v29 }
 0x36c   : > { %7866 = vpow2.f32 %v1753_v30 }
 0x379   : > { %v7867_v31 = vpop.eup %7866 }
 0x37a   : > { %v1755_v32 = vsel %vm1748_vm3, %v7867_v31, 0.0 }
 0x37b   : > { %1756 = vadd.xlane.f32.xlu0 %v1755_v32 }
 0x3db   : > { %v1917_v33 = vpop.xlane.xlu1 %1916 }
 0x3dc   : > { %v1918_v34 = vsub.f32 %v1914_v25, %v1917_v33 }
 0x3de   : > { %v1919_v35 = vmul.f32 1.442695, %v1918_v34 }
 0x3df   : > { %v1761_v36 = vpop.permute.xlu1 %1760 }
 0x3e0   : > { %7868 = vpow2.f32 %v1919_v35  ;;  %7230 = vmatpush3.msra.mxu1 %v1761_v36 }
 0x3e1   : > { %7239 = vmatprep.subr.mxu1 %v8482_v0 }
 0x3ed   : > { %v7869_v37 = vpop.eup %7868 }
 0x3ee   : > { %v1921_v38 = vsel %vm1748_vm3, %v7869_v37, 0.0 }
 0x3ef   : > { %1922 = vadd.xlane.f32.xlu1 %v1921_v38  ;;  %v6870_v38 = vld [vmem:[%s9555_s22 + $0x38] sm:$0xff] }
 0x400   : > { %1926 = vrot.lane.b32.xlu1 %v1667_v14, %s9481_s15  ;;  %v6859_v14 = vld [vmem:[%s9563_s4] ss:$0 sm:$0xff]  ;;  %s9565_s15 = sld [smem:[#allocation49_spill]] }
 0x404   : > { %v1757_v39 = vpop.xlane.xlu0 %1756 }
 0x405   : > { %7870 = vrcp.f32 %v1757_v39  ;;  %v6875_v39 = vld [vmem:[%s9554_s10 + $0x38] sm:$0xff] }
 0x406   : > { %v6861_v22 = vld [vmem:[%s9565_s15] ss:$0 sm:$0xff] }
 0x412   : > { %v7871_v40 = vpop.eup %7870 }
 0x413   : > { %v1759_v41 = vmul.f32 %v7871_v40, %v7867_v31  ;;  %v6869_v40 = vld [vmem:[%s9555_s22 + $0x30] sm:$0xff] }
 0x415   : > { %7232 = vmatmul.mubr.msk.f32.vlgmr.msra.gmra.mxu1 %vm1748_vm3, %v1759_v41  ;;  %v6874_v41 = vld [vmem:[%s9554_s10 + $0x30] sm:$0xff] }
 0x416   : > { %7241 = vmatprep.mubr.msk.f32.mxu1 %vm8483_vm0, %v8482_v0 }
 0x478   : > { %v1923_v43 = vpop.xlane.xlu1 %1922 }
 0x479   : > { %7872 = vrcp.f32 %v1923_v43  ;;  %v6873_v43 = vld [vmem:[%s9554_s10 + $0x28] sm:$0xff] }
 0x47c   : > { %v1927_v44 = vpop.permute.xlu1 %1926 }
 0x47d   : > { %7240 = vmatpush3.msra.mxu1 %v1927_v44  ;;  %v6867_v44 = vld [vmem:[%s9555_s22 + $0x20] sm:$0xff] }
 0x47e   : > { %7251 = vmatprep.subr.mxu1 %v8482_v0 }
 0x486   : > { %v7873_v45 = vpop.eup %7872 }
 0x487   : > { %v1925_v46 = vmul.f32 %v7873_v45, %v7869_v37  ;;  %v6872_v45 = vld [vmem:[%s9554_s10 + $0x20] sm:$0xff]  ;;  %s9573_s10 = sld [smem:[#allocation38_spill]] }
 0x489   : > { %7242 = vmatmul.mubr.msk.f32.vlgmr.msra.gmra.mxu1 %vm1748_vm3, %v1925_v46 }
 0x48a   : > { %7252 = vmatpush3.msra.mxu1 %v1510_v47  ;;  %7255 = vmatprep.mubr.msk.f32.mxu1 %vm8483_vm0, %v8482_v0 }
 0x48b   : > { %7253 = vmatprep.subr.mxu1 %v8482_v0 }
 0x48c   : > { %7254 = vmatpush3.msra.mxu1 %v1509_v48 }
 0x48d   : > { %7269 = vmatprep.subr.mxu1 %v8482_v0 }
 0x4d5   : > { %v1832_v50 = vpop.f32.mrf.mxu1 }
 0x4d6   : > { %7256 = vmatmul.mubr.msk.f32.vlgmr.msra.gmra.mxu1 %vm1670_vm2, %v1832_v50  ;;  %v6865_v50 = vld [vmem:[%s9567_s3] ss:$0 sm:$0xff] }
 0x4d7   : > { %v7233_v51 = vpop.f32.mrf.mxu1  ;;  %7277 = vmatprep.mubr.msk.f32.mxu1 %vm8483_vm0, %v8482_v0 }
 0x549   : > { %v1998_v52 = vpop.f32.mrf.mxu1 }
 0x54a   : > { %7249 = vmatmul.mubr.msk.f32.vlgmr.msra.gmra.mxu0 %vm1670_vm2, %v1998_v52  ;;  %v6866_v52 = vld [vmem:[%s9568_s5] ss:$0 sm:$0xff] }
 0x54b   : > { %v7243_v53 = vpop.f32.mrf.mxu1  ;;  %7266 = vmatprep.mubr.msk.f32.mxu0 %vm8483_vm0, %v8482_v0  ;;  %7259 = vmatpush3.msra.mxu0 %v2189_v5 }
 0x54c   : > { %7260 = vmatprep.subr.mxu0 %v8482_v0 }
 0x54d   : > { %7261 = vmatpush3.msra.mxu0 %v2188_v6 }
 0x54e   : > { %7262 = vmatprep.subr.mxu0 %v8482_v0 }
 0x54f   : > { %7263 = vmatpush3.msra.mxu0 %v2187_v7 }
 0x550   : > { %7264 = vmatprep.subr.mxu0 %v8482_v0 }
 0x551   : > { %7265 = vmatpush3.msra.mxu0 %v2186_v8 }
 0x552   : > { %7280 = vmatprep.subr.mxu0 %v8482_v0 }
 0x596   : > { %v2144_v54 = vpop.f32.mrf.mxu1 }
 0x598   : > { %v7257_v55 = vpop.f32.mrf.mxu1 }
 0x599   : > { %v6882_v55 = vld [vmem:[%s9558_s18 + $0x1] ss:$0 sm:$0xff] }
 0x60a   : > { %v2071_v57 = vpop.f32.mrf.mxu0 }
 0x60b   : > { %v2145_v58 = vadd.f32 %v2144_v54, %v2071_v57 }
 0x60c   : > { %v7250_v59 = vpop.f32.mrf.mxu0 }
 0x60d   : > { %v2154_v60 = vadd.f32 %v6858_v56, %v2145_v58  ;;  %v6884_v56 = vld [vmem:[%s9557_s0 + $0x1] ss:$0 sm:$0xff]  ;;  %s9570_s0 = smov 80  }
 0x60f   : > { %v2155_v61 = vadd.f32 %v2154_v60, %v8933_v9  ;;  %v2194_v9 = vld [vmem:[%s9562_s28 + $0x18] sm:$0xff] }
 0x610   : > { %7270 = vmatpush3.msra.mxu1 %v2194_v9 }
 0x611   : > { %v2158_v62 = vsel %vm1520_vm1, %v2155_v61, 0.0  ;;  %7271 = vmatprep.subr.mxu1 %v8482_v0 }
 0x612   : > { %2159 = vadd.xlane.f32.xlu1 %v2158_v62  ;;  %7272 = vmatpush3.msra.mxu1 %v2193_v19 }
 0x613   : > { %7273 = vmatprep.subr.mxu1 %v8482_v0 }
 0x614   : > { %7274 = vmatpush3.msra.mxu1 %v2192_v20 }
 0x615   : > { %7275 = vmatprep.subr.mxu1 %v8482_v0 }
 0x616   : > { %7276 = vmatpush3.msra.mxu1 %v2191_v21 }
 0x617   : > { %7291 = vmatprep.subr.mxu1 %v8482_v0 }
 0x69b   : > { %v2160_v63 = vpop.xlane.xlu1 %2159 }
 0x69c   : > { %v2162_v1 = vmul.f32 0.03125, %v2160_v63 }
 0x69e   : > { %v2163_v2 = vsub.f32 %v2155_v61, %v2162_v1 }
 0x6a0   : > { %v2164_v3 = vmul.f32 %v2163_v2, %v2163_v2 }
 0x6a2   : > { %v2165_v4 = vsel %vm1520_vm1, %v2164_v3, 0.0 }
 0x6a3   : > { %2166 = vadd.xlane.f32.xlu0 %v2165_v4 }
 0x72c   : > { %v2167_v10 = vpop.xlane.xlu0 %2166 }
 0x72d   : > { %v2168_v11 = vmul.f32 0.03125, %v2167_v10 }
 0x72f   : > { %v2169_v12 = vadd.f32 1e-05, %v2168_v11 }
 0x731   : > { %7874 = vrsqrt.f32 %v2169_v12 }
 0x73e   : > { %v7875_v13 = vpop.eup %7874 }
 0x73f   : > { %v2171_v15 = vmul.f32 %v7875_v13, %v2163_v2 }
 0x741   : > { %v2178_v17 = vmul.f32 %v6859_v14, %v2171_v15 }
 0x743   : > { %v2185_v18 = vadd.f32 %v6860_v16, %v2178_v17 }
 0x745   : > { %7267 = vmatmul.mubr.msk.f32.vlgmr.msra.gmra.mxu0 %vm1520_vm1, %v2185_v18 }
 0x746   : > { %7288 = vmatprep.mubr.msk.f32.mxu0 %vm8483_vm0, %v8482_v0  ;;  %7281 = vmatpush3.msra.mxu0 %v6870_v38  ;;  %v6894_v38 = vld [vmem:[%s9560_s16 + $0x1] ss:$0 sm:$0xff] }
 0x747   : > { %7282 = vmatprep.subr.mxu0 %v8482_v0 }
 0x748   : > { %7283 = vmatpush3.msra.mxu0 %v6869_v40 }
 0x749   : > { %7284 = vmatprep.subr.mxu0 %v8482_v0 }
 0x74a   : > { %7285 = vmatpush3.msra.mxu0 %v6868_v42 }
 0x74b   : > { %7286 = vmatprep.subr.mxu0 %v8482_v0 }
 0x74c   : > { %7287 = vmatpush3.msra.mxu0 %v6867_v44 }
 0x74d   : > { %7302 = vmatprep.subr.mxu0 %v8482_v0 }
 0x805   : > { %v2271_v23 = vpop.f32.mrf.mxu0 }
 0x806   : > { %v2272_v24 = vadd.f32 %v6861_v22, %v2271_v23 }
 0x807   : > { %v7268_v25 = vpop.f32.mrf.mxu0 }
 0x808   : > { %v2275_v26 = vmax.f32 %v2272_v24, 0.0 }
 0x80a   : > { %7278 = vmatmul.mubr.msk.f32.vlgmr.msra.gmra.mxu1 %vm1520_vm1, %v2275_v26 }
 0x80b   : > { %7299 = vmatprep.mubr.msk.f32.mxu1 %vm8483_vm0, %v8482_v0  ;;  %7292 = vmatpush3.msra.mxu1 %v6875_v39 }
 0x80c   : > { %7293 = vmatprep.subr.mxu1 %v8482_v0 }
 0x80d   : > { %7294 = vmatpush3.msra.mxu1 %v6874_v41 }
 0x80e   : > { %7295 = vmatprep.subr.mxu1 %v8482_v0 }
 0x80f   : > { %7296 = vmatpush3.msra.mxu1 %v6873_v43 }
 0x810   : > { %7297 = vmatprep.subr.mxu1 %v8482_v0 }
 0x811   : > { %7298 = vmatpush3.msra.mxu1 %v6872_v45 }
 0x812   : > { %7307 = vmatprep.subr.mxu1 %v8482_v0 }
 0x8ca   : > { %v2351_v28 = vpop.f32.mrf.mxu1 }
 0x8cb   : > { %v2352_v29 = vadd.f32 %v6863_v27, %v2351_v28  ;;  %v6878_v28 = vld [vmem:[%s9559_s26 + $0x28] sm:$0xff] }
 0x8cc   : > { %v7279_v30 = vpop.f32.mrf.mxu1 }
 0x8cd   : > { %v2355_v31 = vadd.f32 %v2352_v29, %v2185_v18  ;;  %v6877_v29 = vld [vmem:[%s9559_s26 + $0x20] sm:$0xff]  ;;  %v6880_v30 = vld [vmem:[%s9559_s26 + $0x38] sm:$0xff] }
 0x8cf   : > { %v2358_v32 = vsel %vm1520_vm1, %v2355_v31, 0.0 }
 0x8d0   : > { %2359 = vadd.xlane.f32.xlu0 %v2358_v32 }
 0x959   : > { %v2360_v33 = vpop.xlane.xlu0 %2359 }
 0x95a   : > { %v2361_v34 = vmul.f32 0.03125, %v2360_v33 }
 0x95c   : > { %v2362_v35 = vsub.f32 %v2355_v31, %v2361_v34  ;;  %v6879_v31 = vld [vmem:[%s9559_s26 + $0x30] sm:$0xff] }
 0x95e   : > { %v2363_v36 = vmul.f32 %v2362_v35, %v2362_v35 }
 0x960   : > { %v2364_v37 = vsel %vm1520_vm1, %v2363_v36, 0.0 }
 0x961   : > { %2365 = vadd.xlane.f32.xlu0 %v2364_v37 }
 0x9ea   : > { %v2366_v46 = vpop.xlane.xlu0 %2365 }
 0x9eb   : > { %v2367_v47 = vmul.f32 0.03125, %v2366_v46 }
 0x9ed   : > { %v2368_v48 = vadd.f32 1e-05, %v2367_v47 }
 0x9ef   : > { %7876 = vrsqrt.f32 %v2368_v48 }
 0x9fc   : > { %v7877_v49 = vpop.eup %7876 }
 0x9fd   : > { %v2370_v51 = vmul.f32 %v7877_v49, %v2362_v35 }
 0x9ff   : > { %v2377_v53 = vmul.f32 %v6865_v50, %v2370_v51  ;;  %v6902_v50 = vld [vmem:[%s9561_s11 + $0x38] sm:$0xff]  ;;  %v6901_v51 = vld [vmem:[%s9561_s11 + $0x30] sm:$0xff] }
 0xa01   : > { %v9039_v54 = vadd.f32 %v6866_v52, %v2377_v53  ;;  %v6900_v52 = vld [vmem:[%s9561_s11 + $0x28] sm:$0xff]  ;;  %v6899_v53 = vld [vmem:[%s9561_s11 + $0x20] sm:$0xff]  ;;  %s1491_s11 = scalar_lea.vmem %s9573_s10, %s8917_s2  ;;  %s9575_s10 = sld [smem:[#allocation55_spill]] }
 0xa03   : > { %7289 = vmatmul.mubr.msk.f32.vlgmr.msra.gmra.mxu0 %vm1520_vm1, %v9039_v54  ;;  %7300 = vmatmul.mubr.msk.f32.vlgmr.msra.gmra.mxu1 %vm1520_vm1, %v9039_v54 }
 0xa04   : > { %7304 = vmatprep.mubr.msk.f32.mxu0 %vm8483_vm0, %v8482_v0  ;;  %7309 = vmatprep.mubr.msk.f32.mxu1 %vm8483_vm0, %v8482_v0 }
 0xac3   : > { %v2481_v57 = vpop.f32.mrf.mxu0  ;;  %v2557_v58 = vpop.f32.mrf.mxu1 }
 0xac4   : > { %v2482_v59 = vadd.f32 %v6882_v55, %v2481_v57  ;;  %v2558_v60 = vadd.f32 %v6884_v56, %v2557_v58  ;;  %v6906_v55 = vld [vmem:[%s9562_s28 + $0x30] sm:$0xff] }
 0xac5   : > { %v7290_v61 = vpop.f32.mrf.mxu0  ;;  %v7301_v62 = vpop.f32.mrf.mxu1 }
 0xac6   : > { %2727 = vrot.lane.b32.xlu0 %v2558_v60, %s9569_s6  ;;  %7303 = vmatpush3.xpose.msk.msra.mxu0 %vm1670_vm2, %v2558_v60  ;;  %v6898_v62 = vld [vmem:[%s9564_s23 + $0x1] ss:$0 sm:$0xff] }
 0xac7   : > { %2725 = vrot.lane.b32.xlu1 %v2482_v59, %s9569_s6  ;;  %7312 = vmatprep.subr.mxu0 %v8482_v0 }
 0xac9   : > { %7305 = vmatmul.mubr.msk.f32.vlgmr.msra.gmra.mxu0 %vm1670_vm2, %v2482_v59 }
 0xaca   : > { %7314 = vmatprep.mubr.msk.f32.mxu0 %vm8483_vm0, %v8482_v0 }
 0xb38   : > { %v2728_v63 = vpop.permute.xlu0 %2727 }
 0xb39   : > { %7313 = vmatpush3.xpose.msk.msra.mxu0 %vm1670_vm2, %v2728_v63  ;;  %v2726_v1 = vpop.permute.xlu1 %2725 }
 0xb3a   : > { %7322 = vmatprep.subr.mxu0 %v8482_v0 }
 0xb3c   : > { %7315 = vmatmul.mubr.msk.f32.vlgmr.msra.gmra.mxu0 %vm1670_vm2, %v2726_v1 }
 0xb3d   : > { %7326 = vmatprep.mubr.msk.f32.mxu0 %vm8483_vm0, %v8482_v0  ;;  %7323 = vmatpush3.msra.mxu0 %v6880_v30 }
 0xb3e   : > { %7324 = vmatprep.subr.mxu0 %v8482_v0 }
 0xb3f   : > { %7325 = vmatpush3.msra.mxu0 %v6879_v31  ;;  %v9166_v31 = vld [vmem:[%s9577_s12] sm:$0x3f]  ;;  %s9578_s12 = sld [smem:[#allocation58_spill]] }
 0xb40   : > { %7336 = vmatprep.subr.mxu0 %v8482_v0 }
 0xb89   : > { %v2633_v2 = vpop.f32.mrf.mxu0 }
 0xb8a   : > { %v2637_v3 = vmul.f32 0.25, %v2633_v2  ;;  %v6905_v2 = vld [vmem:[%s9562_s28 + $0x28] sm:$0xff] }
 0xb8b   : > { %v7306_v4 = vpop.f32.mrf.mxu0 }
 0xb8c   : > { %v2638_v5 = vsel %vm1748_vm3, %v2637_v3, -inf  ;;  %v3284_v4 = vld [vmem:[%s9572_s9 + $0x18] sm:$0xff] }
 0xb8d   : > { %2639 = vmax.xlane.f32.xlu0 %v2638_v5  ;;  %v3283_v5 = vld [vmem:[%s9572_s9 + $0x10] sm:$0xff] }
 0xbfc   : > { %v2799_v6 = vpop.f32.mrf.mxu0 }
 0xbfd   : > { %v2803_v7 = vmul.f32 0.25, %v2799_v6  ;;  %v3282_v6 = vld [vmem:[%s9572_s9 + $0x8] sm:$0xff] }
 0xbfe   : > { %v7316_v8 = vpop.f32.mrf.mxu0 }
 0xbff   : > { %v2804_v9 = vsel %vm1748_vm3, %v2803_v7, -inf  ;;  %v9128_v8 = vld [vmem:[%s1491_s11] sm:$0x3f]  ;;  %s9576_s11 = sld [smem:[#allocation57_spill]] }
 0xc00   : > { %2805 = vmax.xlane.f32.xlu1 %v2804_v9  ;;  %v6909_v9 = vld [vmem:[%s9565_s15 + $0x1] ss:$0 sm:$0xff] }
 0xc11   : > { %2815 = vrot.lane.b32.xlu1 %v2558_v60, %s9570_s0 }
 0xc16   : > { %v2640_v10 = vpop.xlane.xlu0 %2639 }
 0xc17   : > { %v2641_v11 = vsub.f32 %v2637_v3, %v2640_v10  ;;  %v6904_v3 = vld [vmem:[%s9562_s28 + $0x20] sm:$0xff] }
 0xc19   : > { %v2642_v12 = vmul.f32 1.442695, %v2641_v11 }
 0xc1b   : > { %7878 = vpow2.f32 %v2642_v12 }
 0xc28   : > { %v7879_v13 = vpop.eup %7878 }
 0xc29   : > { %v2644_v14 = vsel %vm1748_vm3, %v7879_v13, 0.0 }
 0xc2a   : > { %2645 = vadd.xlane.f32.xlu0 %v2644_v14 }
 0xc89   : > { %v2806_v15 = vpop.xlane.xlu1 %2805 }
 0xc8a   : > { %v2807_v16 = vsub.f32 %v2803_v7, %v2806_v15  ;;  %v3281_v7 = vld [vmem:[%s9572_s9] sm:$0xff] }
 0xc8c   : > { %v2808_v17 = vmul.f32 1.442695, %v2807_v16 }
 0xc8d   : > { %v2816_v25 = vpop.permute.xlu1 %2815 }
 0xc8e   : > { %7880 = vpow2.f32 %v2808_v17 }
 0xc9b   : > { %v7881_v18 = vpop.eup %7880 }
 0xc9c   : > { %v2810_v19 = vsel %vm1748_vm3, %v7881_v18, 0.0 }
 0xc9d   : > { %2811 = vadd.xlane.f32.xlu0 %v2810_v19 }
 0xcb3   : > { %2649 = vrot.lane.b32.xlu0 %v2558_v60, %s9571_s8  ;;  %v2646_v20 = vpop.xlane.xlu0 %2645  ;;  %v6897_v60 = vld [vmem:[%s9563_s4 + $0x1] ss:$0 sm:$0xff]  ;;  %s9574_s4 = sld [smem:[#allocation56_spill]] }
 0xcb4   : > { %7882 = vrcp.f32 %v2646_v20 }
 0xcb9   : > { %v3289_v14 = vld [vmem:[%s9574_s4 + $0x18] sm:$0xff]  ;;  %v3288_v15 = vld [vmem:[%s9574_s4 + $0x10] sm:$0xff]  ;;  %v3287_v16 = vld [vmem:[%s9574_s4 + $0x8] sm:$0xff] }
 0xcba   : > { %v3286_v17 = vld [vmem:[%s9574_s4] sm:$0xff] }
 0xcc1   : > { %v7883_v22 = vpop.eup %7882 }
 0xcc2   : > { %v2648_v24 = vmul.f32 %v7883_v22, %v7879_v13 }
 0xd26   : > { %v2812_v21 = vpop.xlane.xlu0 %2811 }
 0xd27   : > { %7884 = vrcp.f32 %v2812_v21 }
 0xd2a   : > { %v2650_v23 = vpop.permute.xlu0 %2649 }
 0xd2b   : > { %7308 = vmatpush3.msra.mxu1 %v2650_v23 }
 0xd2c   : > { %7310 = vmatmul.mubr.msk.f32.vlgmr.msra.gmra.mxu1 %vm1748_vm3, %v2648_v24  ;;  %7317 = vmatprep.subr.mxu1 %v8482_v0  ;;  %v6919_v24 = vld [vmem:[%s9576_s11] ss:$0 sm:$0xff] }
 0xd2d   : > { %7318 = vmatpush3.msra.mxu1 %v2816_v25  ;;  %7319 = vmatprep.mubr.msk.f32.mxu1 %vm8483_vm0, %v8482_v0 }
 0xd2e   : > { %7329 = vmatprep.subr.mxu1 %v8482_v0 }
 0xd34   : > { %v7885_v26 = vpop.eup %7884 }
 0xd35   : > { %v2814_v27 = vmul.f32 %v7885_v26, %v7881_v18  ;;  %v6917_v18 = vld [vmem:[%s9575_s10] ss:$0 sm:$0xff] }
 0xd37   : > { %7320 = vmatmul.mubr.msk.f32.vlgmr.msra.gmra.mxu1 %vm1748_vm3, %v2814_v27 }
 0xd38   : > { %7330 = vmatpush3.msra.mxu1 %v6878_v28  ;;  %7333 = vmatprep.mubr.msk.f32.mxu1 %vm8483_vm0, %v8482_v0 }
 0xd39   : > { %7331 = vmatprep.subr.mxu1 %v8482_v0 }
 0xd3a   : > { %7332 = vmatpush3.msra.mxu1 %v6877_v29 }
 0xd3b   : > { %7347 = vmatprep.subr.mxu1 %v8482_v0 }
 0xdec   : > { %v2721_v32 = vpop.f32.mrf.mxu1 }
 0xded   : > { %7334 = vmatmul.mubr.msk.f32.vlgmr.msra.gmra.mxu1 %vm1670_vm2, %v2721_v32 }
 0xdee   : > { %v7311_v33 = vpop.f32.mrf.mxu1  ;;  %7355 = vmatprep.mubr.msk.f32.mxu1 %vm8483_vm0, %v8482_v0 }
 0xdf7   : > { %v2887_v34 = vpop.f32.mrf.mxu1 }
 0xdf8   : > { %7327 = vmatmul.mubr.msk.f32.vlgmr.msra.gmra.mxu0 %vm1670_vm2, %v2887_v34 }
 0xdf9   : > { %v7321_v35 = vpop.f32.mrf.mxu1  ;;  %7344 = vmatprep.mubr.msk.f32.mxu0 %vm8483_vm0, %v8482_v0  ;;  %7337 = vmatpush3.msra.mxu0 %v6902_v50 }
 0xdfa   : > { %7338 = vmatprep.subr.mxu0 %v8482_v0 }
 0xdfb   : > { %7339 = vmatpush3.msra.mxu0 %v6901_v51 }
 0xdfc   : > { %7340 = vmatprep.subr.mxu0 %v8482_v0 }
 0xdfd   : > { %7341 = vmatpush3.msra.mxu0 %v6900_v52 }
 0xdfe   : > { %7342 = vmatprep.subr.mxu0 %v8482_v0 }
 0xdff   : > { %7343 = vmatpush3.msra.mxu0 %v6899_v53 }
 0xe00   : > { %7358 = vmatprep.subr.mxu0 %v8482_v0 }
 0xead   : > { %v3033_v36 = vpop.f32.mrf.mxu1 }
 0xeaf   : > { %v7335_v37 = vpop.f32.mrf.mxu1 }
 0xeb8   : > { %v2960_v39 = vpop.f32.mrf.mxu0 }
 0xeb9   : > { %v3034_v40 = vadd.f32 %v3033_v36, %v2960_v39 }
 0xeba   : > { %v7328_v41 = vpop.f32.mrf.mxu0 }
 0xebb   : > { %v3043_v42 = vadd.f32 %v6894_v38, %v3034_v40 }
 0xebd   : > { %v3044_v43 = vadd.f32 %v3043_v42, %v9039_v54  ;;  %v6907_v54 = vld [vmem:[%s9562_s28 + $0x38] sm:$0xff] }
 0xebe   : > { %7348 = vmatpush3.msra.mxu1 %v6907_v54 }
 0xebf   : > { %v3049_v44 = vsel %vm1520_vm1, %v3044_v43, 0.0  ;;  %7349 = vmatprep.subr.mxu1 %v8482_v0 }
 0xec0   : > { %3050 = vadd.xlane.f32.xlu0 %v3049_v44  ;;  %7350 = vmatpush3.msra.mxu1 %v6906_v55 }
 0xec1   : > { %7351 = vmatprep.subr.mxu1 %v8482_v0 }
 0xec2   : > { %7352 = vmatpush3.msra.mxu1 %v6905_v2  ;;  %v3294_v2 = vld [vmem:[%s9578_s12 + $0x18] sm:$0xff] }
 0xec3   : > { %7353 = vmatprep.subr.mxu1 %v8482_v0 }
 0xec4   : > { %7354 = vmatpush3.msra.mxu1 %v6904_v3  ;;  %v3293_v3 = vld [vmem:[%s9578_s12 + $0x10] sm:$0xff] }
 0xec5   : > { %7369 = vmatprep.subr.mxu1 %v8482_v0 }
 0xf49   : > { %v3051_v45 = vpop.xlane.xlu0 %3050 }
 0xf4a   : > { %v3052_v46 = vmul.f32 0.03125, %v3051_v45  ;;  %v6911_v45 = vld [vmem:[%s9566_s1 + $0x1] ss:$0 sm:$0xff]  ;;  %s9579_s1 = sld [smem:[#allocation59_spill]] }
 0xf4c   : > { %v3053_v47 = vsub.f32 %v3044_v43, %v3052_v46 }
 0xf4e   : > { %v3054_v48 = vmul.f32 %v3053_v47, %v3053_v47 }
 0xf50   : > { %v3055_v49 = vsel %vm1520_vm1, %v3054_v48, 0.0 }
 0xf51   : > { %3056 = vadd.xlane.f32.xlu1 %v3055_v49 }
 0xfda   : > { %v3057_v56 = vpop.xlane.xlu1 %3056 }
 0xfdb   : > { %v3058_v57 = vmul.f32 0.03125, %v3057_v56 }
 0xfdd   : > { %v3059_v58 = vadd.f32 1e-05, %v3058_v57 }
 0xfdf   : > { %7886 = vrsqrt.f32 %v3059_v58 }
 0xfec   : > { %v7887_v59 = vpop.eup %7886 }
 0xfed   : > { %v3061_v61 = vmul.f32 %v7887_v59, %v3053_v47 }
 0xfef   : > { %v3068_v63 = vmul.f32 %v6897_v60, %v3061_v61 }
 0xff1   : > { %v9109_v1 = vadd.f32 %v6898_v62, %v3068_v63  ;;  %v3292_v63 = vld [vmem:[%s9578_s12 + $0x8] sm:$0xff] }
 0xff3   : > { %7345 = vmatmul.mubr.msk.f32.vlgmr.msra.gmra.mxu0 %vm1520_vm1, %v9109_v1 }
 0xff4   : > { %7366 = vmatprep.mubr.msk.f32.mxu0 %vm8483_vm0, %v8482_v0  ;;  %7359 = vmatpush3.msra.mxu0 %v3284_v4 }
 0xff5   : > { %7360 = vmatprep.subr.mxu0 %v8482_v0 }
 0xff6   : > { %7361 = vmatpush3.msra.mxu0 %v3283_v5 }
 0xff7   : > { %7362 = vmatprep.subr.mxu0 %v8482_v0 }
 0xff8   : > { %7363 = vmatpush3.msra.mxu0 %v3282_v6 }
 0xff9   : > { %7364 = vmatprep.subr.mxu0 %v8482_v0 }
 0xffa   : > { %7365 = vmatpush3.msra.mxu0 %v3281_v7 }
 0xffb   : > { %7367 = vmatmul.mubr.msk.f32.vlgmr.msra.gmra.mxu0 %vm1520_vm1, %v9128_v8  ;;  %7380 = vmatprep.subr.mxu0 %v8482_v0 }
 0xffc   : > { %7382 = vmatprep.mubr.msk.f32.mxu0 %vm8483_vm0, %v8482_v0 }
0x10b3   : > { %v3165_v10 = vpop.f32.mrf.mxu0 }
0x10b4   : > { %v3166_v11 = vadd.f32 %v6909_v9, %v3165_v10 }
0x10b5   : > { %v7346_v12 = vpop.f32.mrf.mxu0 }
0x10b6   : > { %v3169_v13 = vmax.f32 %v3166_v11, 0.0 }
0x10b8   : > { %7356 = vmatmul.mubr.msk.f32.vlgmr.msra.gmra.mxu1 %vm1520_vm1, %v3169_v13  ;;  %v6931_v13 = vld [vmem:[%s9579_s1] ss:$0 sm:$0xff] }
0x10b9   : > { %7370 = vmatpush3.msra.mxu1 %v3289_v14  ;;  %7377 = vmatprep.mubr.msk.f32.mxu1 %vm8483_vm0, %v8482_v0 }
0x10ba   : > { %7371 = vmatprep.subr.mxu1 %v8482_v0 }
0x10bb   : > { %7372 = vmatpush3.msra.mxu1 %v3288_v15  ;;  %v3371_v19 = vpop.f32.mrf.mxu0 }
0x10bc   : > { %7373 = vmatprep.subr.mxu1 %v8482_v0  ;;  %v3372_v20 = vadd.f32 %v6917_v18, %v3371_v19 }
0x10bd   : > { %7374 = vmatpush3.msra.mxu1 %v3287_v16  ;;  %v7368_v21 = vpop.f32.mrf.mxu0 }
0x10be   : > { %7375 = vmatprep.subr.mxu1 %v8482_v0  ;;  %3620 = vrot.lane.b32.xlu1 %v3372_v20, %s9569_s6 }
0x10bf   : > { %7376 = vmatpush3.msra.mxu1 %v3286_v17 }
0x10c0   : > { %7378 = vmatmul.mubr.msk.f32.vlgmr.msra.gmra.mxu1 %vm1520_vm1, %v9128_v8  ;;  %7385 = vmatprep.subr.mxu1 %v8482_v0 }
0x10c1   : > { %7387 = vmatprep.mubr.msk.f32.mxu1 %vm8483_vm0, %v8482_v0 }
0x1130   : > { %v3621_v29 = vpop.permute.xlu1 %3620 }
0x1178   : > { %v3245_v22 = vpop.f32.mrf.mxu1 }
0x1179   : > { %v3246_v47 = vadd.f32 %v6911_v45, %v3245_v22 }
0x117a   : > { %v7357_v23 = vpop.f32.mrf.mxu1 }
0x117b   : > { %v3249_v48 = vadd.f32 %v3246_v47, %v9109_v1  ;;  %v3291_v1 = vld [vmem:[%s9578_s12] sm:$0xff]  ;;  %v3980_v23 = vld [vmem:[#allocation4 + $0x18] sm:$0xff] }
0x117d   : > { %v3254_v49 = vsel %vm1520_vm1, %v3249_v48, 0.0 }
0x1180   : > { %v3447_v25 = vpop.f32.mrf.mxu1 }
0x1181   : > { %v3448_v26 = vadd.f32 %v6919_v24, %v3447_v25  ;;  %v3979_v24 = vld [vmem:[#allocation4 + $0x10] sm:$0xff]  ;;  %v3978_v25 = vld [vmem:[#allocation4 + $0x8] sm:$0xff] }
0x1182   : > { %v7379_v27 = vpop.f32.mrf.mxu1 }
0x1183   : > { %3622 = vrot.lane.b32.xlu0 %v3448_v26, %s9569_s6  ;;  %7381 = vmatpush3.xpose.msk.msra.mxu0 %vm1670_vm2, %v3448_v26 }
0x1184   : > { %7390 = vmatprep.subr.mxu0 %v8482_v0 }
0x1186   : > { %7383 = vmatmul.mubr.msk.f32.vlgmr.msra.gmra.mxu0 %vm1670_vm2, %v3372_v20 }
0x1187   : > { %7392 = vmatprep.mubr.msk.f32.mxu0 %vm8483_vm0, %v8482_v0 }
0x11f5   : > { %v3623_v28 = vpop.permute.xlu0 %3622 }
0x11f6   : > { %7391 = vmatpush3.xpose.msk.msra.mxu0 %vm1670_vm2, %v3623_v28 }
0x11f7   : > { %7400 = vmatprep.subr.mxu0 %v8482_v0 }
0x11f9   : > { %7393 = vmatmul.mubr.msk.f32.vlgmr.msra.gmra.mxu0 %vm1670_vm2, %v3621_v29 }
0x11fa   : > { %7404 = vmatprep.mubr.msk.f32.mxu0 %vm8483_vm0, %v8482_v0  ;;  %7401 = vmatpush3.msra.mxu0 %v3294_v2 }
0x11fb   : > { %7402 = vmatprep.subr.mxu0 %v8482_v0 }
0x11fc   : > { %7403 = vmatpush3.msra.mxu0 %v3293_v3 }
0x11fd   : > { %7414 = vmatprep.subr.mxu0 %v8482_v0 }
0x1246   : > { %v3523_v30 = vpop.f32.mrf.mxu0 }
0x1247   : > { %v3527_v32 = vmul.f32 0.25, %v3523_v30 }
0x1248   : > { %v7384_v33 = vpop.f32.mrf.mxu0 }
0x1249   : > { %v3528_v34 = vadd.f32 %v3527_v32, %v9166_v31 }
0x124b   : > { %v3530_v35 = vsel %vm3529_vm4, %v3528_v34, -inf }
0x124c   : > { %3531 = vmax.xlane.f32.xlu0 %v3530_v35 }
0x12b9   : > { %v3694_v36 = vpop.f32.mrf.mxu0 }
0x12ba   : > { %v3698_v37 = vmul.f32 0.25, %v3694_v36  ;;  %v6915_v36 = vld [vmem:[%s9567_s3 + $0x1] ss:$0 sm:$0xff]  ;;  %s9580_s3 = sld [smem:[#allocation61_spill]] }
0x12bb   : > { %v7394_v38 = vpop.f32.mrf.mxu0 }
0x12bc   : > { %v3699_v39 = vadd.f32 %v3698_v37, %v9166_v31  ;;  %v6916_v38 = vld [vmem:[%s9568_s5 + $0x1] ss:$0 sm:$0xff] }
0x12be   : > { %v3700_v40 = vsel %vm3529_vm4, %v3699_v39, -inf }
0x12bf   : > { %3701 = vmax.xlane.f32.xlu1 %v3700_v40 }
0x12d0   : > { %3711 = vrot.lane.b32.xlu1 %v3448_v26, %s9570_s0 }
0x12d5   : > { %v3532_v41 = vpop.xlane.xlu0 %3531 }
0x12d6   : > { %v3533_v42 = vsub.f32 %v3528_v34, %v3532_v41  ;;  %v3975_v41 = vld [vmem:[#allocation2 + $0x18] sm:$0xff] }
0x12d8   : > { %v3534_v43 = vmul.f32 1.442695, %v3533_v42  ;;  %v3974_v42 = vld [vmem:[#allocation2 + $0x10] sm:$0xff] }
0x12da   : > { %7888 = vpow2.f32 %v3534_v43  ;;  %v3973_v43 = vld [vmem:[#allocation2 + $0x8] sm:$0xff] }
0x12e7   : > { %v7889_v44 = vpop.eup %7888 }
0x12e8   : > { %v3536_v46 = vsel %vm3529_vm4, %v7889_v44, 0.0 }
0x12e9   : > { %3537 = vadd.xlane.f32.xlu0 %v3536_v46 }
0x12f4   : > { %3255 = vadd.xlane.f32.xlu1 %v3254_v49  ;;  %v6932_v49 = vld [vmem:[#allocation10] ss:$0 sm:$0xff] }
0x1348   : > { %v3702_v50 = vpop.xlane.xlu1 %3701 }
0x1349   : > { %v3703_v51 = vsub.f32 %v3699_v39, %v3702_v50 }
0x134b   : > { %v3704_v52 = vmul.f32 1.442695, %v3703_v51  ;;  %v6933_v51 = vld [vmem:[#allocation12] ss:$0 sm:$0xff] }
0x134c   : > { %v3712_v60 = vpop.permute.xlu1 %3711 }
0x134d   : > { %7890 = vpow2.f32 %v3704_v52 }
0x135a   : > { %v7891_v53 = vpop.eup %7890 }
0x135b   : > { %v3706_v54 = vsel %vm3529_vm4, %v7891_v53, 0.0 }
0x135c   : > { %3707 = vadd.xlane.f32.xlu0 %v3706_v54  ;;  %v6936_v54 = vld [vmem:[#allocation6] ss:$0 sm:$0xff] }
0x1372   : > { %3541 = vrot.lane.b32.xlu0 %v3448_v26, %s9571_s8  ;;  %v3538_v55 = vpop.xlane.xlu0 %3537  ;;  %v3977_v26 = vld [vmem:[#allocation4] sm:$0xff] }
0x1373   : > { %7892 = vrcp.f32 %v3538_v55 }
0x137d   : > { %v3256_v11 = vpop.xlane.xlu1 %3255 }
0x137e   : > { %v3257_v12 = vmul.f32 0.03125, %v3256_v11 }
0x1380   : > { %v7893_v57 = vpop.eup %7892  ;;  %v3258_v17 = vsub.f32 %v3249_v48, %v3257_v12 }
0x1381   : > { %v3540_v59 = vmul.f32 %v7893_v57, %v7889_v44  ;;  %v3972_v44 = vld [vmem:[#allocation2] sm:$0xff] }
0x1382   : > { %v3259_v21 = vmul.f32 %v3258_v17, %v3258_v17 }
0x1384   : > { %v3260_v22 = vsel %vm1520_vm1, %v3259_v21, 0.0 }
0x13e5   : > { %v3708_v56 = vpop.xlane.xlu0 %3707 }
0x13e6   : > { %7894 = vrcp.f32 %v3708_v56 }
0x13e9   : > { %v3542_v58 = vpop.permute.xlu0 %3541 }
0x13ea   : > { %7386 = vmatpush3.msk.msra.mxu1 %vm3547_vm5, %v3542_v58  ;;  %v6934_v58 = vld [vmem:[%s9580_s3] ss:$0 sm:$0xff] }
0x13eb   : > { %7388 = vmatmul.mubr.msk.f32.vlgmr.msra.gmra.mxu1 %vm3543_vm6, %v3540_v59  ;;  %7395 = vmatprep.subr.mxu1 %v8482_v0 }
0x13ec   : > { %7396 = vmatpush3.msk.msra.mxu1 %vm3547_vm5, %v3712_v60  ;;  %7397 = vmatprep.mubr.msk.f32.mxu1 %vm8483_vm0, %v8482_v0 }
0x13ed   : > { %7407 = vmatprep.subr.mxu1 %v8482_v0 }
0x13f3   : > { %v7895_v61 = vpop.eup %7894 }
0x13f4   : > { %v3710_v62 = vmul.f32 %v7895_v61, %v7891_v53 }
0x13f6   : > { %7398 = vmatmul.mubr.msk.f32.vlgmr.msra.gmra.mxu1 %vm3543_vm6, %v3710_v62 }
0x13f7   : > { %7408 = vmatpush3.msra.mxu1 %v3292_v63  ;;  %7411 = vmatprep.mubr.msk.f32.mxu1 %vm8483_vm0, %v8482_v0 }
0x13f8   : > { %7409 = vmatprep.subr.mxu1 %v8482_v0 }
0x13f9   : > { %7410 = vmatpush3.msra.mxu1 %v3291_v1 }
0x13fa   : > { %7425 = vmatprep.subr.mxu1 %v8482_v0 }
0x14ab   : > { %v3616_v4 = vpop.f32.mrf.mxu1 }
0x14ac   : > { %7412 = vmatmul.mubr.msk.f32.vlgmr.msra.gmra.mxu1 %vm1670_vm2, %v3616_v4 }
0x14ad   : > { %v7389_v5 = vpop.f32.mrf.mxu1  ;;  %7433 = vmatprep.mubr.msk.f32.mxu1 %vm8483_vm0, %v8482_v0  ;;  %7426 = vmatpush3.msra.mxu1 %v3980_v23 }
0x14ae   : > { %7427 = vmatprep.subr.mxu1 %v8482_v0 }
0x14af   : > { %7428 = vmatpush3.msra.mxu1 %v3979_v24  ;;  %v3985_v24 = vld [vmem:[#allocation7 + $0x18] sm:$0xff] }
0x14b0   : > { %7429 = vmatprep.subr.mxu1 %v8482_v0 }
0x14b1   : > { %7430 = vmatpush3.msra.mxu1 %v3978_v25 }
0x14b2   : > { %7431 = vmatprep.subr.mxu1 %v8482_v0 }
0x14b3   : > { %7432 = vmatpush3.msra.mxu1 %v3977_v26 }
0x14b4   : > { %7441 = vmatprep.subr.mxu1 %v8482_v0 }
0x14b6   : > { %v3784_v6 = vpop.f32.mrf.mxu1 }
0x14b7   : > { %7405 = vmatmul.mubr.msk.f32.vlgmr.msra.gmra.mxu0 %vm1670_vm2, %v3784_v6 }
0x14b8   : > { %v7399_v7 = vpop.f32.mrf.mxu1  ;;  %7422 = vmatprep.mubr.msk.f32.mxu0 %vm8483_vm0, %v8482_v0  ;;  %7415 = vmatpush3.msra.mxu0 %v3975_v41 }
0x14b9   : > { %7416 = vmatprep.subr.mxu0 %v8482_v0 }
0x14ba   : > { %7417 = vmatpush3.msra.mxu0 %v3974_v42 }
0x14bb   : > { %7418 = vmatprep.subr.mxu0 %v8482_v0 }
0x14bc   : > { %7419 = vmatpush3.msra.mxu0 %v3973_v43 }
0x14bd   : > { %7420 = vmatprep.subr.mxu0 %v8482_v0 }
0x14be   : > { %7421 = vmatpush3.msra.mxu0 %v3972_v44 }
0x14bf   : > { %7436 = vmatprep.subr.mxu0 %v8482_v0 }
0x156c   : > { %v3930_v9 = vpop.f32.mrf.mxu1 }
0x156e   : > { %v7413_v10 = vpop.f32.mrf.mxu1 }
0x1577   : > { %v3857_v14 = vpop.f32.mrf.mxu0 }
0x1578   : > { %v3931_v15 = vadd.f32 %v3930_v9, %v3857_v14 }
0x1579   : > { %v7406_v16 = vpop.f32.mrf.mxu0 }
0x157a   : > { %v3940_v18 = vadd.f32 %v6931_v13, %v3931_v15 }
0x157c   : > { %v3941_v19 = vadd.f32 %v3940_v18, %v9128_v8 }
0x157e   : > { %v3945_v20 = vsel %vm3944_vm7, %v3941_v19, 0.0 }
0x157f   : > { %3946 = vadd.xlane.f32.xlu0 %v3945_v20 }
0x1583   : > { %3261 = vadd.xlane.f32.xlu0 %v3260_v22 }
0x1608   : > { %v3947_v8 = vpop.xlane.xlu0 %3946 }
0x1609   : > { %v3948_v27 = vmul.f32 0.03125, %v3947_v8 }
0x160b   : > { %v3949_v28 = vsub.f32 %v3941_v19, %v3948_v27 }
0x160c   : > { %v3262_v29 = vpop.xlane.xlu0 %3261 }
0x160d   : > { %v3263_v30 = vmul.f32 0.03125, %v3262_v29  ;;  %v3950_v32 = vmul.f32 %v3949_v28, %v3949_v28  ;;  %v3982_v29 = vld [vmem:[#allocation7] sm:$0xff] }
0x160f   : > { %v3264_v33 = vadd.f32 1e-05, %v3263_v30  ;;  %v3951_v34 = vsel %vm3944_vm7, %v3950_v32, 0.0  ;;  %v3984_v30 = vld [vmem:[#allocation7 + $0x10] sm:$0xff] }
0x1610   : > { %3952 = vadd.xlane.f32.xlu1 %v3951_v34 }
0x1611   : > { %7896 = vrsqrt.f32 %v3264_v33 }
0x161e   : > { %v7897_v35 = vpop.eup %7896 }
0x161f   : > { %v3266_v37 = vmul.f32 %v7897_v35, %v3258_v17 }
0x1621   : > { %v3273_v39 = vmul.f32 %v6915_v36, %v3266_v37 }
0x1623   : > { %v9214_v40 = vadd.f32 %v6916_v38, %v3273_v39  ;;  %v6946_v38 = vld [vmem:[#allocation9] ss:$0 sm:$0xff] }
0x1625   : > { %7434 = vmatmul.mubr.msk.f32.vlgmr.msra.gmra.mxu1 %vm1520_vm1, %v9214_v40 }
0x1626   : > { %7443 = vmatprep.mubr.msk.f32.mxu1 %vm8483_vm0, %v8482_v0 }
0x1699   : > { %v3953_v45 = vpop.xlane.xlu1 %3952 }
0x169a   : > { %v3954_v46 = vmul.f32 0.03125, %v3953_v45 }
0x169c   : > { %v3955_v47 = vadd.f32 1e-05, %v3954_v46 }
0x169e   : > { %7898 = vrsqrt.f32 %v3955_v47 }
0x16ab   : > { %v7899_v48 = vpop.eup %7898 }
0x16ac   : > { %v3957_v50 = vmul.f32 %v7899_v48, %v3949_v28  ;;  %v3983_v28 = vld [vmem:[#allocation7 + $0x8] sm:$0xff] }
0x16ae   : > { %v3964_v52 = vmul.f32 %v6932_v49, %v3957_v50 }
0x16b0   : > { %v9224_v53 = vadd.f32 %v6933_v51, %v3964_v52  ;;  %v4662_v51 = vld [vmem:[#allocation19 + $0x18] sm:$0xff]  ;;  %v4661_v52 = vld [vmem:[#allocation19 + $0x10] sm:$0xff] }
0x16b2   : > { %7423 = vmatmul.mubr.msk.f32.vlgmr.msra.gmra.mxu0 %vm1520_vm1, %v9224_v53 }
0x16b3   : > { %7438 = vmatprep.mubr.msk.f32.mxu0 %vm8483_vm0, %v8482_v0 }
0x16e5   : > { %v4141_v55 = vpop.f32.mrf.mxu1 }
0x16e6   : > { %v4142_v56 = vadd.f32 %v6936_v54, %v4141_v55  ;;  %v4660_v54 = vld [vmem:[#allocation19 + $0x8] sm:$0xff]  ;;  %v4667_v55 = vld [vmem:[#allocation22 + $0x18] sm:$0xff] }
0x16e7   : > { %v7435_v57 = vpop.f32.mrf.mxu1 }
0x16e8   : > { %4312 = vrot.lane.b32.xlu0 %v4142_v56, %s9569_s6  ;;  %7437 = vmatpush3.xpose.msk.msra.mxu0 %vm1670_vm2, %v4142_v56 }
0x16e9   : > { %7446 = vmatprep.subr.mxu0 %v8482_v0 }
0x175a   : > { %v4313_v62 = vpop.permute.xlu0 %4312 }
0x1772   : > { %v4062_v59 = vpop.f32.mrf.mxu0 }
0x1773   : > { %v4063_v60 = vadd.f32 %v6934_v58, %v4062_v59 }
0x1774   : > { %v7424_v61 = vpop.f32.mrf.mxu0 }
0x1775   : > { %4310 = vrot.lane.b32.xlu1 %v4063_v60, %s9569_s6  ;;  %7439 = vmatmul.mubr.msk.f32.vlgmr.msra.gmra.mxu0 %vm1670_vm2, %v4063_v60  ;;  %v6947_v60 = vld [vmem:[#allocation13] ss:$0 sm:$0xff] }
0x1776   : > { %7447 = vmatpush3.xpose.msk.msra.mxu0 %vm1670_vm2, %v4313_v62  ;;  %7448 = vmatprep.mubr.msk.f32.mxu0 %vm8483_vm0, %v8482_v0  ;;  %v6948_v62 = vld [vmem:[#allocation15] ss:$0 sm:$0xff] }
0x1777   : > { %7456 = vmatprep.subr.mxu0 %v8482_v0 }
0x17e7   : > { %v4311_v63 = vpop.permute.xlu1 %4310 }
0x17e8   : > { %7449 = vmatmul.mubr.msk.f32.vlgmr.msra.gmra.mxu0 %vm1670_vm2, %v4311_v63 }
0x17e9   : > { %7460 = vmatprep.mubr.msk.f32.mxu0 %vm8483_vm0, %v8482_v0  ;;  %7457 = vmatpush3.msra.mxu0 %v3985_v24  ;;  %v6957_v24 = vld [vmem:[%s9572_s9 + $0x30] sm:$0xff] }
0x17ea   : > { %7458 = vmatprep.subr.mxu0 %v8482_v0 }
0x17eb   : > { %7459 = vmatpush3.msra.mxu0 %v3984_v30 }
0x17ec   : > { %7470 = vmatprep.subr.mxu0 %v8482_v0 }
0x1835   : > { %v4217_v1 = vpop.f32.mrf.mxu0 }
0x1836   : > { %v4221_v2 = vmul.f32 0.25, %v4217_v1 }
0x1837   : > { %v7440_v3 = vpop.f32.mrf.mxu0 }
0x1838   : > { %v4223_v4 = vsel %vm4222_vm8, %v4221_v2, -inf  ;;  %v4665_v3 = vld [vmem:[#allocation22 + $0x8] sm:$0xff] }
0x1839   : > { %4224 = vmax.xlane.f32.xlu1 %v4223_v4  ;;  %v4664_v4 = vld [vmem:[#allocation22] sm:$0xff] }
0x18a8   : > { %v4384_v5 = vpop.f32.mrf.mxu0 }
0x18a9   : > { %v4388_v6 = vmul.f32 0.25, %v4384_v5  ;;  %v6949_v5 = vld [vmem:[#allocation21] ss:$0 sm:$0xff] }
0x18aa   : > { %v7450_v7 = vpop.f32.mrf.mxu0 }
0x18ab   : > { %v4389_v9 = vsel %vm4222_vm8, %v4388_v6, -inf }
0x18ac   : > { %4390 = vmax.xlane.f32.xlu0 %v4389_v9 }
0x18c2   : > { %v4225_v10 = vpop.xlane.xlu1 %4224 }
0x18c3   : > { %v4226_v11 = vsub.f32 %v4221_v2, %v4225_v10  ;;  %v4666_v2 = vld [vmem:[#allocation22 + $0x10] sm:$0xff] }
0x18c5   : > { %v4227_v12 = vmul.f32 1.442695, %v4226_v11  ;;  %v6951_v11 = vld [vmem:[#allocation24] ss:$0 sm:$0xff] }
0x18c7   : > { %7900 = vpow2.f32 %v4227_v12 }
0x18d4   : > { %v7901_v13 = vpop.eup %7900 }
0x18d5   : > { %v4229_v14 = vsel %vm4222_vm8, %v7901_v13, 0.0 }
0x18d6   : > { %4230 = vadd.xlane.f32.xlu0 %v4229_v14 }
0x18ec   : > { %4234 = vrot.lane.b32.xlu0 %v4142_v56, %s9571_s8 }
0x1935   : > { %v4391_v15 = vpop.xlane.xlu0 %4390 }
0x1936   : > { %v4392_v16 = vsub.f32 %v4388_v6, %v4391_v15 }
0x1938   : > { %v4393_v17 = vmul.f32 1.442695, %v4392_v16 }
0x193a   : > { %7902 = vpow2.f32 %v4393_v17 }
0x1947   : > { %v7903_v18 = vpop.eup %7902 }
0x1948   : > { %v4395_v19 = vsel %vm4222_vm8, %v7903_v18, 0.0 }
0x1949   : > { %4396 = vadd.xlane.f32.xlu1 %v4395_v19 }
0x195a   : > { %4400 = vrot.lane.b32.xlu1 %v4142_v56, %s9570_s0 }
0x195f   : > { %v4231_v20 = vpop.xlane.xlu0 %4230 }
0x1960   : > { %7904 = vrcp.f32 %v4231_v20 }
0x1963   : > { %v4235_v21 = vpop.permute.xlu0 %4234 }
0x1964   : > { %7442 = vmatpush3.msra.mxu1 %v4235_v21 }
0x1965   : > { %7451 = vmatprep.subr.mxu1 %v8482_v0 }
0x196d   : > { %v7905_v22 = vpop.eup %7904 }
0x196e   : > { %v4233_v23 = vmul.f32 %v7905_v22, %v7901_v13  ;;  %v6958_v22 = vld [vmem:[%s9572_s9 + $0x38] sm:$0xff] }
0x1970   : > { %7444 = vmatmul.mubr.msk.f32.vlgmr.msra.gmra.mxu1 %vm1748_vm3, %v4233_v23  ;;  %v6963_v23 = vld [vmem:[%s9574_s4 + $0x38] sm:$0xff] }
0x1971   : > { %7453 = vmatprep.mubr.msk.f32.mxu1 %vm8483_vm0, %v8482_v0 }
0x19d2   : > { %v4397_v25 = vpop.xlane.xlu1 %4396 }
0x19d3   : > { %7906 = vrcp.f32 %v4397_v25  ;;  %v6962_v25 = vld [vmem:[%s9574_s4 + $0x30] sm:$0xff] }
0x19d6   : > { %v4401_v26 = vpop.permute.xlu1 %4400 }
0x19d7   : > { %7452 = vmatpush3.msra.mxu1 %v4401_v26  ;;  %v6956_v26 = vld [vmem:[%s9572_s9 + $0x28] sm:$0xff] }
0x19d8   : > { %7463 = vmatprep.subr.mxu1 %v8482_v0 }
0x19e0   : > { %v7907_v8 = vpop.eup %7906 }
0x19e1   : > { %v4399_v27 = vmul.f32 %v7907_v8, %v7903_v18  ;;  %v6961_v8 = vld [vmem:[%s9574_s4 + $0x28] sm:$0xff] }
0x19e3   : > { %7454 = vmatmul.mubr.msk.f32.vlgmr.msra.gmra.mxu1 %vm1748_vm3, %v4399_v27  ;;  %v6955_v27 = vld [vmem:[%s9572_s9 + $0x20] sm:$0xff] }
0x19e4   : > { %7464 = vmatpush3.msra.mxu1 %v3983_v28  ;;  %7467 = vmatprep.mubr.msk.f32.mxu1 %vm8483_vm0, %v8482_v0  ;;  %v6960_v28 = vld [vmem:[%s9574_s4 + $0x20] sm:$0xff] }
0x19e5   : > { %7465 = vmatprep.subr.mxu1 %v8482_v0 }
0x19e6   : > { %7466 = vmatpush3.msra.mxu1 %v3982_v29 }
0x19e7   : > { %7481 = vmatprep.subr.mxu1 %v8482_v0 }
0x1a30   : > { %v4306_v32 = vpop.f32.mrf.mxu1 }
0x1a31   : > { %7468 = vmatmul.mubr.msk.f32.vlgmr.msra.gmra.mxu1 %vm1670_vm2, %v4306_v32 }
0x1a32   : > { %v7445_v33 = vpop.f32.mrf.mxu1  ;;  %7489 = vmatprep.mubr.msk.f32.mxu1 %vm8483_vm0, %v8482_v0  ;;  %7482 = vmatpush3.msra.mxu1 %v4667_v55 }
0x1a33   : > { %7483 = vmatprep.subr.mxu1 %v8482_v0 }
0x1a34   : > { %7484 = vmatpush3.msra.mxu1 %v4666_v2 }
0x1a35   : > { %7485 = vmatprep.subr.mxu1 %v8482_v0 }
0x1a36   : > { %7486 = vmatpush3.msra.mxu1 %v4665_v3 }
0x1a37   : > { %7487 = vmatprep.subr.mxu1 %v8482_v0 }
0x1a38   : > { %7488 = vmatpush3.msra.mxu1 %v4664_v4 }
0x1a39   : > { %7503 = vmatprep.subr.mxu1 %v8482_v0 }
0x1aa3   : > { %v4472_v34 = vpop.f32.mrf.mxu1 }
0x1aa4   : > { %7461 = vmatmul.mubr.msk.f32.vlgmr.msra.gmra.mxu0 %vm1670_vm2, %v4472_v34  ;;  %v6953_v34 = vld [vmem:[#allocation16] ss:$0 sm:$0xff] }
0x1aa5   : > { %v7455_v35 = vpop.f32.mrf.mxu1  ;;  %7478 = vmatprep.mubr.msk.f32.mxu0 %vm8483_vm0, %v8482_v0  ;;  %7471 = vmatpush3.msra.mxu0 %v4662_v51 }
0x1aa6   : > { %7472 = vmatprep.subr.mxu0 %v8482_v0 }
0x1aa7   : > { %7473 = vmatpush3.msra.mxu0 %v4661_v52 }
0x1aa8   : > { %7474 = vmatprep.subr.mxu0 %v8482_v0 }
0x1aa9   : > { %7475 = vmatpush3.msra.mxu0 %v4660_v54 }
0x1aaa   : > { %7476 = vmatprep.subr.mxu0 %v8482_v0 }
0x1af1   : > { %v4618_v36 = vpop.f32.mrf.mxu1 }
0x1af3   : > { %v7469_v37 = vpop.f32.mrf.mxu1 }
0x1b64   : > { %v4545_v39 = vpop.f32.mrf.mxu0 }
0x1b65   : > { %v4619_v41 = vadd.f32 %v4618_v36, %v4545_v39  ;;  %v6954_v36 = vld [vmem:[#allocation18] ss:$0 sm:$0xff]  ;;  %v6970_v39 = vld [vmem:[%s9575_s10 + $0x1] ss:$0 sm:$0xff] }
0x1b66   : > { %v7462_v42 = vpop.f32.mrf.mxu0 }
0x1b67   : > { %v4628_v43 = vadd.f32 %v6946_v38, %v4619_v41  ;;  %v6972_v41 = vld [vmem:[%s9576_s11 + $0x1] ss:$0 sm:$0xff] }
0x1b69   : > { %v4629_v44 = vadd.f32 %v4628_v43, %v9224_v53  ;;  %v4659_v53 = vld [vmem:[#allocation19] sm:$0xff] }
0x1b6a   : > { %7477 = vmatpush3.msra.mxu0 %v4659_v53 }
0x1b6b   : > { %v4632_v45 = vsel %vm3944_vm7, %v4629_v44, 0.0  ;;  %7492 = vmatprep.subr.mxu0 %v8482_v0 }
0x1b6c   : > { %4633 = vadd.xlane.f32.xlu1 %v4632_v45 }
0x1bf5   : > { %v4634_v46 = vpop.xlane.xlu1 %4633 }
0x1bf6   : > { %v4635_v47 = vmul.f32 0.03125, %v4634_v46 }
0x1bf8   : > { %v4636_v48 = vsub.f32 %v4629_v44, %v4635_v47 }
0x1bfa   : > { %v4637_v49 = vmul.f32 %v4636_v48, %v4636_v48 }
0x1bfc   : > { %v4638_v50 = vsel %vm3944_vm7, %v4637_v49, 0.0 }
0x1bfd   : > { %4639 = vadd.xlane.f32.xlu0 %v4638_v50 }
0x1c86   : > { %v4640_v56 = vpop.xlane.xlu0 %4639 }
0x1c87   : > { %v4641_v57 = vmul.f32 0.03125, %v4640_v56 }
0x1c89   : > { %v4642_v58 = vadd.f32 1e-05, %v4641_v57 }
0x1c8b   : > { %7908 = vrsqrt.f32 %v4642_v58 }
0x1c98   : > { %v7909_v59 = vpop.eup %7908 }
0x1c99   : > { %v4644_v61 = vmul.f32 %v7909_v59, %v4636_v48 }
0x1c9b   : > { %v4651_v63 = vmul.f32 %v6947_v60, %v4644_v61 }
0x1c9d   : > { %v4658_v1 = vadd.f32 %v6948_v62, %v4651_v63 }
0x1c9f   : > { %7479 = vmatmul.mubr.msk.f32.vlgmr.msra.gmra.mxu0 %vm1520_vm1, %v4658_v1 }
0x1ca0   : > { %7500 = vmatprep.mubr.msk.f32.mxu0 %vm8483_vm0, %v8482_v0  ;;  %7493 = vmatpush3.msra.mxu0 %v6958_v22 }
0x1ca1   : > { %7494 = vmatprep.subr.mxu0 %v8482_v0 }
0x1ca2   : > { %7495 = vmatpush3.msra.mxu0 %v6957_v24  ;;  %v5561_v24 = vld [vmem:[#allocation4 + $0x20] sm:$0xff] }
0x1ca3   : > { %7496 = vmatprep.subr.mxu0 %v8482_v0 }
0x1ca4   : > { %7497 = vmatpush3.msra.mxu0 %v6956_v26 }
0x1ca5   : > { %7498 = vmatprep.subr.mxu0 %v8482_v0 }
0x1ca6   : > { %7499 = vmatpush3.msra.mxu0 %v6955_v27 }
0x1ca7   : > { %7514 = vmatprep.subr.mxu0 %v8482_v0 }
0x1d5f   : > { %v4744_v6 = vpop.f32.mrf.mxu0 }
0x1d60   : > { %v4745_v7 = vadd.f32 %v6949_v5, %v4744_v6 }
0x1d61   : > { %v7480_v9 = vpop.f32.mrf.mxu0 }
0x1d62   : > { %v4748_v10 = vmax.f32 %v4745_v7, 0.0 }
0x1d64   : > { %7490 = vmatmul.mubr.msk.f32.vlgmr.msra.gmra.mxu1 %vm1520_vm1, %v4748_v10 }
0x1d65   : > { %7511 = vmatprep.mubr.msk.f32.mxu1 %vm8483_vm0, %v8482_v0  ;;  %7504 = vmatpush3.msra.mxu1 %v6963_v23  ;;  %v5562_v23 = vld [vmem:[#allocation4 + $0x28] sm:$0xff] }
0x1d66   : > { %7505 = vmatprep.subr.mxu1 %v8482_v0 }
0x1d67   : > { %7506 = vmatpush3.msra.mxu1 %v6962_v25 }
0x1d68   : > { %7507 = vmatprep.subr.mxu1 %v8482_v0 }
0x1d69   : > { %7508 = vmatpush3.msra.mxu1 %v6961_v8 }
0x1d6a   : > { %7509 = vmatprep.subr.mxu1 %v8482_v0 }
0x1d6b   : > { %7510 = vmatpush3.msra.mxu1 %v6960_v28 }
0x1d6c   : > { %7519 = vmatprep.subr.mxu1 %v8482_v0 }
0x1e24   : > { %v4824_v12 = vpop.f32.mrf.mxu1 }
0x1e25   : > { %v4825_v13 = vadd.f32 %v6951_v11, %v4824_v12  ;;  %v6968_v11 = vld [vmem:[%s9578_s12 + $0x38] sm:$0xff] }
0x1e26   : > { %v7491_v14 = vpop.f32.mrf.mxu1 }
0x1e27   : > { %v4828_v15 = vadd.f32 %v4825_v13, %v4658_v1 }
0x1e29   : > { %v4831_v16 = vsel %vm3944_vm7, %v4828_v15, 0.0 }
0x1e2a   : > { %4832 = vadd.xlane.f32.xlu0 %v4831_v16  ;;  %v6966_v16 = vld [vmem:[%s9578_s12 + $0x28] sm:$0xff] }
0x1eb3   : > { %v4833_v17 = vpop.xlane.xlu0 %4832 }
0x1eb4   : > { %v4834_v18 = vmul.f32 0.03125, %v4833_v17  ;;  %v6965_v17 = vld [vmem:[%s9578_s12 + $0x20] sm:$0xff] }
0x1eb6   : > { %v4835_v19 = vsub.f32 %v4828_v15, %v4834_v18  ;;  %v6967_v18 = vld [vmem:[%s9578_s12 + $0x30] sm:$0xff] }
0x1eb8   : > { %v4836_v20 = vmul.f32 %v4835_v19, %v4835_v19 }
0x1eba   : > { %v4837_v21 = vsel %vm3944_vm7, %v4836_v20, 0.0 }
0x1ebb   : > { %4838 = vadd.xlane.f32.xlu1 %v4837_v21  ;;  %v5563_v21 = vld [vmem:[#allocation4 + $0x30] sm:$0xff] }
0x1f44   : > { %v4839_v29 = vpop.xlane.xlu1 %4838 }
0x1f45   : > { %v4840_v30 = vmul.f32 0.03125, %v4839_v29 }
0x1f47   : > { %v4841_v32 = vadd.f32 1e-05, %v4840_v30  ;;  %v6984_v30 = vld [vmem:[%s9579_s1 + $0x1] ss:$0 sm:$0xff] }
0x1f49   : > { %7910 = vrsqrt.f32 %v4841_v32 }
0x1f56   : > { %v7911_v33 = vpop.eup %7910 }
0x1f57   : > { %v4843_v35 = vmul.f32 %v7911_v33, %v4835_v19  ;;  %v5564_v19 = vld [vmem:[#allocation4 + $0x38] sm:$0xff] }
0x1f59   : > { %v4850_v37 = vmul.f32 %v6953_v34, %v4843_v35 }
0x1f5b   : > { %v9302_v38 = vadd.f32 %v6954_v36, %v4850_v37 }
0x1f5d   : > { %7501 = vmatmul.mubr.msk.f32.vlgmr.msra.gmra.mxu0 %vm1520_vm1, %v9302_v38  ;;  %7512 = vmatmul.mubr.msk.f32.vlgmr.msra.gmra.mxu1 %vm1520_vm1, %v9302_v38 }
0x1f5e   : > { %7516 = vmatprep.mubr.msk.f32.mxu0 %vm8483_vm0, %v8482_v0  ;;  %7521 = vmatprep.mubr.msk.f32.mxu1 %vm8483_vm0, %v8482_v0 }
0x201d   : > { %v4954_v42 = vpop.f32.mrf.mxu0  ;;  %v5030_v43 = vpop.f32.mrf.mxu1 }
0x201e   : > { %v4955_v44 = vadd.f32 %v6970_v39, %v4954_v42  ;;  %v5031_v45 = vadd.f32 %v6972_v41, %v5030_v43 }
0x201f   : > { %v7502_v46 = vpop.f32.mrf.mxu0  ;;  %v7513_v47 = vpop.f32.mrf.mxu1 }
0x2020   : > { %5202 = vrot.lane.b32.xlu0 %v5031_v45, %s9569_s6  ;;  %7515 = vmatpush3.xpose.msk.msra.mxu0 %vm1670_vm2, %v5031_v45  ;;  %v5557_v46 = vld [vmem:[#allocation2 + $0x38] sm:$0xff]  ;;  %v5555_v47 = vld [vmem:[#allocation2 + $0x28] sm:$0xff] }
0x2021   : > { %5200 = vrot.lane.b32.xlu1 %v4955_v44, %s9569_s6  ;;  %7524 = vmatprep.subr.mxu0 %v8482_v0 }
0x2023   : > { %7517 = vmatmul.mubr.msk.f32.vlgmr.msra.gmra.mxu0 %vm1670_vm2, %v4955_v44  ;;  %v6990_v44 = vld [vmem:[#allocation6 + $0x1] ss:$0 sm:$0xff] }
0x2024   : > { %7526 = vmatprep.mubr.msk.f32.mxu0 %vm8483_vm0, %v8482_v0 }
0x2092   : > { %v5203_v48 = vpop.permute.xlu0 %5202 }
0x2093   : > { %7525 = vmatpush3.xpose.msk.msra.mxu0 %vm1670_vm2, %v5203_v48  ;;  %v5201_v49 = vpop.permute.xlu1 %5200  ;;  %v5554_v48 = vld [vmem:[#allocation2 + $0x20] sm:$0xff] }
0x2094   : > { %7534 = vmatprep.subr.mxu0 %v8482_v0 }
0x2096   : > { %7527 = vmatmul.mubr.msk.f32.vlgmr.msra.gmra.mxu0 %vm1670_vm2, %v5201_v49 }
0x2097   : > { %7538 = vmatprep.mubr.msk.f32.mxu0 %vm8483_vm0, %v8482_v0  ;;  %7535 = vmatpush3.msra.mxu0 %v6968_v11 }
0x2098   : > { %7536 = vmatprep.subr.mxu0 %v8482_v0 }
0x2099   : > { %7537 = vmatpush3.msra.mxu0 %v6967_v18 }
0x209a   : > { %7548 = vmatprep.subr.mxu0 %v8482_v0 }
0x20e3   : > { %v5106_v50 = vpop.f32.mrf.mxu0 }
0x20e4   : > { %v5110_v51 = vmul.f32 0.25, %v5106_v50 }
0x20e5   : > { %v7518_v52 = vpop.f32.mrf.mxu0 }
0x20e6   : > { %v5111_v54 = vadd.f32 %v5110_v51, %v9166_v31 }
0x20e8   : > { %v5112_v53 = vsel %vm3529_vm4, %v5111_v54, -inf }
0x20e9   : > { %5113 = vmax.xlane.f32.xlu1 %v5112_v53 }
0x2156   : > { %v5274_v55 = vpop.f32.mrf.mxu0 }
0x2157   : > { %v5278_v56 = vmul.f32 0.25, %v5274_v55  ;;  %v6986_v55 = vld [vmem:[#allocation12 + $0x1] ss:$0 sm:$0xff] }
0x2158   : > { %v7528_v57 = vpop.f32.mrf.mxu0 }
0x2159   : > { %v5279_v58 = vadd.f32 %v5278_v56, %v9166_v31 }
0x215b   : > { %v5280_v59 = vsel %vm3529_vm4, %v5279_v58, -inf }
0x215c   : > { %5281 = vmax.xlane.f32.xlu0 %v5280_v59 }
0x2172   : > { %v5114_v60 = vpop.xlane.xlu1 %5113 }
0x2173   : > { %v5115_v61 = vsub.f32 %v5111_v54, %v5114_v60  ;;  %v6985_v54 = vld [vmem:[#allocation10 + $0x1] ss:$0 sm:$0xff] }
0x2175   : > { %v5116_v62 = vmul.f32 1.442695, %v5115_v61 }
0x2177   : > { %7912 = vpow2.f32 %v5116_v62 }
0x2184   : > { %v7913_v63 = vpop.eup %7912 }
0x2185   : > { %v5118_v1 = vsel %vm3529_vm4, %v7913_v63, 0.0 }
0x2186   : > { %5119 = vadd.xlane.f32.xlu0 %v5118_v1 }
0x219c   : > { %5123 = vrot.lane.b32.xlu0 %v5031_v45, %s9571_s8 }
0x21e5   : > { %v5282_v2 = vpop.xlane.xlu0 %5281 }
0x21e6   : > { %v5283_v3 = vsub.f32 %v5279_v58, %v5282_v2  ;;  %v6988_v58 = vld [vmem:[%s9580_s3 + $0x1] ss:$0 sm:$0xff] }
0x21e8   : > { %v5284_v4 = vmul.f32 1.442695, %v5283_v3 }
0x21ea   : > { %7914 = vpow2.f32 %v5284_v4 }
0x21f7   : > { %v7915_v5 = vpop.eup %7914 }
0x21f8   : > { %v5286_v31 = vsel %vm3529_vm4, %v7915_v5, 0.0 }
0x21f9   : > { %5287 = vadd.xlane.f32.xlu1 %v5286_v31 }
0x220a   : > { %5291 = vrot.lane.b32.xlu1 %v5031_v45, %s9570_s0 }
0x220f   : > { %v5120_v6 = vpop.xlane.xlu0 %5119 }
0x2210   : > { %7916 = vrcp.f32 %v5120_v6 }
0x2213   : > { %v5124_v7 = vpop.permute.xlu0 %5123 }
0x2214   : > { %7520 = vmatpush3.msk.msra.mxu1 %vm3547_vm5, %v5124_v7 }
0x2215   : > { %7529 = vmatprep.subr.mxu1 %v8482_v0 }
0x221d   : > { %v7917_v9 = vpop.eup %7916 }
0x221e   : > { %v5122_v10 = vmul.f32 %v7917_v9, %v7913_v63 }
0x2220   : > { %7522 = vmatmul.mubr.msk.f32.vlgmr.msra.gmra.mxu1 %vm3543_vm6, %v5122_v10 }
0x2221   : > { %7531 = vmatprep.mubr.msk.f32.mxu1 %vm8483_vm0, %v8482_v0 }
0x2282   : > { %v5288_v12 = vpop.xlane.xlu1 %5287 }
0x2283   : > { %7918 = vrcp.f32 %v5288_v12 }
0x2286   : > { %v5292_v13 = vpop.permute.xlu1 %5291 }
0x2287   : > { %7530 = vmatpush3.msk.msra.mxu1 %vm3547_vm5, %v5292_v13 }
0x2288   : > { %7541 = vmatprep.subr.mxu1 %v8482_v0 }
0x2290   : > { %v7919_v14 = vpop.eup %7918 }
0x2291   : > { %v5290_v15 = vmul.f32 %v7919_v14, %v7915_v5 }
0x2293   : > { %7532 = vmatmul.mubr.msk.f32.vlgmr.msra.gmra.mxu1 %vm3543_vm6, %v5290_v15 }
0x2294   : > { %7542 = vmatpush3.msra.mxu1 %v6966_v16  ;;  %7545 = vmatprep.mubr.msk.f32.mxu1 %vm8483_vm0, %v8482_v0 }
0x2295   : > { %7543 = vmatprep.subr.mxu1 %v8482_v0 }
0x2296   : > { %7544 = vmatpush3.msra.mxu1 %v6965_v17 }
0x2297   : > { %7559 = vmatprep.subr.mxu1 %v8482_v0 }
0x22e0   : > { %v5196_v20 = vpop.f32.mrf.mxu1 }
0x22e1   : > { %7546 = vmatmul.mubr.msk.f32.vlgmr.msra.gmra.mxu1 %vm1670_vm2, %v5196_v20 }
0x22e2   : > { %7560 = vmatpush3.msra.mxu1 %v5564_v19  ;;  %v7523_v22 = vpop.f32.mrf.mxu1  ;;  %7567 = vmatprep.mubr.msk.f32.mxu1 %vm8483_vm0, %v8482_v0 }
0x22e3   : > { %7561 = vmatprep.subr.mxu1 %v8482_v0 }
0x22e4   : > { %7562 = vmatpush3.msra.mxu1 %v5563_v21 }
0x22e5   : > { %7563 = vmatprep.subr.mxu1 %v8482_v0 }
0x22e6   : > { %7564 = vmatpush3.msra.mxu1 %v5562_v23  ;;  %v5571_v23 = vld [vmem:[#allocation7 + $0x38] sm:$0xff] }
0x22e7   : > { %7565 = vmatprep.subr.mxu1 %v8482_v0 }
0x22e8   : > { %7566 = vmatpush3.msra.mxu1 %v5561_v24 }
0x22e9   : > { %7568 = vmatmul.mubr.msk.f32.vlgmr.msra.gmra.mxu1 %vm1520_vm1, %v9214_v40  ;;  %7575 = vmatprep.subr.mxu1 %v8482_v0 }
0x22ea   : > { %7577 = vmatprep.mubr.msk.f32.mxu1 %vm8483_vm0, %v8482_v0 }
0x2353   : > { %v5364_v25 = vpop.f32.mrf.mxu1 }
0x2354   : > { %7539 = vmatmul.mubr.msk.f32.vlgmr.msra.gmra.mxu0 %vm1670_vm2, %v5364_v25 }
0x2355   : > { %v7533_v26 = vpop.f32.mrf.mxu1  ;;  %7556 = vmatprep.mubr.msk.f32.mxu0 %vm8483_vm0, %v8482_v0  ;;  %7549 = vmatpush3.msra.mxu0 %v5557_v46 }
0x2356   : > { %7550 = vmatprep.subr.mxu0 %v8482_v0 }
0x23a1   : > { %v5510_v8 = vpop.f32.mrf.mxu1 }
0x23a3   : > { %v7547_v27 = vpop.f32.mrf.mxu1 }
0x23a4   : > { %v5569_v27 = vld [vmem:[#allocation7 + $0x28] sm:$0xff] }
0x23a9   : > { %v5725_v28 = vpop.f32.mrf.mxu1 }
0x23aa   : > { %v9370_v45 = vadd.f32 %v6990_v44, %v5725_v28  ;;  %v5568_v28 = vld [vmem:[#allocation7 + $0x20] sm:$0xff] }
0x23ab   : > { %v7569_v29 = vpop.f32.mrf.mxu1 }
0x23ac   : > { %v5570_v29 = vld [vmem:[#allocation7 + $0x30] sm:$0xff] }
0x2414   : > { %v5437_v32 = vpop.f32.mrf.mxu0 }
0x2415   : > { %v5511_v33 = vadd.f32 %v5510_v8, %v5437_v32 }
0x2416   : > { %v7540_v40 = vpop.f32.mrf.mxu0 }
0x2417   : > { %v5520_v34 = vadd.f32 %v6984_v30, %v5511_v33 }
0x2419   : > { %v5521_v35 = vadd.f32 %v5520_v34, %v9302_v38  ;;  %v5556_v38 = vld [vmem:[#allocation2 + $0x30] sm:$0xff] }
0x241a   : > { %7551 = vmatpush3.msra.mxu0 %v5556_v38 }
0x241b   : > { %v5526_v36 = vsel %vm3944_vm7, %v5521_v35, 0.0  ;;  %7552 = vmatprep.subr.mxu0 %v8482_v0 }
0x241c   : > { %5527 = vadd.xlane.f32.xlu1 %v5526_v36  ;;  %7553 = vmatpush3.msra.mxu0 %v5555_v47  ;;  %v7000_v36 = vld [vmem:[#allocation9 + $0x1] ss:$0 sm:$0xff] }
0x241d   : > { %7554 = vmatprep.subr.mxu0 %v8482_v0 }
0x241e   : > { %7555 = vmatpush3.msra.mxu0 %v5554_v48 }
0x241f   : > { %7570 = vmatprep.subr.mxu0 %v8482_v0 }
0x24a5   : > { %v5528_v37 = vpop.xlane.xlu1 %5527 }
0x24a6   : > { %v5529_v39 = vmul.f32 0.03125, %v5528_v37 }
0x24a8   : > { %v5530_v41 = vsub.f32 %v5521_v35, %v5529_v39 }
0x24aa   : > { %v5531_v42 = vmul.f32 %v5530_v41, %v5530_v41 }
0x24ac   : > { %v5532_v43 = vsel %vm3944_vm7, %v5531_v42, 0.0 }
0x24ad   : > { %5533 = vadd.xlane.f32.xlu0 %v5532_v43 }
0x24c3   : > { %5895 = vrot.lane.b32.xlu0 %v9370_v45, %s9569_s6 }
0x2536   : > { %v5534_v49 = vpop.xlane.xlu0 %5533 }
0x2537   : > { %v5535_v50 = vmul.f32 0.03125, %v5534_v49  ;;  %v6248_v49 = vld [vmem:[#allocation19 + $0x38] sm:$0xff] }
0x2539   : > { %v5536_v51 = vadd.f32 1e-05, %v5535_v50  ;;  %v6247_v50 = vld [vmem:[#allocation19 + $0x30] sm:$0xff] }
0x253a   : > { %v5896_v62 = vpop.permute.xlu0 %5895 }
0x253b   : > { %7920 = vrsqrt.f32 %v5536_v51  ;;  %v6246_v51 = vld [vmem:[#allocation19 + $0x28] sm:$0xff] }
0x2548   : > { %v7921_v52 = vpop.eup %7920 }
0x2549   : > { %v5538_v53 = vmul.f32 %v7921_v52, %v5530_v41  ;;  %v6245_v52 = vld [vmem:[#allocation19 + $0x20] sm:$0xff] }
0x254b   : > { %v5545_v56 = vmul.f32 %v6985_v54, %v5538_v53  ;;  %v6255_v54 = vld [vmem:[#allocation22 + $0x38] sm:$0xff] }
0x254d   : > { %v9378_v57 = vadd.f32 %v6986_v55, %v5545_v56 }
0x254f   : > { %7557 = vmatmul.mubr.msk.f32.vlgmr.msra.gmra.mxu0 %vm1520_vm1, %v9378_v57 }
0x2550   : > { %7571 = vmatpush3.xpose.msk.msra.mxu0 %vm1670_vm2, %v9370_v45  ;;  %7572 = vmatprep.mubr.msk.f32.mxu0 %vm8483_vm0, %v8482_v0 }
0x2551   : > { %7580 = vmatprep.subr.mxu0 %v8482_v0 }
0x260f   : > { %v5649_v59 = vpop.f32.mrf.mxu0 }
0x2610   : > { %v5650_v60 = vadd.f32 %v6988_v58, %v5649_v59  ;;  %v7001_v58 = vld [vmem:[#allocation13 + $0x1] ss:$0 sm:$0xff] }
0x2611   : > { %v7558_v61 = vpop.f32.mrf.mxu0 }
0x2612   : > { %5893 = vrot.lane.b32.xlu1 %v5650_v60, %s9569_s6  ;;  %7573 = vmatmul.mubr.msk.f32.vlgmr.msra.gmra.mxu0 %vm1670_vm2, %v5650_v60  ;;  %v7002_v60 = vld [vmem:[#allocation15 + $0x1] ss:$0 sm:$0xff] }
0x2613   : > { %7581 = vmatpush3.xpose.msk.msra.mxu0 %vm1670_vm2, %v5896_v62  ;;  %7582 = vmatprep.mubr.msk.f32.mxu0 %vm8483_vm0, %v8482_v0 }
0x2614   : > { %7590 = vmatprep.subr.mxu0 %v8482_v0 }
0x2684   : > { %v5894_v63 = vpop.permute.xlu1 %5893 }
0x2685   : > { %7583 = vmatmul.mubr.msk.f32.vlgmr.msra.gmra.mxu0 %vm1670_vm2, %v5894_v63  ;;  %v6254_v63 = vld [vmem:[#allocation22 + $0x30] sm:$0xff] }
0x2686   : > { %7594 = vmatprep.mubr.msk.f32.mxu0 %vm8483_vm0, %v8482_v0  ;;  %7591 = vmatpush3.msra.mxu0 %v5571_v23 }
0x2687   : > { %7592 = vmatprep.subr.mxu0 %v8482_v0 }
0x2688   : > { %7593 = vmatpush3.msra.mxu0 %v5570_v29 }
0x2689   : > { %7604 = vmatprep.subr.mxu0 %v8482_v0 }
0x26d2   : > { %v5801_v1 = vpop.f32.mrf.mxu0 }
0x26d3   : > { %v5805_v2 = vmul.f32 0.25, %v5801_v1  ;;  %v6253_v1 = vld [vmem:[#allocation22 + $0x28] sm:$0xff] }
0x26d4   : > { %v7574_v3 = vpop.f32.mrf.mxu0 }
0x26d5   : > { %v5806_v4 = vsel %vm4222_vm8, %v5805_v2, -inf  ;;  %v7003_v3 = vld [vmem:[#allocation21 + $0x1] ss:$0 sm:$0xff] }
0x26d6   : > { %5807 = vmax.xlane.f32.xlu1 %v5806_v4 }
0x2745   : > { %v5967_v5 = vpop.f32.mrf.mxu0 }
0x2746   : > { %v5971_v31 = vmul.f32 0.25, %v5967_v5 }
0x2747   : > { %v7584_v6 = vpop.f32.mrf.mxu0 }
0x2748   : > { %v5972_v7 = vsel %vm4222_vm8, %v5971_v31, -inf }
0x2749   : > { %5973 = vmax.xlane.f32.xlu0 %v5972_v7  ;;  %v7005_v7 = vld [vmem:[#allocation24 + $0x1] ss:$0 sm:$0xff] }
0x275f   : > { %v5808_v9 = vpop.xlane.xlu1 %5807 }
0x2760   : > { %v5809_v10 = vsub.f32 %v5805_v2, %v5808_v9  ;;  %v6252_v2 = vld [vmem:[#allocation22 + $0x20] sm:$0xff] }
0x2762   : > { %v5810_v11 = vmul.f32 1.442695, %v5809_v10 }
0x2764   : > { %7922 = vpow2.f32 %v5810_v11 }
0x2771   : > { %v7923_v12 = vpop.eup %7922 }
0x2772   : > { %v5812_v13 = vsel %vm4222_vm8, %v7923_v12, 0.0 }
0x2773   : > { %5813 = vadd.xlane.f32.xlu0 %v5812_v13 }
0x2789   : > { %5817 = vrot.lane.b32.xlu0 %v9370_v45, %s9571_s8  ;;  %s1495_s8 = scalar_lea.vmem %s8700_s25, %s8917_s2 }
0x27d2   : > { %v5974_v14 = vpop.xlane.xlu0 %5973 }
0x27d3   : > { %v5975_v15 = vsub.f32 %v5971_v31, %v5974_v14 }
0x27d5   : > { %v5976_v16 = vmul.f32 1.442695, %v5975_v15 }
0x27d7   : > { %7924 = vpow2.f32 %v5976_v16 }
0x27e4   : > { %v7925_v17 = vpop.eup %7924 }
0x27e5   : > { %v5978_v18 = vsel %vm4222_vm8, %v7925_v17, 0.0 }
0x27e6   : > { %5979 = vadd.xlane.f32.xlu1 %v5978_v18 }
0x27f7   : > { %5983 = vrot.lane.b32.xlu1 %v9370_v45, %s9570_s0 }
0x27fc   : > { %v5814_v19 = vpop.xlane.xlu0 %5813 }
0x27fd   : > { %7926 = vrcp.f32 %v5814_v19  ;;  %v6452_v19 = vld [vmem:[#allocation25 + $0x18] sm:$0xff] }
0x2800   : > { %v5818_v20 = vpop.permute.xlu0 %5817 }
0x2801   : > { %7576 = vmatpush3.msra.mxu1 %v5818_v20  ;;  %v6451_v20 = vld [vmem:[#allocation25 + $0x10] sm:$0xff] }
0x2802   : > { %7585 = vmatprep.subr.mxu1 %v8482_v0 }
0x280a   : > { %v7927_v21 = vpop.eup %7926 }
0x280b   : > { %v5816_v22 = vmul.f32 %v7927_v21, %v7923_v12  ;;  %v6450_v21 = vld [vmem:[#allocation25 + $0x8] sm:$0xff] }
0x280d   : > { %7578 = vmatmul.mubr.msk.f32.vlgmr.msra.gmra.mxu1 %vm1748_vm3, %v5816_v22  ;;  %v6449_v22 = vld [vmem:[#allocation25] sm:$0xff] }
0x280e   : > { %7587 = vmatprep.mubr.msk.f32.mxu1 %vm8483_vm0, %v8482_v0 }
0x286f   : > { %v5980_v24 = vpop.xlane.xlu1 %5979 }
0x2870   : > { %7928 = vrcp.f32 %v5980_v24 }
0x2873   : > { %v5984_v25 = vpop.permute.xlu1 %5983 }
0x2874   : > { %7586 = vmatpush3.msra.mxu1 %v5984_v25 }
0x2875   : > { %7597 = vmatprep.subr.mxu1 %v8482_v0 }
0x287d   : > { %v7929_v26 = vpop.eup %7928 }
0x287e   : > { %v5982_v8 = vmul.f32 %v7929_v26, %v7925_v17 }
0x2880   : > { %7588 = vmatmul.mubr.msk.f32.vlgmr.msra.gmra.mxu1 %vm1748_vm3, %v5982_v8  ;;  %v7007_v8 = vld [vmem:[#allocation16 + $0x1] ss:$0 sm:$0xff] }
0x2881   : > { %7598 = vmatpush3.msra.mxu1 %v5569_v27  ;;  %7601 = vmatprep.mubr.msk.f32.mxu1 %vm8483_vm0, %v8482_v0 }
0x2882   : > { %7599 = vmatprep.subr.mxu1 %v8482_v0 }
0x2883   : > { %7600 = vmatpush3.msra.mxu1 %v5568_v28  ;;  %v7008_v28 = vld [vmem:[#allocation18 + $0x1] ss:$0 sm:$0xff] }
0x2884   : > { %7615 = vmatprep.subr.mxu1 %v8482_v0 }
0x28cd   : > { %v5889_v30 = vpop.f32.mrf.mxu1 }
0x28ce   : > { %7602 = vmatmul.mubr.msk.f32.vlgmr.msra.gmra.mxu1 %vm1670_vm2, %v5889_v30 }
0x28cf   : > { %v7579_v32 = vpop.f32.mrf.mxu1  ;;  %7623 = vmatprep.mubr.msk.f32.mxu1 %vm8483_vm0, %v8482_v0  ;;  %7616 = vmatpush3.msra.mxu1 %v6255_v54 }
0x28d0   : > { %7617 = vmatprep.subr.mxu1 %v8482_v0  ;;  %v7009_v32 = vld [vmem:[#allocation27] ss:$0 sm:$0xff] }
0x28d1   : > { %7618 = vmatpush3.msra.mxu1 %v6254_v63 }
0x28d2   : > { %7619 = vmatprep.subr.mxu1 %v8482_v0 }
0x28d3   : > { %7620 = vmatpush3.msra.mxu1 %v6253_v1 }
0x28d4   : > { %7621 = vmatprep.subr.mxu1 %v8482_v0 }
0x28d5   : > { %7622 = vmatpush3.msra.mxu1 %v6252_v2 }
0x2940   : > { %v6055_v33 = vpop.f32.mrf.mxu1 }
0x2941   : > { %7595 = vmatmul.mubr.msk.f32.vlgmr.msra.gmra.mxu0 %vm1670_vm2, %v6055_v33 }
0x2942   : > { %v7589_v40 = vpop.f32.mrf.mxu1  ;;  %7612 = vmatprep.mubr.msk.f32.mxu0 %vm8483_vm0, %v8482_v0  ;;  %7605 = vmatpush3.msra.mxu0 %v6248_v49 }
0x2943   : > { %7606 = vmatprep.subr.mxu0 %v8482_v0 }
0x2944   : > { %7607 = vmatpush3.msra.mxu0 %v6247_v50 }
0x2945   : > { %7608 = vmatprep.subr.mxu0 %v8482_v0 }
0x2946   : > { %7609 = vmatpush3.msra.mxu0 %v6246_v51 }
0x2947   : > { %7610 = vmatprep.subr.mxu0 %v8482_v0 }
0x2948   : > { %7611 = vmatpush3.msra.mxu0 %v6245_v52 }
0x2949   : > { %7626 = vmatprep.subr.mxu0 %v8482_v0 }
0x298e   : > { %v6201_v34 = vpop.f32.mrf.mxu1 }
0x2990   : > { %v7603_v35 = vpop.f32.mrf.mxu1 }
0x2a01   : > { %v6128_v37 = vpop.f32.mrf.mxu0 }
0x2a02   : > { %v6202_v39 = vadd.f32 %v6201_v34, %v6128_v37 }
0x2a03   : > { %v7596_v41 = vpop.f32.mrf.mxu0 }
0x2a04   : > { %v6211_v42 = vadd.f32 %v7000_v36, %v6202_v39 }
0x2a06   : > { %v6212_v43 = vadd.f32 %v6211_v42, %v9378_v57 }
0x2a08   : > { %v6217_v44 = vsel %vm3944_vm7, %v6212_v43, 0.0 }
0x2a09   : > { %6218 = vadd.xlane.f32.xlu1 %v6217_v44 }
0x2a92   : > { %v6219_v45 = vpop.xlane.xlu1 %6218 }
0x2a93   : > { %v6220_v46 = vmul.f32 0.03125, %v6219_v45 }
0x2a95   : > { %v6221_v38 = vsub.f32 %v6212_v43, %v6220_v46 }
0x2a97   : > { %v6222_v47 = vmul.f32 %v6221_v38, %v6221_v38 }
0x2a99   : > { %v6223_v48 = vsel %vm3944_vm7, %v6222_v47, 0.0 }
0x2a9a   : > { %6224 = vadd.xlane.f32.xlu0 %v6223_v48 }
0x2b23   : > { %v6225_v53 = vpop.xlane.xlu0 %6224 }
0x2b24   : > { %v6226_v55 = vmul.f32 0.03125, %v6225_v53 }
0x2b26   : > { %v6227_v56 = vadd.f32 1e-05, %v6226_v55 }
0x2b28   : > { %7930 = vrsqrt.f32 %v6227_v56 }
0x2b35   : > { %v7931_v57 = vpop.eup %7930 }
0x2b36   : > { %v6229_v59 = vmul.f32 %v7931_v57, %v6221_v38 }
0x2b38   : > { %v6236_v61 = vmul.f32 %v7001_v58, %v6229_v59 }
0x2b3a   : > { %v6243_v62 = vadd.f32 %v7002_v60, %v6236_v61 }
0x2b3c   : > { %7613 = vmatmul.mubr.msk.f32.vlgmr.msra.gmra.mxu0 %vm1520_vm1, %v6243_v62 }
0x2b3d   : > { %7634 = vmatprep.mubr.msk.f32.mxu0 %vm8483_vm0, %v8482_v0  ;;  %7627 = vmatpush3.msra.mxu0 %v6452_v19 }
0x2b3e   : > { %7628 = vmatprep.subr.mxu0 %v8482_v0 }
0x2b3f   : > { %7629 = vmatpush3.msra.mxu0 %v6451_v20 }
0x2b40   : > { %7630 = vmatprep.subr.mxu0 %v8482_v0 }
0x2b41   : > { %7631 = vmatpush3.msra.mxu0 %v6450_v21 }
0x2b42   : > { %7632 = vmatprep.subr.mxu0 %v8482_v0 }
0x2b43   : > { %7633 = vmatpush3.msra.mxu0 %v6449_v22 }
0x2bfc   : > { %v6333_v4 = vpop.f32.mrf.mxu0 }
0x2bfd   : > { %v6334_v5 = vadd.f32 %v7003_v3, %v6333_v4 }
0x2bfe   : > { %v7614_v31 = vpop.f32.mrf.mxu0 }
0x2bff   : > { %v6337_v6 = vmax.f32 %v6334_v5, 0.0 }
0x2c01   : > { %7624 = vmatmul.mubr.msk.f32.vlgmr.msra.gmra.mxu1 %vm1520_vm1, %v6337_v6 }
0x2cc1   : > { %v6413_v9 = vpop.f32.mrf.mxu1 }
0x2cc2   : > { %v6414_v10 = vadd.f32 %v7005_v7, %v6413_v9 }
0x2cc3   : > { %v7625_v11 = vpop.f32.mrf.mxu1 }
0x2cc4   : > { %v6417_v12 = vadd.f32 %v6414_v10, %v6243_v62 }
0x2cc6   : > { %v6422_v13 = vsel %vm3944_vm7, %v6417_v12, 0.0 }
0x2cc7   : > { %6423 = vadd.xlane.f32.xlu0 %v6422_v13 }
0x2d50   : > { %v6424_v14 = vpop.xlane.xlu0 %6423 }
0x2d51   : > { %v6425_v15 = vmul.f32 0.03125, %v6424_v14 }
0x2d53   : > { %v6426_v16 = vsub.f32 %v6417_v12, %v6425_v15 }
0x2d55   : > { %v6427_v17 = vmul.f32 %v6426_v16, %v6426_v16 }
0x2d57   : > { %v6428_v18 = vsel %vm3944_vm7, %v6427_v17, 0.0 }
0x2d58   : > { %6429 = vadd.xlane.f32.xlu1 %v6428_v18 }
0x2de1   : > { %v6430_v23 = vpop.xlane.xlu1 %6429 }
0x2de2   : > { %v6431_v24 = vmul.f32 0.03125, %v6430_v23 }
0x2de4   : > { %v6432_v25 = vadd.f32 1e-05, %v6431_v24 }
0x2de6   : > { %7932 = vrsqrt.f32 %v6432_v25 }
0x2df3   : > { %v7933_v26 = vpop.eup %7932 }
0x2df4   : > { %v6434_v27 = vmul.f32 %v7933_v26, %v6426_v16 }
0x2df6   : > { %v6441_v29 = vmul.f32 %v7007_v8, %v6434_v27 }
0x2df8   : > { %v6448_v30 = vadd.f32 %v7008_v28, %v6441_v29 }
0x2dfa   : > { %7635 = vmatmul.mubr.msk.f32.vlgmr.msra.gmra.mxu0 %vm1520_vm1, %v6448_v30 }
0x2eba   : > { %v6529_v33 = vpop.f32.mrf.mxu0 }
0x2ebb   : > { %v6530_v40 = vadd.f32 %v7009_v32, %v6529_v33 }
0x2ebc   : > { %v7636_v34 = vpop.f32.mrf.mxu0 }
0x2ebd   : > { %6533 = vst [vmem:[%s1495_s8] sm:$0x3f] %v6530_v40 }
0x2ebe PF: > { %s102_s7 = sadd.s32 1, %s8418_s7  }
0x2ebf   : > { %p99_p5 = scmp.ge.s32.totalorder %s102_s7, 4  }
0x2ec1   :  { %101 = sbr.rel (!%p99_p5) target bundleno = 86 (0x56), region = 363 }
0x2ec6   :  { %6553 = vsyncpa [#allocation3], 1 }
0x2ec7   :  { %6555 = vsyncpa [#allocation3 + $0x1], 1 }
0x2ec8   :  { %6556 = vsyncpa [#allocation5], 1 }
0x2ec9   :  { %6557 = vsyncpa [#allocation8], 1 }
0x2eca   :  { %6558 = vsyncpa [#allocation11], 1 }
0x2ecb   :  { %6559 = vsyncpa [#allocation14], 1 }
0x2ecc   :  { %6560 = vsyncpa [#allocation17], 1 }
0x2ecd   :  { %6561 = vsyncpa [#allocation20], 1 }
0x2ece   :  { %6562 = vsyncpa [#allocation23], 1 }
0x2ecf   :  { %6563 = vsyncpa [#allocation26], 1 }

</bundles_post_ra>
